<compile_context>
chip_gen: v7x
topology: tpu7x:2x2x1
jax: 0.10.0
libtpu: 0.0.40
codegen_flags: <defaults>
</compile_context>

<pallas_src>
import functools

import jax
import jax.numpy as jnp
from jax.experimental import pallas as pl
from jax.experimental.pallas import tpu as pltpu

_EPS = 1e-5   # nn.BatchNorm2d default eps
_KS = 5       # conv kernel size
_PAD = 2      # 'same' padding for k=5, stride=1


def _round_up(x, m):
    return (x + m - 1) // m * m


def _full_spec(shape):
    zeros = (0,) * len(shape)
    return pl.BlockSpec(shape, lambda i, _z=zeros: _z)


def _conv_block_kernel(x_ref, w_ref, b_ref, g_ref, beta_ref, mask_ref,
                       o_ref, p_ref, y_ref, *, cin, n, h, w, wpad):
    """Fused Conv(5x5,'same') + BatchNorm(train) + ReLU + 2x2-max epilogue.

    x_ref   : (Cin, Lx)       padded input, positions flattened on lanes
    w_ref   : (Cout, Kpad)    bf16 weights, K ordered (kh, kw, cin)
    b/g/beta: (Cout, 1)       conv bias / BN gamma / BN beta
    mask_ref: (1, L)          1.0 on valid (h < H, w < W) output positions
    o_ref   : (Cout, L)       pooled map: max over the 2x2 window rooted at q
    p_ref   : (Kpad, L)       VMEM scratch: in-VMEM im2col patches
    y_ref   : (Cout, L+tail)  VMEM scratch for the shifted pooling reads
    """
    L = o_ref.shape[1]
    cout = o_ref.shape[0]
    ktaps = _KS * _KS * cin
    kpad = p_ref.shape[0]
    tail = y_ref.shape[1] - L

    # ---- in-VMEM im2col: 25 shifted views of the padded input (no HBM blowup) ----
    for kh in range(_KS):
        for kw in range(_KS):
            t = kh * _KS + kw
            off = kh * wpad + kw
            p_ref[t * cin:(t + 1) * cin, :] = x_ref[:, off:off + L]
    if kpad > ktaps:                       # zero the K alignment padding rows
        p_ref[ktaps:kpad, :] = jnp.zeros((kpad - ktaps, L), jnp.float32)

    # ---- conv as one MXU matmul: (Cout, Kpad) @ (Kpad, L), f32 accumulation ----
    acc = jnp.dot(w_ref[...], p_ref[...].astype(jnp.bfloat16),
                  preferred_element_type=jnp.float32)
    acc = acc + b_ref[...]                                     # conv bias

    # ---- BatchNorm2d training mode: biased stats over the valid N*H*W ----
    m = mask_ref[...]
    inv_cnt = 1.0 / float(n * h * w)
    mean = jnp.sum(acc * m, axis=1, keepdims=True) * inv_cnt   # (Cout, 1)
    cen = acc - mean
    var = jnp.sum(cen * cen * m, axis=1, keepdims=True) * inv_cnt
    y = cen * jax.lax.rsqrt(var + _EPS) * g_ref[...] + beta_ref[...]
    y = jnp.maximum(y, 0.0)                                    # ReLU (f32 VPU)

    # ---- fused MaxPool2d(2,2) reduction: max over the 4 window corners ----
    y_ref[:, 0:L] = y
    y_ref[:, L:L + tail] = jnp.zeros((cout, tail), jnp.float32)
    c01 = y_ref[:, 1:1 + L]
    c10 = y_ref[:, wpad:wpad + L]
    c11 = y_ref[:, wpad + 1:wpad + 1 + L]
    o_ref[...] = jnp.maximum(jnp.maximum(y, c01), jnp.maximum(c10, c11))


def _conv_block(x_cfirst, w_oihw, bias, gamma, beta):
    """Conv2d(k=5,s=1,p=2) + BatchNorm2d(train) + ReLU + MaxPool2d(2,2).

    x_cfirst: (Cin, N, H, W) f32.  Returns (Cout, N, H//2, W//2) f32.
    """
    cin, n, h, w = x_cfirst.shape
    cout = w_oihw.shape[0]
    hpad, wpad = h + 2 * _PAD, w + 2 * _PAD
    L = n * hpad * wpad
    ktaps = _KS * _KS * cin
    kpad = _round_up(ktaps, 8)
    in_tail = _round_up((_KS - 1) * wpad + (_KS - 1), 128)
    pool_tail = 128

    # zero-pad spatially, flatten positions onto lanes; a small lane tail keeps
    # the in-kernel shifted tap views in bounds
    xp = jnp.pad(x_cfirst, ((0, 0), (0, 0), (_PAD, _PAD), (_PAD, _PAD)))
    xflat = jnp.pad(xp.reshape(cin, L), ((0, 0), (0, in_tail)))

    # weights -> (Cout, (kh, kw, cin)), zero-padded K, bf16 MXU operands
    w2 = jnp.transpose(w_oihw, (0, 2, 3, 1)).reshape(cout, ktaps)
    w2 = jnp.pad(w2, ((0, 0), (0, kpad - ktaps))).astype(jnp.bfloat16)

    # validity mask of real conv-output positions inside the padded grid
    mask = jnp.pad(jnp.ones((n, h, w), jnp.float32),
                   ((0, 0), (0, 2 * _PAD), (0, 2 * _PAD))).reshape(1, L)

    kernel = functools.partial(_conv_block_kernel, cin=cin, n=n, h=h, w=w,
                               wpad=wpad)
    pooled_map = pl.pallas_call(
        kernel,
        out_shape=jax.ShapeDtypeStruct((cout, L), jnp.float32),
        grid=(1,),
        in_specs=[_full_spec(xflat.shape), _full_spec(w2.shape),
                  _full_spec((cout, 1)), _full_spec((cout, 1)),
                  _full_spec((cout, 1)), _full_spec(mask.shape)],
        out_specs=_full_spec((cout, L)),
        scratch_shapes=[pltpu.VMEM((kpad, L), jnp.float32),
                        pltpu.VMEM((cout, L + pool_tail), jnp.float32)],
        compiler_params=pltpu.CompilerParams(
            dimension_semantics=("arbitrary",),
            vmem_limit_bytes=32 * 1024 * 1024),
    )(xflat, w2, bias.reshape(cout, 1), gamma.reshape(cout, 1),
      beta.reshape(cout, 1), mask)

    # stride-2 decimation of the fused pooled map -> (Cout, N, H//2, W//2)
    pm = pooled_map.reshape(cout, n, hpad, wpad)
    return pm[:, :, 0:h:2, 0:w:2]


def init_params(key):
    ks = jax.random.split(key, 6)
    return {
        "w1": jax.random.normal(ks[0], (6, 1, 5, 5), jnp.float32) * 0.1,
        "b1": jax.random.normal(ks[1], (6,), jnp.float32) * 0.1,
        "g1": jnp.ones((6,), jnp.float32),    # BN gamma default init
        "be1": jnp.zeros((6,), jnp.float32),  # BN beta default init
        "w2": jax.random.normal(ks[2], (16, 6, 5, 5), jnp.float32) * 0.1,
        "b2": jax.random.normal(ks[3], (16,), jnp.float32) * 0.1,
        "g2": jnp.ones((16,), jnp.float32),
        "be2": jnp.zeros((16,), jnp.float32),
        # fc weight stored pre-transposed (784, 12) so forward never transposes
        "wfc_t": jax.random.normal(ks[4], (28 * 28, 12), jnp.float32) * 0.05,
        "bfc": jax.random.normal(ks[5], (12,), jnp.float32) * 0.05,
    }


@jax.jit
def cnn_forward(x_nchw, params):
    n = x_nchw.shape[0]
    x = jnp.transpose(x_nchw, (1, 0, 2, 3))        # NCHW -> (C, N, H, W)
    out = _conv_block(x, params["w1"], params["b1"], params["g1"], params["be1"])
    out = _conv_block(out, params["w2"], params["b2"], params["g2"], params["be2"])
    # match PyTorch out.reshape(N, -1) on NCHW: flatten in (C, H, W) order
    flat = jnp.transpose(out, (1, 0, 2, 3)).reshape(n, -1)   # (N, 16*7*7)
    # tiny 784x12 Linear left to plain XLA (cheaper than a pallas_call launch)
    return flat @ params["wfc_t"] + params["bfc"]


if __name__ == "__main__":
    key = jax.random.PRNGKey(0)
    kx, kp = jax.random.split(key)
    # fc expects 16*7*7 = 784 features -> input spatial must be 28x28 (MNIST-like)
    x = jax.random.normal(kx, (2, 1, 28, 28), jnp.float32)
    params = init_params(kp)
    out = jax.block_until_ready(cnn_forward(x, params))
    assert out.shape == (2, 12) and out.dtype == jnp.float32
    assert bool(jnp.all(jnp.isfinite(out)))
    print("KERNEL_OK")
</pallas_src>

<mosaic_0001>
module attributes {stable_mosaic.version = 11 : i64} {
  func.func @_conv_block_kernel(%arg0: i32, %arg1: memref<1x2304xf32, #tpu.memory_space<vmem>>, %arg2: memref<6x32xbf16, #tpu.memory_space<vmem>>, %arg3: memref<6x1xf32, #tpu.memory_space<vmem>>, %arg4: memref<6x1xf32, #tpu.memory_space<vmem>>, %arg5: memref<6x1xf32, #tpu.memory_space<vmem>>, %arg6: memref<1x2048xf32, #tpu.memory_space<vmem>>, %arg7: memref<6x2048xf32, #tpu.memory_space<vmem>>, %arg8: memref<32x2048xf32, #tpu.memory_space<vmem>>, %arg9: memref<6x2176xf32, #tpu.memory_space<vmem>>) attributes {dimension_semantics = [#tpu.dimension_semantics<arbitrary>], iteration_bounds = array<i64: 1>, scalar_prefetch = 0 : i64, scratch_operands = 2 : i64, tpu.core_type = #tpu.core_type<tc>, window_params = [{pipeline_mode = #tpu.pipeline_mode<synchronous>, transform_indices = @transform_0, window_bounds = array<i64: 1, 2304>}, {pipeline_mode = #tpu.pipeline_mode<synchronous>, transform_indices = @transform_1, window_bounds = array<i64: 6, 32>}, {pipeline_mode = #tpu.pipeline_mode<synchronous>, transform_indices = @transform_2, window_bounds = array<i64: 6, 1>}, {pipeline_mode = #tpu.pipeline_mode<synchronous>, transform_indices = @transform_3, window_bounds = array<i64: 6, 1>}, {pipeline_mode = #tpu.pipeline_mode<synchronous>, transform_indices = @transform_4, window_bounds = array<i64: 6, 1>}, {pipeline_mode = #tpu.pipeline_mode<synchronous>, transform_indices = @transform_5, window_bounds = array<i64: 1, 2048>}, {pipeline_mode = #tpu.pipeline_mode<synchronous>, transform_indices = @transform_6, window_bounds = array<i64: 6, 2048>}]} {
    %c0 = arith.constant 0 : index
    %c0_0 = arith.constant 0 : index
    %0 = vector.load %arg1[%c0, %c0_0] : memref<1x2304xf32, #tpu.memory_space<vmem>>, vector<1x2048xf32>
    %c0_1 = arith.constant 0 : index
    %c0_2 = arith.constant 0 : index
    %1 = vector.load %arg8[%c0_1, %c0_2] : memref<32x2048xf32, #tpu.memory_space<vmem>>, vector<1x2048xf32>
    tpu.vector_store %arg8[%c0_1, %c0_2], %0 {strides = array<i32>} : memref<32x2048xf32, #tpu.memory_space<vmem>>, vector<1x2048xf32>,
    %c0_3 = arith.constant 0 : index
    %c1 = arith.constant 1 : index
    %2 = vector.load %arg1[%c0_3, %c1] : memref<1x2304xf32, #tpu.memory_space<vmem>>, vector<1x2048xf32>
    %c1_4 = arith.constant 1 : index
    %c0_5 = arith.constant 0 : index
    %3 = vector.load %arg8[%c1_4, %c0_5] : memref<32x2048xf32, #tpu.memory_space<vmem>>, vector<1x2048xf32>
    tpu.vector_store %arg8[%c1_4, %c0_5], %2 {strides = array<i32>} : memref<32x2048xf32, #tpu.memory_space<vmem>>, vector<1x2048xf32>,
    %c0_6 = arith.constant 0 : index
    %c2 = arith.constant 2 : index
    %4 = vector.load %arg1[%c0_6, %c2] : memref<1x2304xf32, #tpu.memory_space<vmem>>, vector<1x2048xf32>
    %c2_7 = arith.constant 2 : index
    %c0_8 = arith.constant 0 : index
    %5 = vector.load %arg8[%c2_7, %c0_8] : memref<32x2048xf32, #tpu.memory_space<vmem>>, vector<1x2048xf32>
    tpu.vector_store %arg8[%c2_7, %c0_8], %4 {strides = array<i32>} : memref<32x2048xf32, #tpu.memory_space<vmem>>, vector<1x2048xf32>,
    %c0_9 = arith.constant 0 : index
    %c3 = arith.constant 3 : index
    %6 = vector.load %arg1[%c0_9, %c3] : memref<1x2304xf32, #tpu.memory_space<vmem>>, vector<1x2048xf32>
    %c3_10 = arith.constant 3 : index
    %c0_11 = arith.constant 0 : index
    %7 = vector.load %arg8[%c3_10, %c0_11] : memref<32x2048xf32, #tpu.memory_space<vmem>>, vector<1x2048xf32>
    tpu.vector_store %arg8[%c3_10, %c0_11], %6 {strides = array<i32>} : memref<32x2048xf32, #tpu.memory_space<vmem>>, vector<1x2048xf32>,
    %c0_12 = arith.constant 0 : index
    %c4 = arith.constant 4 : index
    %8 = vector.load %arg1[%c0_12, %c4] : memref<1x2304xf32, #tpu.memory_space<vmem>>, vector<1x2048xf32>
    %c4_13 = arith.constant 4 : index
    %c0_14 = arith.constant 0 : index
    %9 = vector.load %arg8[%c4_13, %c0_14] : memref<32x2048xf32, #tpu.memory_space<vmem>>, vector<1x2048xf32>
    tpu.vector_store %arg8[%c4_13, %c0_14], %8 {strides = array<i32>} : memref<32x2048xf32, #tpu.memory_space<vmem>>, vector<1x2048xf32>,
    %c0_15 = arith.constant 0 : index
    %c32 = arith.constant 32 : index
    %10 = vector.load %arg1[%c0_15, %c32] : memref<1x2304xf32, #tpu.memory_space<vmem>>, vector<1x2048xf32>
    %c5 = arith.constant 5 : index
    %c0_16 = arith.constant 0 : index
    %11 = vector.load %arg8[%c5, %c0_16] : memref<32x2048xf32, #tpu.memory_space<vmem>>, vector<1x2048xf32>
    tpu.vector_store %arg8[%c5, %c0_16], %10 {strides = array<i32>} : memref<32x2048xf32, #tpu.memory_space<vmem>>, vector<1x2048xf32>,
    %c0_17 = arith.constant 0 : index
    %c33 = arith.constant 33 : index
    %12 = vector.load %arg1[%c0_17, %c33] : memref<1x2304xf32, #tpu.memory_space<vmem>>, vector<1x2048xf32>
    %c6 = arith.constant 6 : index
    %c0_18 = arith.constant 0 : index
    %13 = vector.load %arg8[%c6, %c0_18] : memref<32x2048xf32, #tpu.memory_space<vmem>>, vector<1x2048xf32>
    tpu.vector_store %arg8[%c6, %c0_18], %12 {strides = array<i32>} : memref<32x2048xf32, #tpu.memory_space<vmem>>, vector<1x2048xf32>,
    %c0_19 = arith.constant 0 : index
    %c34 = arith.constant 34 : index
    %14 = vector.load %arg1[%c0_19, %c34] : memref<1x2304xf32, #tpu.memory_space<vmem>>, vector<1x2048xf32>
    %c7 = arith.constant 7 : index
    %c0_20 = arith.constant 0 : index
    %15 = vector.load %arg8[%c7, %c0_20] : memref<32x2048xf32, #tpu.memory_space<vmem>>, vector<1x2048xf32>
    tpu.vector_store %arg8[%c7, %c0_20], %14 {strides = array<i32>} : memref<32x2048xf32, #tpu.memory_space<vmem>>, vector<1x2048xf32>,
    %c0_21 = arith.constant 0 : index
    %c35 = arith.constant 35 : index
    %16 = vector.load %arg1[%c0_21, %c35] : memref<1x2304xf32, #tpu.memory_space<vmem>>, vector<1x2048xf32>
    %c8 = arith.constant 8 : index
    %c0_22 = arith.constant 0 : index
    %17 = vector.load %arg8[%c8, %c0_22] : memref<32x2048xf32, #tpu.memory_space<vmem>>, vector<1x2048xf32>
    tpu.vector_store %arg8[%c8, %c0_22], %16 {strides = array<i32>} : memref<32x2048xf32, #tpu.memory_space<vmem>>, vector<1x2048xf32>,
    %c0_23 = arith.constant 0 : index
    %c36 = arith.constant 36 : index
    %18 = vector.load %arg1[%c0_23, %c36] : memref<1x2304xf32, #tpu.memory_space<vmem>>, vector<1x2048xf32>
    %c9 = arith.constant 9 : index
    %c0_24 = arith.constant 0 : index
    %19 = vector.load %arg8[%c9, %c0_24] : memref<32x2048xf32, #tpu.memory_space<vmem>>, vector<1x2048xf32>
    tpu.vector_store %arg8[%c9, %c0_24], %18 {strides = array<i32>} : memref<32x2048xf32, #tpu.memory_space<vmem>>, vector<1x2048xf32>,
    %c0_25 = arith.constant 0 : index
    %c64 = arith.constant 64 : index
    %20 = vector.load %arg1[%c0_25, %c64] : memref<1x2304xf32, #tpu.memory_space<vmem>>, vector<1x2048xf32>
    %c10 = arith.constant 10 : index
    %c0_26 = arith.constant 0 : index
    %21 = vector.load %arg8[%c10, %c0_26] : memref<32x2048xf32, #tpu.memory_space<vmem>>, vector<1x2048xf32>
    tpu.vector_store %arg8[%c10, %c0_26], %20 {strides = array<i32>} : memref<32x2048xf32, #tpu.memory_space<vmem>>, vector<1x2048xf32>,
    %c0_27 = arith.constant 0 : index
    %c65 = arith.constant 65 : index
    %22 = vector.load %arg1[%c0_27, %c65] : memref<1x2304xf32, #tpu.memory_space<vmem>>, vector<1x2048xf32>
    %c11 = arith.constant 11 : index
    %c0_28 = arith.constant 0 : index
    %23 = vector.load %arg8[%c11, %c0_28] : memref<32x2048xf32, #tpu.memory_space<vmem>>, vector<1x2048xf32>
    tpu.vector_store %arg8[%c11, %c0_28], %22 {strides = array<i32>} : memref<32x2048xf32, #tpu.memory_space<vmem>>, vector<1x2048xf32>,
    %c0_29 = arith.constant 0 : index
    %c66 = arith.constant 66 : index
    %24 = vector.load %arg1[%c0_29, %c66] : memref<1x2304xf32, #tpu.memory_space<vmem>>, vector<1x2048xf32>
    %c12 = arith.constant 12 : index
    %c0_30 = arith.constant 0 : index
    %25 = vector.load %arg8[%c12, %c0_30] : memref<32x2048xf32, #tpu.memory_space<vmem>>, vector<1x2048xf32>
    tpu.vector_store %arg8[%c12, %c0_30], %24 {strides = array<i32>} : memref<32x2048xf32, #tpu.memory_space<vmem>>, vector<1x2048xf32>,
    %c0_31 = arith.constant 0 : index
    %c67 = arith.constant 67 : index
    %26 = vector.load %arg1[%c0_31, %c67] : memref<1x2304xf32, #tpu.memory_space<vmem>>, vector<1x2048xf32>
    %c13 = arith.constant 13 : index
    %c0_32 = arith.constant 0 : index
    %27 = vector.load %arg8[%c13, %c0_32] : memref<32x2048xf32, #tpu.memory_space<vmem>>, vector<1x2048xf32>
    tpu.vector_store %arg8[%c13, %c0_32], %26 {strides = array<i32>} : memref<32x2048xf32, #tpu.memory_space<vmem>>, vector<1x2048xf32>,
    %c0_33 = arith.constant 0 : index
    %c68 = arith.constant 68 : index
    %28 = vector.load %arg1[%c0_33, %c68] : memref<1x2304xf32, #tpu.memory_space<vmem>>, vector<1x2048xf32>
    %c14 = arith.constant 14 : index
    %c0_34 = arith.constant 0 : index
    %29 = vector.load %arg8[%c14, %c0_34] : memref<32x2048xf32, #tpu.memory_space<vmem>>, vector<1x2048xf32>
    tpu.vector_store %arg8[%c14, %c0_34], %28 {strides = array<i32>} : memref<32x2048xf32, #tpu.memory_space<vmem>>, vector<1x2048xf32>,
    %c0_35 = arith.constant 0 : index
    %c96 = arith.constant 96 : index
    %30 = vector.load %arg1[%c0_35, %c96] : memref<1x2304xf32, #tpu.memory_space<vmem>>, vector<1x2048xf32>
    %c15 = arith.constant 15 : index
    %c0_36 = arith.constant 0 : index
    %31 = vector.load %arg8[%c15, %c0_36] : memref<32x2048xf32, #tpu.memory_space<vmem>>, vector<1x2048xf32>
    tpu.vector_store %arg8[%c15, %c0_36], %30 {strides = array<i32>} : memref<32x2048xf32, #tpu.memory_space<vmem>>, vector<1x2048xf32>,
    %c0_37 = arith.constant 0 : index
    %c97 = arith.constant 97 : index
    %32 = vector.load %arg1[%c0_37, %c97] : memref<1x2304xf32, #tpu.memory_space<vmem>>, vector<1x2048xf32>
    %c16 = arith.constant 16 : index
    %c0_38 = arith.constant 0 : index
    %33 = vector.load %arg8[%c16, %c0_38] : memref<32x2048xf32, #tpu.memory_space<vmem>>, vector<1x2048xf32>
    tpu.vector_store %arg8[%c16, %c0_38], %32 {strides = array<i32>} : memref<32x2048xf32, #tpu.memory_space<vmem>>, vector<1x2048xf32>,
    %c0_39 = arith.constant 0 : index
    %c98 = arith.constant 98 : index
    %34 = vector.load %arg1[%c0_39, %c98] : memref<1x2304xf32, #tpu.memory_space<vmem>>, vector<1x2048xf32>
    %c17 = arith.constant 17 : index
    %c0_40 = arith.constant 0 : index
    %35 = vector.load %arg8[%c17, %c0_40] : memref<32x2048xf32, #tpu.memory_space<vmem>>, vector<1x2048xf32>
    tpu.vector_store %arg8[%c17, %c0_40], %34 {strides = array<i32>} : memref<32x2048xf32, #tpu.memory_space<vmem>>, vector<1x2048xf32>,
    %c0_41 = arith.constant 0 : index
    %c99 = arith.constant 99 : index
    %36 = vector.load %arg1[%c0_41, %c99] : memref<1x2304xf32, #tpu.memory_space<vmem>>, vector<1x2048xf32>
    %c18 = arith.constant 18 : index
    %c0_42 = arith.constant 0 : index
    %37 = vector.load %arg8[%c18, %c0_42] : memref<32x2048xf32, #tpu.memory_space<vmem>>, vector<1x2048xf32>
    tpu.vector_store %arg8[%c18, %c0_42], %36 {strides = array<i32>} : memref<32x2048xf32, #tpu.memory_space<vmem>>, vector<1x2048xf32>,
    %c0_43 = arith.constant 0 : index
    %c100 = arith.constant 100 : index
    %38 = vector.load %arg1[%c0_43, %c100] : memref<1x2304xf32, #tpu.memory_space<vmem>>, vector<1x2048xf32>
    %c19 = arith.constant 19 : index
    %c0_44 = arith.constant 0 : index
    %39 = vector.load %arg8[%c19, %c0_44] : memref<32x2048xf32, #tpu.memory_space<vmem>>, vector<1x2048xf32>
    tpu.vector_store %arg8[%c19, %c0_44], %38 {strides = array<i32>} : memref<32x2048xf32, #tpu.memory_space<vmem>>, vector<1x2048xf32>,
    %c0_45 = arith.constant 0 : index
    %c128 = arith.constant 128 : index
    %40 = vector.load %arg1[%c0_45, %c128] : memref<1x2304xf32, #tpu.memory_space<vmem>>, vector<1x2048xf32>
    %c20 = arith.constant 20 : index
    %c0_46 = arith.constant 0 : index
    %41 = vector.load %arg8[%c20, %c0_46] : memref<32x2048xf32, #tpu.memory_space<vmem>>, vector<1x2048xf32>
    tpu.vector_store %arg8[%c20, %c0_46], %40 {strides = array<i32>} : memref<32x2048xf32, #tpu.memory_space<vmem>>, vector<1x2048xf32>,
    %c0_47 = arith.constant 0 : index
    %c129 = arith.constant 129 : index
    %42 = vector.load %arg1[%c0_47, %c129] : memref<1x2304xf32, #tpu.memory_space<vmem>>, vector<1x2048xf32>
    %c21 = arith.constant 21 : index
    %c0_48 = arith.constant 0 : index
    %43 = vector.load %arg8[%c21, %c0_48] : memref<32x2048xf32, #tpu.memory_space<vmem>>, vector<1x2048xf32>
    tpu.vector_store %arg8[%c21, %c0_48], %42 {strides = array<i32>} : memref<32x2048xf32, #tpu.memory_space<vmem>>, vector<1x2048xf32>,
    %c0_49 = arith.constant 0 : index
    %c130 = arith.constant 130 : index
    %44 = vector.load %arg1[%c0_49, %c130] : memref<1x2304xf32, #tpu.memory_space<vmem>>, vector<1x2048xf32>
    %c22 = arith.constant 22 : index
    %c0_50 = arith.constant 0 : index
    %45 = vector.load %arg8[%c22, %c0_50] : memref<32x2048xf32, #tpu.memory_space<vmem>>, vector<1x2048xf32>
    tpu.vector_store %arg8[%c22, %c0_50], %44 {strides = array<i32>} : memref<32x2048xf32, #tpu.memory_space<vmem>>, vector<1x2048xf32>,
    %c0_51 = arith.constant 0 : index
    %c131 = arith.constant 131 : index
    %46 = vector.load %arg1[%c0_51, %c131] : memref<1x2304xf32, #tpu.memory_space<vmem>>, vector<1x2048xf32>
    %c23 = arith.constant 23 : index
    %c0_52 = arith.constant 0 : index
    %47 = vector.load %arg8[%c23, %c0_52] : memref<32x2048xf32, #tpu.memory_space<vmem>>, vector<1x2048xf32>
    tpu.vector_store %arg8[%c23, %c0_52], %46 {strides = array<i32>} : memref<32x2048xf32, #tpu.memory_space<vmem>>, vector<1x2048xf32>,
    %c0_53 = arith.constant 0 : index
    %c132 = arith.constant 132 : index
    %48 = vector.load %arg1[%c0_53, %c132] : memref<1x2304xf32, #tpu.memory_space<vmem>>, vector<1x2048xf32>
    %c24 = arith.constant 24 : index
    %c0_54 = arith.constant 0 : index
    %49 = vector.load %arg8[%c24, %c0_54] : memref<32x2048xf32, #tpu.memory_space<vmem>>, vector<1x2048xf32>
    tpu.vector_store %arg8[%c24, %c0_54], %48 {strides = array<i32>} : memref<32x2048xf32, #tpu.memory_space<vmem>>, vector<1x2048xf32>,
    %cst = arith.constant 0.000000e+00 : f32
    %50 = vector.broadcast %cst : f32 to vector<7x2048xf32>
    %c25 = arith.constant 25 : index
    %c0_55 = arith.constant 0 : index
    %51 = vector.load %arg8[%c25, %c0_55] : memref<32x2048xf32, #tpu.memory_space<vmem>>, vector<7x2048xf32>
    tpu.vector_store %arg8[%c25, %c0_55], %50 {strides = array<i32>} : memref<32x2048xf32, #tpu.memory_space<vmem>>, vector<7x2048xf32>,
    %c0_56 = arith.constant 0 : index
    %c0_57 = arith.constant 0 : index
    %52 = vector.load %arg2[%c0_56, %c0_57] : memref<6x32xbf16, #tpu.memory_space<vmem>>, vector<6x32xbf16>
    %c0_58 = arith.constant 0 : index
    %c0_59 = arith.constant 0 : index
    %53 = vector.load %arg8[%c0_58, %c0_59] : memref<32x2048xf32, #tpu.memory_space<vmem>>, vector<32x2048xf32>
    %54 = arith.truncf %53 : vector<32x2048xf32> to vector<32x2048xbf16>
    %cst_60 = arith.constant dense<0.000000e+00> : vector<6x2048xf32>
    %55 = tpu.matmul %52, %54, %cst_60 {dimension_numbers = #tpu.dot_dimension_numbers<[1], [0], [0], [1], [0, 0, 1, 1], [], []>} : vector<6x32xbf16>, vector<32x2048xbf16>, vector<6x2048xf32> -> vector<6x2048xf32>
    %c0_61 = arith.constant 0 : index
    %c0_62 = arith.constant 0 : index
    %56 = vector.load %arg3[%c0_61, %c0_62] : memref<6x1xf32, #tpu.memory_space<vmem>>, vector<6x1xf32>
    %57 = vector.broadcast %56 : vector<6x1xf32> to vector<6x2048xf32>
    %58 = arith.addf %55, %57 : vector<6x2048xf32>
    %c0_63 = arith.constant 0 : index
    %c0_64 = arith.constant 0 : index
    %59 = vector.load %arg6[%c0_63, %c0_64] : memref<1x2048xf32, #tpu.memory_space<vmem>>, vector<1x2048xf32>
    %60 = vector.broadcast %59 : vector<1x2048xf32> to vector<6x2048xf32>
    %61 = arith.mulf %58, %60 : vector<6x2048xf32>
    %cst_65 = arith.constant dense<0.000000e+00> : vector<6xf32>
    %62 = vector.multi_reduction <add>, %61, %cst_65 [1] : vector<6x2048xf32> to vector<6xf32>
    %63 = vector.shape_cast %62 : vector<6xf32> to vector<6x1xf32>
    %cst_66 = arith.constant 6.37755089E-4 : f32
    %64 = vector.broadcast %cst_66 : f32 to vector<6x1xf32>
    %65 = arith.mulf %63, %64 : vector<6x1xf32>
    %66 = vector.broadcast %65 : vector<6x1xf32> to vector<6x2048xf32>
    %67 = arith.subf %58, %66 : vector<6x2048xf32>
    %68 = arith.mulf %67, %67 : vector<6x2048xf32>
    %69 = vector.broadcast %59 : vector<1x2048xf32> to vector<6x2048xf32>
    %70 = arith.mulf %68, %69 : vector<6x2048xf32>
    %cst_67 = arith.constant dense<0.000000e+00> : vector<6xf32>
    %71 = vector.multi_reduction <add>, %70, %cst_67 [1] : vector<6x2048xf32> to vector<6xf32>
    %72 = vector.shape_cast %71 : vector<6xf32> to vector<6x1xf32>
    %cst_68 = arith.constant 6.37755089E-4 : f32
    %73 = vector.broadcast %cst_68 : f32 to vector<6x1xf32>
    %74 = arith.mulf %72, %73 : vector<6x1xf32>
    %cst_69 = arith.constant 9.99999974E-6 : f32
    %75 = vector.broadcast %cst_69 : f32 to vector<6x1xf32>
    %76 = arith.addf %74, %75 : vector<6x1xf32>
    %77 = math.rsqrt %76 : vector<6x1xf32>
    %78 = vector.broadcast %77 : vector<6x1xf32> to vector<6x2048xf32>
    %79 = arith.mulf %67, %78 : vector<6x2048xf32>
    %c0_70 = arith.constant 0 : index
    %c0_71 = arith.constant 0 : index
    %80 = vector.load %arg4[%c0_70, %c0_71] : memref<6x1xf32, #tpu.memory_space<vmem>>, vector<6x1xf32>
    %81 = vector.broadcast %80 : vector<6x1xf32> to vector<6x2048xf32>
    %82 = arith.mulf %79, %81 : vector<6x2048xf32>
    %c0_72 = arith.constant 0 : index
    %c0_73 = arith.constant 0 : index
    %83 = vector.load %arg5[%c0_72, %c0_73] : memref<6x1xf32, #tpu.memory_space<vmem>>, vector<6x1xf32>
    %84 = vector.broadcast %83 : vector<6x1xf32> to vector<6x2048xf32>
    %85 = arith.addf %82, %84 : vector<6x2048xf32>
    %cst_74 = arith.constant 0.000000e+00 : f32
    %86 = vector.broadcast %cst_74 : f32 to vector<6x2048xf32>
    %87 = arith.maximumf %85, %86 : vector<6x2048xf32>
    %c0_75 = arith.constant 0 : index
    %c0_76 = arith.constant 0 : index
    %88 = vector.load %arg9[%c0_75, %c0_76] : memref<6x2176xf32, #tpu.memory_space<vmem>>, vector<6x2048xf32>
    tpu.vector_store %arg9[%c0_75, %c0_76], %87 {strides = array<i32>} : memref<6x2176xf32, #tpu.memory_space<vmem>>, vector<6x2048xf32>,
    %cst_77 = arith.constant 0.000000e+00 : f32
    %89 = vector.broadcast %cst_77 : f32 to vector<6x128xf32>
    %c0_78 = arith.constant 0 : index
    %c2048 = arith.constant 2048 : index
    %90 = vector.load %arg9[%c0_78, %c2048] : memref<6x2176xf32, #tpu.memory_space<vmem>>, vector<6x128xf32>
    tpu.vector_store %arg9[%c0_78, %c2048], %89 {strides = array<i32>} : memref<6x2176xf32, #tpu.memory_space<vmem>>, vector<6x128xf32>,
    %c0_79 = arith.constant 0 : index
    %c1_80 = arith.constant 1 : index
    %91 = vector.load %arg9[%c0_79, %c1_80] : memref<6x2176xf32, #tpu.memory_space<vmem>>, vector<6x2048xf32>
    %c0_81 = arith.constant 0 : index
    %c32_82 = arith.constant 32 : index
    %92 = vector.load %arg9[%c0_81, %c32_82] : memref<6x2176xf32, #tpu.memory_space<vmem>>, vector<6x2048xf32>
    %c0_83 = arith.constant 0 : index
    %c33_84 = arith.constant 33 : index
    %93 = vector.load %arg9[%c0_83, %c33_84] : memref<6x2176xf32, #tpu.memory_space<vmem>>, vector<6x2048xf32>
    %94 = arith.maximumf %87, %91 : vector<6x2048xf32>
    %95 = arith.maximumf %92, %93 : vector<6x2048xf32>
    %96 = arith.maximumf %94, %95 : vector<6x2048xf32>
    %c0_85 = arith.constant 0 : index
    %c0_86 = arith.constant 0 : index
    %97 = vector.load %arg7[%c0_85, %c0_86] : memref<6x2048xf32, #tpu.memory_space<vmem>>, vector<6x2048xf32>
    tpu.vector_store %arg7[%c0_85, %c0_86], %96 {strides = array<i32>} : memref<6x2048xf32, #tpu.memory_space<vmem>>, vector<6x2048xf32>,
    return
  }
  func.func @transform_0(%arg0: i32) -> (i32, i32) {
    %c0_i32 = arith.constant 0 : i32
    %c0_i32_0 = arith.constant 0 : i32
    %c0_i32_1 = arith.constant 0 : i32
    return %c0_i32, %c0_i32_0 : i32, i32
  }
  func.func @transform_1(%arg0: i32) -> (i32, i32) {
    %c0_i32 = arith.constant 0 : i32
    %c0_i32_0 = arith.constant 0 : i32
    %c0_i32_1 = arith.constant 0 : i32
    return %c0_i32, %c0_i32_0 : i32, i32
  }
  func.func @transform_2(%arg0: i32) -> (i32, i32) {
    %c0_i32 = arith.constant 0 : i32
    %c0_i32_0 = arith.constant 0 : i32
    %c0_i32_1 = arith.constant 0 : i32
    return %c0_i32, %c0_i32_0 : i32, i32
  }
  func.func @transform_3(%arg0: i32) -> (i32, i32) {
    %c0_i32 = arith.constant 0 : i32
    %c0_i32_0 = arith.constant 0 : i32
    %c0_i32_1 = arith.constant 0 : i32
    return %c0_i32, %c0_i32_0 : i32, i32
  }
  func.func @transform_4(%arg0: i32) -> (i32, i32) {
    %c0_i32 = arith.constant 0 : i32
    %c0_i32_0 = arith.constant 0 : i32
    %c0_i32_1 = arith.constant 0 : i32
    return %c0_i32, %c0_i32_0 : i32, i32
  }
  func.func @transform_5(%arg0: i32) -> (i32, i32) {
    %c0_i32 = arith.constant 0 : i32
    %c0_i32_0 = arith.constant 0 : i32
    %c0_i32_1 = arith.constant 0 : i32
    return %c0_i32, %c0_i32_0 : i32, i32
  }
  func.func @transform_6(%arg0: i32) -> (i32, i32) {
    %c0_i32 = arith.constant 0 : i32
    %c0_i32_0 = arith.constant 0 : i32
    %c0_i32_1 = arith.constant 0 : i32
    return %c0_i32, %c0_i32_0 : i32, i32
  }
}

module attributes {stable_mosaic.version = 11 : i64} {
  func.func @_conv_block_kernel(%arg0: i32, %arg1: memref<6x776xf32, #tpu.memory_space<vmem>>, %arg2: memref<16x152xbf16, #tpu.memory_space<vmem>>, %arg3: memref<16x1xf32, #tpu.memory_space<vmem>>, %arg4: memref<16x1xf32, #tpu.memory_space<vmem>>, %arg5: memref<16x1xf32, #tpu.memory_space<vmem>>, %arg6: memref<1x648xf32, #tpu.memory_space<vmem>>, %arg7: memref<16x648xf32, #tpu.memory_space<vmem>>, %arg8: memref<152x648xf32, #tpu.memory_space<vmem>>, %arg9: memref<16x776xf32, #tpu.memory_space<vmem>>) attributes {dimension_semantics = [#tpu.dimension_semantics<arbitrary>], iteration_bounds = array<i64: 1>, scalar_prefetch = 0 : i64, scratch_operands = 2 : i64, tpu.core_type = #tpu.core_type<tc>, window_params = [{pipeline_mode = #tpu.pipeline_mode<synchronous>, transform_indices = @transform_0, window_bounds = array<i64: 6, 776>}, {pipeline_mode = #tpu.pipeline_mode<synchronous>, transform_indices = @transform_1, window_bounds = array<i64: 16, 152>}, {pipeline_mode = #tpu.pipeline_mode<synchronous>, transform_indices = @transform_2, window_bounds = array<i64: 16, 1>}, {pipeline_mode = #tpu.pipeline_mode<synchronous>, transform_indices = @transform_3, window_bounds = array<i64: 16, 1>}, {pipeline_mode = #tpu.pipeline_mode<synchronous>, transform_indices = @transform_4, window_bounds = array<i64: 16, 1>}, {pipeline_mode = #tpu.pipeline_mode<synchronous>, transform_indices = @transform_5, window_bounds = array<i64: 1, 648>}, {pipeline_mode = #tpu.pipeline_mode<synchronous>, transform_indices = @transform_6, window_bounds = array<i64: 16, 648>}]} {
    %c0 = arith.constant 0 : index
    %c0_0 = arith.constant 0 : index
    %0 = vector.load %arg1[%c0, %c0_0] : memref<6x776xf32, #tpu.memory_space<vmem>>, vector<6x648xf32>
    %c0_1 = arith.constant 0 : index
    %c0_2 = arith.constant 0 : index
    %1 = vector.load %arg8[%c0_1, %c0_2] : memref<152x648xf32, #tpu.memory_space<vmem>>, vector<6x648xf32>
    tpu.vector_store %arg8[%c0_1, %c0_2], %0 {strides = array<i32>} : memref<152x648xf32, #tpu.memory_space<vmem>>, vector<6x648xf32>,
    %c0_3 = arith.constant 0 : index
    %c1 = arith.constant 1 : index
    %2 = vector.load %arg1[%c0_3, %c1] : memref<6x776xf32, #tpu.memory_space<vmem>>, vector<6x648xf32>
    %c6 = arith.constant 6 : index
    %c0_4 = arith.constant 0 : index
    %3 = vector.load %arg8[%c6, %c0_4] : memref<152x648xf32, #tpu.memory_space<vmem>>, vector<6x648xf32>
    tpu.vector_store %arg8[%c6, %c0_4], %2 {strides = array<i32>} : memref<152x648xf32, #tpu.memory_space<vmem>>, vector<6x648xf32>,
    %c0_5 = arith.constant 0 : index
    %c2 = arith.constant 2 : index
    %4 = vector.load %arg1[%c0_5, %c2] : memref<6x776xf32, #tpu.memory_space<vmem>>, vector<6x648xf32>
    %c12 = arith.constant 12 : index
    %c0_6 = arith.constant 0 : index
    %5 = vector.load %arg8[%c12, %c0_6] : memref<152x648xf32, #tpu.memory_space<vmem>>, vector<6x648xf32>
    tpu.vector_store %arg8[%c12, %c0_6], %4 {strides = array<i32>} : memref<152x648xf32, #tpu.memory_space<vmem>>, vector<6x648xf32>,
    %c0_7 = arith.constant 0 : index
    %c3 = arith.constant 3 : index
    %6 = vector.load %arg1[%c0_7, %c3] : memref<6x776xf32, #tpu.memory_space<vmem>>, vector<6x648xf32>
    %c18 = arith.constant 18 : index
    %c0_8 = arith.constant 0 : index
    %7 = vector.load %arg8[%c18, %c0_8] : memref<152x648xf32, #tpu.memory_space<vmem>>, vector<6x648xf32>
    tpu.vector_store %arg8[%c18, %c0_8], %6 {strides = array<i32>} : memref<152x648xf32, #tpu.memory_space<vmem>>, vector<6x648xf32>,
    %c0_9 = arith.constant 0 : index
    %c4 = arith.constant 4 : index
    %8 = vector.load %arg1[%c0_9, %c4] : memref<6x776xf32, #tpu.memory_space<vmem>>, vector<6x648xf32>
    %c24 = arith.constant 24 : index
    %c0_10 = arith.constant 0 : index
    %9 = vector.load %arg8[%c24, %c0_10] : memref<152x648xf32, #tpu.memory_space<vmem>>, vector<6x648xf32>
    tpu.vector_store %arg8[%c24, %c0_10], %8 {strides = array<i32>} : memref<152x648xf32, #tpu.memory_space<vmem>>, vector<6x648xf32>,
    %c0_11 = arith.constant 0 : index
    %c18_12 = arith.constant 18 : index
    %10 = vector.load %arg1[%c0_11, %c18_12] : memref<6x776xf32, #tpu.memory_space<vmem>>, vector<6x648xf32>
    %c30 = arith.constant 30 : index
    %c0_13 = arith.constant 0 : index
    %11 = vector.load %arg8[%c30, %c0_13] : memref<152x648xf32, #tpu.memory_space<vmem>>, vector<6x648xf32>
    tpu.vector_store %arg8[%c30, %c0_13], %10 {strides = array<i32>} : memref<152x648xf32, #tpu.memory_space<vmem>>, vector<6x648xf32>,
    %c0_14 = arith.constant 0 : index
    %c19 = arith.constant 19 : index
    %12 = vector.load %arg1[%c0_14, %c19] : memref<6x776xf32, #tpu.memory_space<vmem>>, vector<6x648xf32>
    %c36 = arith.constant 36 : index
    %c0_15 = arith.constant 0 : index
    %13 = vector.load %arg8[%c36, %c0_15] : memref<152x648xf32, #tpu.memory_space<vmem>>, vector<6x648xf32>
    tpu.vector_store %arg8[%c36, %c0_15], %12 {strides = array<i32>} : memref<152x648xf32, #tpu.memory_space<vmem>>, vector<6x648xf32>,
    %c0_16 = arith.constant 0 : index
    %c20 = arith.constant 20 : index
    %14 = vector.load %arg1[%c0_16, %c20] : memref<6x776xf32, #tpu.memory_space<vmem>>, vector<6x648xf32>
    %c42 = arith.constant 42 : index
    %c0_17 = arith.constant 0 : index
    %15 = vector.load %arg8[%c42, %c0_17] : memref<152x648xf32, #tpu.memory_space<vmem>>, vector<6x648xf32>
    tpu.vector_store %arg8[%c42, %c0_17], %14 {strides = array<i32>} : memref<152x648xf32, #tpu.memory_space<vmem>>, vector<6x648xf32>,
    %c0_18 = arith.constant 0 : index
    %c21 = arith.constant 21 : index
    %16 = vector.load %arg1[%c0_18, %c21] : memref<6x776xf32, #tpu.memory_space<vmem>>, vector<6x648xf32>
    %c48 = arith.constant 48 : index
    %c0_19 = arith.constant 0 : index
    %17 = vector.load %arg8[%c48, %c0_19] : memref<152x648xf32, #tpu.memory_space<vmem>>, vector<6x648xf32>
    tpu.vector_store %arg8[%c48, %c0_19], %16 {strides = array<i32>} : memref<152x648xf32, #tpu.memory_space<vmem>>, vector<6x648xf32>,
    %c0_20 = arith.constant 0 : index
    %c22 = arith.constant 22 : index
    %18 = vector.load %arg1[%c0_20, %c22] : memref<6x776xf32, #tpu.memory_space<vmem>>, vector<6x648xf32>
    %c54 = arith.constant 54 : index
    %c0_21 = arith.constant 0 : index
    %19 = vector.load %arg8[%c54, %c0_21] : memref<152x648xf32, #tpu.memory_space<vmem>>, vector<6x648xf32>
    tpu.vector_store %arg8[%c54, %c0_21], %18 {strides = array<i32>} : memref<152x648xf32, #tpu.memory_space<vmem>>, vector<6x648xf32>,
    %c0_22 = arith.constant 0 : index
    %c36_23 = arith.constant 36 : index
    %20 = vector.load %arg1[%c0_22, %c36_23] : memref<6x776xf32, #tpu.memory_space<vmem>>, vector<6x648xf32>
    %c60 = arith.constant 60 : index
    %c0_24 = arith.constant 0 : index
    %21 = vector.load %arg8[%c60, %c0_24] : memref<152x648xf32, #tpu.memory_space<vmem>>, vector<6x648xf32>
    tpu.vector_store %arg8[%c60, %c0_24], %20 {strides = array<i32>} : memref<152x648xf32, #tpu.memory_space<vmem>>, vector<6x648xf32>,
    %c0_25 = arith.constant 0 : index
    %c37 = arith.constant 37 : index
    %22 = vector.load %arg1[%c0_25, %c37] : memref<6x776xf32, #tpu.memory_space<vmem>>, vector<6x648xf32>
    %c66 = arith.constant 66 : index
    %c0_26 = arith.constant 0 : index
    %23 = vector.load %arg8[%c66, %c0_26] : memref<152x648xf32, #tpu.memory_space<vmem>>, vector<6x648xf32>
    tpu.vector_store %arg8[%c66, %c0_26], %22 {strides = array<i32>} : memref<152x648xf32, #tpu.memory_space<vmem>>, vector<6x648xf32>,
    %c0_27 = arith.constant 0 : index
    %c38 = arith.constant 38 : index
    %24 = vector.load %arg1[%c0_27, %c38] : memref<6x776xf32, #tpu.memory_space<vmem>>, vector<6x648xf32>
    %c72 = arith.constant 72 : index
    %c0_28 = arith.constant 0 : index
    %25 = vector.load %arg8[%c72, %c0_28] : memref<152x648xf32, #tpu.memory_space<vmem>>, vector<6x648xf32>
    tpu.vector_store %arg8[%c72, %c0_28], %24 {strides = array<i32>} : memref<152x648xf32, #tpu.memory_space<vmem>>, vector<6x648xf32>,
    %c0_29 = arith.constant 0 : index
    %c39 = arith.constant 39 : index
    %26 = vector.load %arg1[%c0_29, %c39] : memref<6x776xf32, #tpu.memory_space<vmem>>, vector<6x648xf32>
    %c78 = arith.constant 78 : index
    %c0_30 = arith.constant 0 : index
    %27 = vector.load %arg8[%c78, %c0_30] : memref<152x648xf32, #tpu.memory_space<vmem>>, vector<6x648xf32>
    tpu.vector_store %arg8[%c78, %c0_30], %26 {strides = array<i32>} : memref<152x648xf32, #tpu.memory_space<vmem>>, vector<6x648xf32>,
    %c0_31 = arith.constant 0 : index
    %c40 = arith.constant 40 : index
    %28 = vector.load %arg1[%c0_31, %c40] : memref<6x776xf32, #tpu.memory_space<vmem>>, vector<6x648xf32>
    %c84 = arith.constant 84 : index
    %c0_32 = arith.constant 0 : index
    %29 = vector.load %arg8[%c84, %c0_32] : memref<152x648xf32, #tpu.memory_space<vmem>>, vector<6x648xf32>
    tpu.vector_store %arg8[%c84, %c0_32], %28 {strides = array<i32>} : memref<152x648xf32, #tpu.memory_space<vmem>>, vector<6x648xf32>,
    %c0_33 = arith.constant 0 : index
    %c54_34 = arith.constant 54 : index
    %30 = vector.load %arg1[%c0_33, %c54_34] : memref<6x776xf32, #tpu.memory_space<vmem>>, vector<6x648xf32>
    %c90 = arith.constant 90 : index
    %c0_35 = arith.constant 0 : index
    %31 = vector.load %arg8[%c90, %c0_35] : memref<152x648xf32, #tpu.memory_space<vmem>>, vector<6x648xf32>
    tpu.vector_store %arg8[%c90, %c0_35], %30 {strides = array<i32>} : memref<152x648xf32, #tpu.memory_space<vmem>>, vector<6x648xf32>,
    %c0_36 = arith.constant 0 : index
    %c55 = arith.constant 55 : index
    %32 = vector.load %arg1[%c0_36, %c55] : memref<6x776xf32, #tpu.memory_space<vmem>>, vector<6x648xf32>
    %c96 = arith.constant 96 : index
    %c0_37 = arith.constant 0 : index
    %33 = vector.load %arg8[%c96, %c0_37] : memref<152x648xf32, #tpu.memory_space<vmem>>, vector<6x648xf32>
    tpu.vector_store %arg8[%c96, %c0_37], %32 {strides = array<i32>} : memref<152x648xf32, #tpu.memory_space<vmem>>, vector<6x648xf32>,
    %c0_38 = arith.constant 0 : index
    %c56 = arith.constant 56 : index
    %34 = vector.load %arg1[%c0_38, %c56] : memref<6x776xf32, #tpu.memory_space<vmem>>, vector<6x648xf32>
    %c102 = arith.constant 102 : index
    %c0_39 = arith.constant 0 : index
    %35 = vector.load %arg8[%c102, %c0_39] : memref<152x648xf32, #tpu.memory_space<vmem>>, vector<6x648xf32>
    tpu.vector_store %arg8[%c102, %c0_39], %34 {strides = array<i32>} : memref<152x648xf32, #tpu.memory_space<vmem>>, vector<6x648xf32>,
    %c0_40 = arith.constant 0 : index
    %c57 = arith.constant 57 : index
    %36 = vector.load %arg1[%c0_40, %c57] : memref<6x776xf32, #tpu.memory_space<vmem>>, vector<6x648xf32>
    %c108 = arith.constant 108 : index
    %c0_41 = arith.constant 0 : index
    %37 = vector.load %arg8[%c108, %c0_41] : memref<152x648xf32, #tpu.memory_space<vmem>>, vector<6x648xf32>
    tpu.vector_store %arg8[%c108, %c0_41], %36 {strides = array<i32>} : memref<152x648xf32, #tpu.memory_space<vmem>>, vector<6x648xf32>,
    %c0_42 = arith.constant 0 : index
    %c58 = arith.constant 58 : index
    %38 = vector.load %arg1[%c0_42, %c58] : memref<6x776xf32, #tpu.memory_space<vmem>>, vector<6x648xf32>
    %c114 = arith.constant 114 : index
    %c0_43 = arith.constant 0 : index
    %39 = vector.load %arg8[%c114, %c0_43] : memref<152x648xf32, #tpu.memory_space<vmem>>, vector<6x648xf32>
    tpu.vector_store %arg8[%c114, %c0_43], %38 {strides = array<i32>} : memref<152x648xf32, #tpu.memory_space<vmem>>, vector<6x648xf32>,
    %c0_44 = arith.constant 0 : index
    %c72_45 = arith.constant 72 : index
    %40 = vector.load %arg1[%c0_44, %c72_45] : memref<6x776xf32, #tpu.memory_space<vmem>>, vector<6x648xf32>
    %c120 = arith.constant 120 : index
    %c0_46 = arith.constant 0 : index
    %41 = vector.load %arg8[%c120, %c0_46] : memref<152x648xf32, #tpu.memory_space<vmem>>, vector<6x648xf32>
    tpu.vector_store %arg8[%c120, %c0_46], %40 {strides = array<i32>} : memref<152x648xf32, #tpu.memory_space<vmem>>, vector<6x648xf32>,
    %c0_47 = arith.constant 0 : index
    %c73 = arith.constant 73 : index
    %42 = vector.load %arg1[%c0_47, %c73] : memref<6x776xf32, #tpu.memory_space<vmem>>, vector<6x648xf32>
    %c126 = arith.constant 126 : index
    %c0_48 = arith.constant 0 : index
    %43 = vector.load %arg8[%c126, %c0_48] : memref<152x648xf32, #tpu.memory_space<vmem>>, vector<6x648xf32>
    tpu.vector_store %arg8[%c126, %c0_48], %42 {strides = array<i32>} : memref<152x648xf32, #tpu.memory_space<vmem>>, vector<6x648xf32>,
    %c0_49 = arith.constant 0 : index
    %c74 = arith.constant 74 : index
    %44 = vector.load %arg1[%c0_49, %c74] : memref<6x776xf32, #tpu.memory_space<vmem>>, vector<6x648xf32>
    %c132 = arith.constant 132 : index
    %c0_50 = arith.constant 0 : index
    %45 = vector.load %arg8[%c132, %c0_50] : memref<152x648xf32, #tpu.memory_space<vmem>>, vector<6x648xf32>
    tpu.vector_store %arg8[%c132, %c0_50], %44 {strides = array<i32>} : memref<152x648xf32, #tpu.memory_space<vmem>>, vector<6x648xf32>,
    %c0_51 = arith.constant 0 : index
    %c75 = arith.constant 75 : index
    %46 = vector.load %arg1[%c0_51, %c75] : memref<6x776xf32, #tpu.memory_space<vmem>>, vector<6x648xf32>
    %c138 = arith.constant 138 : index
    %c0_52 = arith.constant 0 : index
    %47 = vector.load %arg8[%c138, %c0_52] : memref<152x648xf32, #tpu.memory_space<vmem>>, vector<6x648xf32>
    tpu.vector_store %arg8[%c138, %c0_52], %46 {strides = array<i32>} : memref<152x648xf32, #tpu.memory_space<vmem>>, vector<6x648xf32>,
    %c0_53 = arith.constant 0 : index
    %c76 = arith.constant 76 : index
    %48 = vector.load %arg1[%c0_53, %c76] : memref<6x776xf32, #tpu.memory_space<vmem>>, vector<6x648xf32>
    %c144 = arith.constant 144 : index
    %c0_54 = arith.constant 0 : index
    %49 = vector.load %arg8[%c144, %c0_54] : memref<152x648xf32, #tpu.memory_space<vmem>>, vector<6x648xf32>
    tpu.vector_store %arg8[%c144, %c0_54], %48 {strides = array<i32>} : memref<152x648xf32, #tpu.memory_space<vmem>>, vector<6x648xf32>,
    %cst = arith.constant 0.000000e+00 : f32
    %50 = vector.broadcast %cst : f32 to vector<2x648xf32>
    %c150 = arith.constant 150 : index
    %c0_55 = arith.constant 0 : index
    %51 = vector.load %arg8[%c150, %c0_55] : memref<152x648xf32, #tpu.memory_space<vmem>>, vector<2x648xf32>
    tpu.vector_store %arg8[%c150, %c0_55], %50 {strides = array<i32>} : memref<152x648xf32, #tpu.memory_space<vmem>>, vector<2x648xf32>,
    %c0_56 = arith.constant 0 : index
    %c0_57 = arith.constant 0 : index
    %52 = vector.load %arg2[%c0_56, %c0_57] : memref<16x152xbf16, #tpu.memory_space<vmem>>, vector<16x152xbf16>
    %c0_58 = arith.constant 0 : index
    %c0_59 = arith.constant 0 : index
    %53 = vector.load %arg8[%c0_58, %c0_59] : memref<152x648xf32, #tpu.memory_space<vmem>>, vector<152x648xf32>
    %54 = arith.truncf %53 : vector<152x648xf32> to vector<152x648xbf16>
    %cst_60 = arith.constant dense<0.000000e+00> : vector<16x648xf32>
    %55 = tpu.matmul %52, %54, %cst_60 {dimension_numbers = #tpu.dot_dimension_numbers<[1], [0], [0], [1], [0, 0, 1, 1], [], []>} : vector<16x152xbf16>, vector<152x648xbf16>, vector<16x648xf32> -> vector<16x648xf32>
    %c0_61 = arith.constant 0 : index
    %c0_62 = arith.constant 0 : index
    %56 = vector.load %arg3[%c0_61, %c0_62] : memref<16x1xf32, #tpu.memory_space<vmem>>, vector<16x1xf32>
    %57 = vector.broadcast %56 : vector<16x1xf32> to vector<16x648xf32>
    %58 = arith.addf %55, %57 : vector<16x648xf32>
    %c0_63 = arith.constant 0 : index
    %c0_64 = arith.constant 0 : index
    %59 = vector.load %arg6[%c0_63, %c0_64] : memref<1x648xf32, #tpu.memory_space<vmem>>, vector<1x648xf32>
    %60 = vector.broadcast %59 : vector<1x648xf32> to vector<16x648xf32>
    %61 = arith.mulf %58, %60 : vector<16x648xf32>
    %cst_65 = arith.constant dense<0.000000e+00> : vector<16xf32>
    %62 = vector.multi_reduction <add>, %61, %cst_65 [1] : vector<16x648xf32> to vector<16xf32>
    %63 = vector.shape_cast %62 : vector<16xf32> to vector<16x1xf32>
    %cst_66 = arith.constant 0.00255102036 : f32
    %64 = vector.broadcast %cst_66 : f32 to vector<16x1xf32>
    %65 = arith.mulf %63, %64 : vector<16x1xf32>
    %66 = vector.broadcast %65 : vector<16x1xf32> to vector<16x648xf32>
    %67 = arith.subf %58, %66 : vector<16x648xf32>
    %68 = arith.mulf %67, %67 : vector<16x648xf32>
    %69 = vector.broadcast %59 : vector<1x648xf32> to vector<16x648xf32>
    %70 = arith.mulf %68, %69 : vector<16x648xf32>
    %cst_67 = arith.constant dense<0.000000e+00> : vector<16xf32>
    %71 = vector.multi_reduction <add>, %70, %cst_67 [1] : vector<16x648xf32> to vector<16xf32>
    %72 = vector.shape_cast %71 : vector<16xf32> to vector<16x1xf32>
    %cst_68 = arith.constant 0.00255102036 : f32
    %73 = vector.broadcast %cst_68 : f32 to vector<16x1xf32>
    %74 = arith.mulf %72, %73 : vector<16x1xf32>
    %cst_69 = arith.constant 9.99999974E-6 : f32
    %75 = vector.broadcast %cst_69 : f32 to vector<16x1xf32>
    %76 = arith.addf %74, %75 : vector<16x1xf32>
    %77 = math.rsqrt %76 : vector<16x1xf32>
    %78 = vector.broadcast %77 : vector<16x1xf32> to vector<16x648xf32>
    %79 = arith.mulf %67, %78 : vector<16x648xf32>
    %c0_70 = arith.constant 0 : index
    %c0_71 = arith.constant 0 : index
    %80 = vector.load %arg4[%c0_70, %c0_71] : memref<16x1xf32, #tpu.memory_space<vmem>>, vector<16x1xf32>
    %81 = vector.broadcast %80 : vector<16x1xf32> to vector<16x648xf32>
    %82 = arith.mulf %79, %81 : vector<16x648xf32>
    %c0_72 = arith.constant 0 : index
    %c0_73 = arith.constant 0 : index
    %83 = vector.load %arg5[%c0_72, %c0_73] : memref<16x1xf32, #tpu.memory_space<vmem>>, vector<16x1xf32>
    %84 = vector.broadcast %83 : vector<16x1xf32> to vector<16x648xf32>
    %85 = arith.addf %82, %84 : vector<16x648xf32>
    %cst_74 = arith.constant 0.000000e+00 : f32
    %86 = vector.broadcast %cst_74 : f32 to vector<16x648xf32>
    %87 = arith.maximumf %85, %86 : vector<16x648xf32>
    %c0_75 = arith.constant 0 : index
    %c0_76 = arith.constant 0 : index
    %88 = vector.load %arg9[%c0_75, %c0_76] : memref<16x776xf32, #tpu.memory_space<vmem>>, vector<16x648xf32>
    tpu.vector_store %arg9[%c0_75, %c0_76], %87 {strides = array<i32>} : memref<16x776xf32, #tpu.memory_space<vmem>>, vector<16x648xf32>,
    %cst_77 = arith.constant 0.000000e+00 : f32
    %89 = vector.broadcast %cst_77 : f32 to vector<16x128xf32>
    %c0_78 = arith.constant 0 : index
    %c648 = arith.constant 648 : index
    %90 = vector.load %arg9[%c0_78, %c648] : memref<16x776xf32, #tpu.memory_space<vmem>>, vector<16x128xf32>
    tpu.vector_store %arg9[%c0_78, %c648], %89 {strides = array<i32>} : memref<16x776xf32, #tpu.memory_space<vmem>>, vector<16x128xf32>,
    %c0_79 = arith.constant 0 : index
    %c1_80 = arith.constant 1 : index
    %91 = vector.load %arg9[%c0_79, %c1_80] : memref<16x776xf32, #tpu.memory_space<vmem>>, vector<16x648xf32>
    %c0_81 = arith.constant 0 : index
    %c18_82 = arith.constant 18 : index
    %92 = vector.load %arg9[%c0_81, %c18_82] : memref<16x776xf32, #tpu.memory_space<vmem>>, vector<16x648xf32>
    %c0_83 = arith.constant 0 : index
    %c19_84 = arith.constant 19 : index
    %93 = vector.load %arg9[%c0_83, %c19_84] : memref<16x776xf32, #tpu.memory_space<vmem>>, vector<16x648xf32>
    %94 = arith.maximumf %87, %91 : vector<16x648xf32>
    %95 = arith.maximumf %92, %93 : vector<16x648xf32>
    %96 = arith.maximumf %94, %95 : vector<16x648xf32>
    %c0_85 = arith.constant 0 : index
    %c0_86 = arith.constant 0 : index
    %97 = vector.load %arg7[%c0_85, %c0_86] : memref<16x648xf32, #tpu.memory_space<vmem>>, vector<16x648xf32>
    tpu.vector_store %arg7[%c0_85, %c0_86], %96 {strides = array<i32>} : memref<16x648xf32, #tpu.memory_space<vmem>>, vector<16x648xf32>,
    return
  }
  func.func @transform_0(%arg0: i32) -> (i32, i32) {
    %c0_i32 = arith.constant 0 : i32
    %c0_i32_0 = arith.constant 0 : i32
    %c0_i32_1 = arith.constant 0 : i32
    return %c0_i32, %c0_i32_0 : i32, i32
  }
  func.func @transform_1(%arg0: i32) -> (i32, i32) {
    %c0_i32 = arith.constant 0 : i32
    %c0_i32_0 = arith.constant 0 : i32
    %c0_i32_1 = arith.constant 0 : i32
    return %c0_i32, %c0_i32_0 : i32, i32
  }
  func.func @transform_2(%arg0: i32) -> (i32, i32) {
    %c0_i32 = arith.constant 0 : i32
    %c0_i32_0 = arith.constant 0 : i32
    %c0_i32_1 = arith.constant 0 : i32
    return %c0_i32, %c0_i32_0 : i32, i32
  }
  func.func @transform_3(%arg0: i32) -> (i32, i32) {
    %c0_i32 = arith.constant 0 : i32
    %c0_i32_0 = arith.constant 0 : i32
    %c0_i32_1 = arith.constant 0 : i32
    return %c0_i32, %c0_i32_0 : i32, i32
  }
  func.func @transform_4(%arg0: i32) -> (i32, i32) {
    %c0_i32 = arith.constant 0 : i32
    %c0_i32_0 = arith.constant 0 : i32
    %c0_i32_1 = arith.constant 0 : i32
    return %c0_i32, %c0_i32_0 : i32, i32
  }
  func.func @transform_5(%arg0: i32) -> (i32, i32) {
    %c0_i32 = arith.constant 0 : i32
    %c0_i32_0 = arith.constant 0 : i32
    %c0_i32_1 = arith.constant 0 : i32
    return %c0_i32, %c0_i32_0 : i32, i32
  }
  func.func @transform_6(%arg0: i32) -> (i32, i32) {
    %c0_i32 = arith.constant 0 : i32
    %c0_i32_0 = arith.constant 0 : i32
    %c0_i32_1 = arith.constant 0 : i32
    return %c0_i32, %c0_i32_0 : i32, i32
  }
}

</mosaic_0001>

<bundles_post_ra>
// kernel: cnn_forward.2
= control target key start
LH: loop header
LB: loop body
LE: loop exit
PB: predicated region body
PF: predicated region fallthrough
CT: control target
= control target key end

     0   :  { %s1728_s23 = smov 126   ;;  %s1729_s24 = smov 127   ;;  %v1747_v4 = vmov 0.0   ;;  %v1748_v9 = vmov 0   ;;  %vm46_vm0 = vcmask 1046528   ;;  %vm76_vm1 = vcmask 1031168   ;;  %s2846_s0 = inlined_call_operand.vmem [shape: f32[1,2304], index: 0, kind: input, shape index: {}]   ;;  %s2847_s2 = inlined_call_operand.vmem [shape: f32[6,1], index: 2, kind: input, shape index: {}]   ;;  %s2848_s1 = inlined_call_operand.vmem [shape: bf16[6,32], index: 1, kind: input, shape index: {}]   ;;  %s2849_s5 = inlined_call_operand.vmem [shape: f32[1,2048], index: 5, kind: input, shape index: {}]   ;;  %s2850_s3 = inlined_call_operand.vmem [shape: f32[6,1], index: 3, kind: input, shape index: {}]   ;;  %s2851_s4 = inlined_call_operand.vmem [shape: f32[6,1], index: 4, kind: input, shape index: {}]   ;;  %s2852_s6 = inlined_call_operand.vmem [shape: f32[6,2048], index: 6, kind: output, shape index: {}]  }
   0x1   :  { %v60_v0 = vld [vmem:[%s2846_s0] sm:$0xff]  ;;  %v61_v2 = vld [vmem:[%s2846_s0 + $0x8] sm:$0xff]  ;;  %s1730_s29 = smov 125   ;;  %s1731_s30 = smov 124   ;;  %681 = vst [vmem:[#allocation2 + $0x188] sm:$0xfe] %v1747_v4  ;;  %834 = vmatprep.mubr.bf16.mxu0 %v1748_v9  ;;  %875 = vmatprep.mubr.bf16.mxu1 %v1748_v9 }
   0x2   :  { %66 = vrot.lane.b32.xlu1 %v60_v0, %s1728_s23  ;;  %37 = vrot.lane.b32.xlu0 %v60_v0, %s1729_s24  ;;  %v1792_v1 = vld [vmem:[%s2846_s0 + $0x1] sm:$0xff]  ;;  %26 = vst [vmem:[#allocation2] ss:$8 sm:$0xf] %v60_v0  ;;  %s1732_s7 = smov 96   ;;  %s1733_s8 = smov 95  }
   0x3   :  { %27 = vst [vmem:[#allocation2] ss:$8 sm:$0xf0] %v60_v0  ;;  %567 = vst [vmem:[#allocation2 + $0x104] ss:$8 sm:$0xf] %v1792_v1  ;;  %1724 = vset.pattern.permute.xlu1 %v1748_v9  ;;  %1725 = vset.pattern.permute.xlu0 %v1748_v9 }
   0x4   :  { %568 = vst [vmem:[#allocation2 + $0x104] ss:$8 sm:$0xf0] %v1792_v1  ;;  %s1734_s9 = smov 94   ;;  %s1735_s10 = smov 93   ;;  %v573_v3 = vld [vmem:[%s2846_s0 + $0x9] sm:$0xff] }
   0x5   :  { %s1736_s11 = smov 92   ;;  %s1737_s12 = smov 64   ;;  %680 = vst [vmem:[#allocation2 + $0x180] sm:$0xfe] %v1747_v4  ;;  %682 = vst [vmem:[#allocation2 + $0x190] sm:$0xfe] %v1747_v4 }
   0x6   :  { %68 = vrot.lane.b32.xlu1 %v61_v2, %s1728_s23  ;;  %39 = vrot.lane.b32.xlu0 %v61_v2, %s1729_s24  ;;  %s1738_s13 = smov 63   ;;  %s1739_s14 = smov 62   ;;  %683 = vst [vmem:[#allocation2 + $0x198] sm:$0xfe] %v1747_v4  ;;  %684 = vst [vmem:[#allocation2 + $0x1a0] sm:$0xfe] %v1747_v4 }
   0x7   :  { %s1740_s15 = smov 61   ;;  %s1741_s16 = smov 60   ;;  %685 = vst [vmem:[#allocation2 + $0x1a8] sm:$0xfe] %v1747_v4  ;;  %686 = vst [vmem:[#allocation2 + $0x1b0] sm:$0xfe] %v1747_v4 }
   0x8   :  { %s1742_s17 = smov 32   ;;  %s1743_s18 = smov 31   ;;  %687 = vst [vmem:[#allocation2 + $0x1b8] sm:$0xfe] %v1747_v4  ;;  %688 = vst [vmem:[#allocation2 + $0x1c0] sm:$0xfe] %v1747_v4 }
   0x9   :  { %s2854_s19 = smov 30   ;;  %s2855_s20 = smov 29   ;;  %689 = vst [vmem:[#allocation2 + $0x1c8] sm:$0xfe] %v1747_v4  ;;  %690 = vst [vmem:[#allocation2 + $0x1d0] sm:$0xfe] %v1747_v4 }
   0xa   :  { %96 = vrot.lane.b32.xlu1 %v61_v2, %s1730_s29  ;;  %94 = vrot.lane.b32.xlu0 %v60_v0, %s1730_s29  ;;  %s2853_s21 = smov 28   ;;  %691 = vst [vmem:[#allocation2 + $0x1d8] sm:$0xfe] %v1747_v4  ;;  %692 = vst [vmem:[#allocation2 + $0x1e0] sm:$0xfe] %v1747_v4  ;;  %v25_v12 = vld [vmem:[%s2846_s0 + $0x8] sm:$0xff] }
   0xb   :  { %693 = vst [vmem:[#allocation2 + $0x1e8] sm:$0xfe] %v1747_v4  ;;  %694 = vst [vmem:[#allocation2 + $0x1f0] sm:$0xfe] %v1747_v4  ;;  %v62_v5 = vld [vmem:[%s2846_s0 + $0x10] sm:$0x1] }
   0xc   :  { %695 = vst [vmem:[#allocation2 + $0x1f8] sm:$0xfe] %v1747_v4  ;;  %1441 = vst [vmem:[#allocation3 + $0x80] sm:$0x3f] %v1747_v4  ;;  %v33_v6 = vld [vmem:[%s2846_s0 + $0x10] sm:$0x1] }
   0xd   :  { %v118_v7 = vld [vmem:[%s2846_s0 + $0x10] sm:$0x1]  ;;  %29 = vst [vmem:[#allocation2 + $0x40] ss:$8 sm:$0xf] %v25_v12  ;;  %vm48_vm2 = vcmask 1039360  }
   0xe   :  { %124 = vrot.lane.b32.xlu1 %v61_v2, %s1731_s30  ;;  %122 = vrot.lane.b32.xlu0 %v60_v0, %s1731_s30  ;;  %v90_v8 = vld [vmem:[%s2846_s0 + $0x10] sm:$0x1]  ;;  %30 = vst [vmem:[#allocation2 + $0x40] ss:$8 sm:$0xf0] %v25_v12  ;;  %vm104_vm3 = vcmask 1022976  }
   0xf   :  { %v174_v10 = vld [vmem:[%s2846_s0 + $0x10] sm:$0x1]  ;;  %v574_v42 = vld [vmem:[%s2846_s0 + $0x11] sm:$0x1]  ;;  %vm132_vm4 = vcmask 1014784   ;;  %s2862_s26 = smov 28  }
  0x10   :  { %v146_v11 = vld [vmem:[%s2846_s0 + $0x10] sm:$0x1]  ;;  %v628_v51 = vld [vmem:[%s2846_s0 + $0x11] sm:$0x1]  ;;  %vm160_vm5 = vcmask 785408   ;;  %vm188_vm6 = vcmask 777216  }
  0x11   :  { %v230_v13 = vld [vmem:[%s2846_s0 + $0x10] sm:$0x1]  ;;  %v601_v52 = vld [vmem:[%s2846_s0 + $0x11] sm:$0x1]  ;;  %vm216_vm7 = vcmask 769024   ;;  %vm244_vm8 = vcmask 760832  }
  0x12   :  { %152 = vrot.lane.b32.xlu1 %v61_v2, %s1732_s7  ;;  %150 = vrot.lane.b32.xlu0 %v60_v0, %s1732_s7  ;;  %v202_v14 = vld [vmem:[%s2846_s0 + $0x10] sm:$0x1]  ;;  %v655_v59 = vld [vmem:[%s2846_s0 + $0x11] sm:$0x1]  ;;  %vm272_vm9 = vcmask 752640   ;;  %vm300_vm10 = vcmask 523264  }
  0x13   :  { %v286_v15 = vld [vmem:[%s2846_s0 + $0x10] sm:$0x1]  ;;  %vm328_vm11 = vcmask 515072   ;;  %vm356_vm12 = vcmask 506880   ;;  %vm2856_vm13 = vcmask 498688   ;;  %vm2857_vm14 = vcmask 490496  }
  0x14   :  { %v258_v16 = vld [vmem:[%s2846_s0 + $0x10] sm:$0x1]  ;;  %vm440_vm15 = vcmask 261120  }
  0x15   :  { %v342_v17 = vld [vmem:[%s2846_s0 + $0x10] sm:$0x1] }
  0x16   :  { %180 = vrot.lane.b32.xlu1 %v61_v2, %s1733_s8  ;;  %178 = vrot.lane.b32.xlu0 %v60_v0, %s1733_s8  ;;  %v314_v18 = vld [vmem:[%s2846_s0 + $0x10] sm:$0x1] }
  0x17   :  { %v398_v19 = vld [vmem:[%s2846_s0 + $0x10] sm:$0x1] }
  0x18   :  { %v370_v20 = vld [vmem:[%s2846_s0 + $0x10] sm:$0x1] }
  0x19   :  { %v454_v24 = vld [vmem:[%s2846_s0 + $0x10] sm:$0x1] }
  0x1a   :  { %208 = vrot.lane.b32.xlu1 %v61_v2, %s1734_s9  ;;  %206 = vrot.lane.b32.xlu0 %v60_v0, %s1734_s9  ;;  %v426_v25 = vld [vmem:[%s2846_s0 + $0x10] sm:$0x1] }
  0x1b   :  { %v510_v33 = vld [vmem:[%s2846_s0 + $0x10] sm:$0x1] }
  0x1c   :  { %v482_v34 = vld [vmem:[%s2846_s0 + $0x10] sm:$0x1] }
  0x1d   :  { %v538_v43 = vld [vmem:[%s2846_s0 + $0x10] sm:$0x1] }
  0x1e   :  { %236 = vrot.lane.b32.xlu1 %v61_v2, %s1735_s10  ;;  %234 = vrot.lane.b32.xlu0 %v60_v0, %s1735_s10  ;;  %v565_v44 = vld [vmem:[%s2846_s0 + $0x9] sm:$0xff] }
  0x1f   :  { %570 = vst [vmem:[#allocation2 + $0x144] ss:$8 sm:$0xf] %v565_v44  ;;  %571 = vst [vmem:[#allocation2 + $0x144] ss:$8 sm:$0xf0] %v565_v44 }
  0x22   :  { %264 = vrot.lane.b32.xlu1 %v61_v2, %s1736_s11  ;;  %262 = vrot.lane.b32.xlu0 %v60_v0, %s1736_s11 }
  0x26   :  { %292 = vrot.lane.b32.xlu1 %v61_v2, %s1737_s12  ;;  %290 = vrot.lane.b32.xlu0 %v60_v0, %s1737_s12 }
  0x2a   :  { %320 = vrot.lane.b32.xlu1 %v61_v2, %s1738_s13  ;;  %318 = vrot.lane.b32.xlu0 %v60_v0, %s1738_s13 }
  0x2e   :  { %348 = vrot.lane.b32.xlu1 %v61_v2, %s1739_s14  ;;  %346 = vrot.lane.b32.xlu0 %v60_v0, %s1739_s14 }
  0x32   :  { %376 = vrot.lane.b32.xlu1 %v61_v2, %s1740_s15  ;;  %374 = vrot.lane.b32.xlu0 %v60_v0, %s1740_s15 }
  0x36   :  { %404 = vrot.lane.b32.xlu1 %v61_v2, %s1741_s16  ;;  %402 = vrot.lane.b32.xlu0 %v60_v0, %s1741_s16 }
  0x3a   :  { %432 = vrot.lane.b32.xlu1 %v61_v2, %s1742_s17  ;;  %430 = vrot.lane.b32.xlu0 %v60_v0, %s1742_s17 }
  0x3e   :  { %460 = vrot.lane.b32.xlu1 %v61_v2, %s1743_s18  ;;  %458 = vrot.lane.b32.xlu0 %v60_v0, %s1743_s18 }
  0x42   :  { %488 = vrot.lane.b32.xlu1 %v61_v2, %s2854_s19  ;;  %486 = vrot.lane.b32.xlu0 %v60_v0, %s2854_s19 }
  0x46   :  { %516 = vrot.lane.b32.xlu1 %v61_v2, %s2855_s20  ;;  %514 = vrot.lane.b32.xlu0 %v60_v0, %s2855_s20 }
  0x4a   :  { %544 = vrot.lane.b32.xlu1 %v61_v2, %s2853_s21  ;;  %542 = vrot.lane.b32.xlu0 %v60_v0, %s2853_s21 }
  0x4e   :  { %580 = vrot.lane.b32.xlu1 %v573_v3, %s1729_s24  ;;  %578 = vrot.lane.b32.xlu0 %v1792_v1, %s1729_s24 }
  0x52   :  { %607 = vrot.lane.b32.xlu1 %v573_v3, %s1728_s23  ;;  %605 = vrot.lane.b32.xlu0 %v1792_v1, %s1728_s23 }
  0x56   :  { %634 = vrot.lane.b32.xlu1 %v573_v3, %s1730_s29  ;;  %632 = vrot.lane.b32.xlu0 %v1792_v1, %s1730_s29 }
  0x5a   :  { %661 = vrot.lane.b32.xlu1 %v573_v3, %s1731_s30  ;;  %659 = vrot.lane.b32.xlu0 %v1792_v1, %s1731_s30 }
  0x5e   :  { %70 = vrot.lane.b32.xlu1 %v62_v5, %s1728_s23  ;;  %41 = vrot.lane.b32.xlu0 %v33_v6, %s1729_s24 }
  0x62   :  { %126 = vrot.lane.b32.xlu1 %v118_v7, %s1731_s30  ;;  %98 = vrot.lane.b32.xlu0 %v90_v8, %s1730_s29 }
  0x66   :  { %182 = vrot.lane.b32.xlu1 %v174_v10, %s1733_s8  ;;  %154 = vrot.lane.b32.xlu0 %v146_v11, %s1732_s7 }
  0x6a   :  { %238 = vrot.lane.b32.xlu1 %v230_v13, %s1735_s10  ;;  %210 = vrot.lane.b32.xlu0 %v202_v14, %s1734_s9 }
  0x6e   :  { %294 = vrot.lane.b32.xlu1 %v286_v15, %s1737_s12  ;;  %266 = vrot.lane.b32.xlu0 %v258_v16, %s1736_s11 }
  0x72   :  { %350 = vrot.lane.b32.xlu1 %v342_v17, %s1739_s14  ;;  %322 = vrot.lane.b32.xlu0 %v314_v18, %s1738_s13 }
  0x74   :  { %v67_v21 = vpop.permute.xlu1 %66  ;;  %v38_v22 = vpop.permute.xlu0 %37 }
  0x75   :  { %v72_v23 = vrot.slane %v67_v21, 1  ;;  %v43_v28 = vrot.slane %v38_v22, 1 }
  0x76   :  { %406 = vrot.lane.b32.xlu1 %v398_v19, %s1741_s16  ;;  %378 = vrot.lane.b32.xlu0 %v370_v20, %s1740_s15 }
  0x78   :  { %v1919_v26 = vpop.permute.xlu1 %68  ;;  %v1921_v27 = vpop.permute.xlu0 %39 }
  0x79   :  { %v73_v29 = vrot.slane %v1919_v26, 1  ;;  %v44_v30 = vrot.slane %v1921_v27, 1 }
  0x7a   :  { %462 = vrot.lane.b32.xlu1 %v454_v24, %s1743_s18  ;;  %434 = vrot.lane.b32.xlu0 %v426_v25, %s1742_s17  ;;  %s2860_s17 = smov 29   ;;  %s2861_s18 = smov 30  }
  0x7b   :  { %v75_v31 = vsel %vm46_vm0, %v72_v23, %v73_v29  ;;  %v47_v32 = vsel %vm46_vm0, %v43_v28, %v44_v30  ;;  %v793_v28 = vld [vmem:[%s2847_s2] sm:$0x3f] }
  0x7c   :  { %v77_v35 = vsel %vm76_vm1, %v67_v21, %v75_v31  ;;  %v49_v36 = vsel %vm48_vm2, %v38_v22, %v47_v32  ;;  %v1941_v37 = vpop.permute.xlu1 %96  ;;  %v95_v38 = vpop.permute.xlu0 %94 }
  0x7d   :  { %83 = vst [vmem:[#allocation2 + $0x2] ss:$8 sm:$0xf] %v77_v35  ;;  %84 = vst [vmem:[#allocation2 + $0x2] ss:$8 sm:$0xf0] %v77_v35 }
  0x7e   :  { %55 = vst [vmem:[#allocation2 + $0x1] ss:$8 sm:$0xf] %v49_v36  ;;  %56 = vst [vmem:[#allocation2 + $0x1] ss:$8 sm:$0xf0] %v49_v36  ;;  %518 = vrot.lane.b32.xlu1 %v510_v33, %s2860_s17  ;;  %490 = vrot.lane.b32.xlu0 %v482_v34, %s2861_s18 }
  0x7f   :  { %v101_v39 = vrot.slane %v1941_v37, 1  ;;  %v100_v40 = vrot.slane %v95_v38, 1 }
  0x80   :  { %v1959_v46 = vpop.permute.xlu1 %124  ;;  %v123_v47 = vpop.permute.xlu0 %122 }
  0x81   :  { %v103_v41 = vsel %vm46_vm0, %v100_v40, %v101_v39  ;;  %v129_v48 = vrot.slane %v1959_v46, 1  ;;  %v128_v49 = vrot.slane %v123_v47, 1 }
  0x82   :  { %v105_v45 = vsel %vm104_vm3, %v95_v38, %v103_v41  ;;  %582 = vrot.lane.b32.xlu1 %v574_v42, %s1729_s24  ;;  %546 = vrot.lane.b32.xlu0 %v538_v43, %s2862_s26 }
  0x83   :  { %111 = vst [vmem:[#allocation2 + $0x3] ss:$8 sm:$0xf] %v105_v45  ;;  %112 = vst [vmem:[#allocation2 + $0x3] ss:$8 sm:$0xf0] %v105_v45  ;;  %v131_v50 = vsel %vm46_vm0, %v128_v49, %v129_v48 }
  0x84   :  { %v133_v53 = vsel %vm132_vm4, %v123_v47, %v131_v50  ;;  %v1974_v54 = vpop.permute.xlu1 %152  ;;  %v151_v55 = vpop.permute.xlu0 %150 }
  0x85   :  { %139 = vst [vmem:[#allocation2 + $0x4] ss:$8 sm:$0xf] %v133_v53  ;;  %140 = vst [vmem:[#allocation2 + $0x4] ss:$8 sm:$0xf0] %v133_v53 }
  0x86   :  { %v157_v56 = vrot.slane %v1974_v54, 1  ;;  %v156_v57 = vrot.slane %v151_v55, 1  ;;  %636 = vrot.lane.b32.xlu1 %v628_v51, %s1730_s29  ;;  %609 = vrot.lane.b32.xlu0 %v601_v52, %s1728_s23 }
  0x88   :  { %v159_v58 = vsel %vm46_vm0, %v156_v57, %v157_v56  ;;  %v1986_v61 = vpop.permute.xlu1 %180  ;;  %v179_v62 = vpop.permute.xlu0 %178 }
  0x89   :  { %v161_v60 = vsel %vm160_vm5, %v151_v55, %v159_v58  ;;  %v185_v63 = vrot.slane %v1986_v61, 1  ;;  %v184_v0 = vrot.slane %v179_v62, 1 }
  0x8a   :  { %167 = vst [vmem:[#allocation2 + $0x5] ss:$8 sm:$0xf] %v161_v60  ;;  %168 = vst [vmem:[#allocation2 + $0x5] ss:$8 sm:$0xf0] %v161_v60  ;;  %663 = vrot.lane.b32.xlu0 %v655_v59, %s1731_s30  ;;  %796 = vperm.xlu1 %1724, %v793_v28  }
  0x8b   :  { %v187_v1 = vsel %vm46_vm0, %v184_v0, %v185_v63 }
  0x8c   :  { %v189_v2 = vsel %vm188_vm6, %v179_v62, %v187_v1  ;;  %v1994_v3 = vpop.permute.xlu1 %208  ;;  %v207_v4 = vpop.permute.xlu0 %206 }
  0x8d   :  { %195 = vst [vmem:[#allocation2 + $0x6] ss:$8 sm:$0xf] %v189_v2  ;;  %196 = vst [vmem:[#allocation2 + $0x6] ss:$8 sm:$0xf0] %v189_v2 }
  0x8e   :  { %v213_v5 = vrot.slane %v1994_v3, 1  ;;  %v212_v6 = vrot.slane %v207_v4, 1 }
  0x90   :  { %v215_v7 = vsel %vm46_vm0, %v212_v6, %v213_v5  ;;  %v2001_v10 = vpop.permute.xlu1 %236  ;;  %v235_v11 = vpop.permute.xlu0 %234 }
  0x91   :  { %v217_v8 = vsel %vm216_vm7, %v207_v4, %v215_v7  ;;  %v241_v12 = vrot.slane %v2001_v10, 1  ;;  %v240_v13 = vrot.slane %v235_v11, 1 }
  0x92   :  { %223 = vst [vmem:[#allocation2 + $0x7] ss:$8 sm:$0xf] %v217_v8  ;;  %224 = vst [vmem:[#allocation2 + $0x7] ss:$8 sm:$0xf0] %v217_v8 }
  0x93   :  { %v243_v14 = vsel %vm46_vm0, %v240_v13, %v241_v12 }
  0x94   :  { %v245_v15 = vsel %vm244_vm8, %v235_v11, %v243_v14  ;;  %v2008_v16 = vpop.permute.xlu1 %264  ;;  %v263_v17 = vpop.permute.xlu0 %262 }
  0x95   :  { %251 = vst [vmem:[#allocation2 + $0x80] ss:$8 sm:$0xf] %v245_v15  ;;  %252 = vst [vmem:[#allocation2 + $0x80] ss:$8 sm:$0xf0] %v245_v15 }
  0x96   :  { %v269_v18 = vrot.slane %v2008_v16, 1  ;;  %v268_v19 = vrot.slane %v263_v17, 1 }
  0x98   :  { %v271_v20 = vsel %vm46_vm0, %v268_v19, %v269_v18  ;;  %v2015_v22 = vpop.permute.xlu1 %292  ;;  %v291_v23 = vpop.permute.xlu0 %290 }
  0x99   :  { %v273_v21 = vsel %vm272_vm9, %v263_v17, %v271_v20  ;;  %v297_v24 = vrot.slane %v2015_v22, 1  ;;  %v296_v25 = vrot.slane %v291_v23, 1 }
  0x9a   :  { %279 = vst [vmem:[#allocation2 + $0x81] ss:$8 sm:$0xf] %v273_v21  ;;  %280 = vst [vmem:[#allocation2 + $0x81] ss:$8 sm:$0xf0] %v273_v21 }
  0x9b   :  { %v299_v31 = vsel %vm46_vm0, %v296_v25, %v297_v24 }
  0x9c   :  { %v301_v32 = vsel %vm300_vm10, %v291_v23, %v299_v31  ;;  %v2025_v33 = vpop.permute.xlu1 %320  ;;  %v319_v34 = vpop.permute.xlu0 %318  ;;  %v698_v31 = vld [vmem:[#allocation2 + $0x8] sm:$0xff] }
  0x9d   :  { %307 = vst [vmem:[#allocation2 + $0x82] ss:$8 sm:$0xf] %v301_v32  ;;  %308 = vst [vmem:[#allocation2 + $0x82] ss:$8 sm:$0xf0] %v301_v32 }
  0x9e   :  { %v325_v35 = vrot.slane %v2025_v33, 1  ;;  %v324_v36 = vrot.slane %v319_v34, 1  ;;  %v700_v32 = vld [vmem:[#allocation2 + $0x18] sm:$0xff] }
  0xa0   :  { %v327_v38 = vsel %vm46_vm0, %v324_v36, %v325_v35  ;;  %v2032_v41 = vpop.permute.xlu1 %348  ;;  %v347_v42 = vpop.permute.xlu0 %346 }
  0xa1   :  { %v329_v40 = vsel %vm328_vm11, %v319_v34, %v327_v38  ;;  %v353_v43 = vrot.slane %v2032_v41, 1  ;;  %v352_v44 = vrot.slane %v347_v42, 1 }
  0xa2   :  { %335 = vst [vmem:[#allocation2 + $0x83] ss:$8 sm:$0xf] %v329_v40  ;;  %336 = vst [vmem:[#allocation2 + $0x83] ss:$8 sm:$0xf0] %v329_v40 }
  0xa3   :  { %v355_v45 = vsel %vm46_vm0, %v352_v44, %v353_v43 }
  0xa4   :  { %v357_v47 = vsel %vm356_vm12, %v347_v42, %v355_v45  ;;  %v2039_v49 = vpop.permute.xlu1 %376  ;;  %v375_v50 = vpop.permute.xlu0 %374 }
  0xa5   :  { %363 = vst [vmem:[#allocation2 + $0x84] ss:$8 sm:$0xf] %v357_v47  ;;  %364 = vst [vmem:[#allocation2 + $0x84] ss:$8 sm:$0xf0] %v357_v47 }
  0xa6   :  { %v381_v51 = vrot.slane %v2039_v49, 1  ;;  %v380_v52 = vrot.slane %v375_v50, 1 }
  0xa8   :  { %v383_v53 = vsel %vm46_vm0, %v380_v52, %v381_v51  ;;  %v2046_v57 = vpop.permute.xlu1 %404  ;;  %v403_v58 = vpop.permute.xlu0 %402 }
  0xa9   :  { %v385_v55 = vsel %vm2856_vm13, %v375_v50, %v383_v53  ;;  %v409_v59 = vrot.slane %v2046_v57, 1  ;;  %v408_v60 = vrot.slane %v403_v58, 1  ;;  %vm2858_vm13 = vcmask 252928   ;;  %v697_v53 = vld [vmem:[#allocation2] sm:$0xff] }
  0xaa   :  { %391 = vst [vmem:[#allocation2 + $0x85] ss:$8 sm:$0xf] %v385_v55  ;;  %392 = vst [vmem:[#allocation2 + $0x85] ss:$8 sm:$0xf0] %v385_v55 }
  0xab   :  { %v411_v62 = vsel %vm46_vm0, %v408_v60, %v409_v59  ;;  %v699_v55 = vld [vmem:[#allocation2 + $0x10] sm:$0xff] }
  0xac   :  { %v413_v0 = vsel %vm2857_vm14, %v403_v58, %v411_v62  ;;  %v2053_v1 = vpop.permute.xlu1 %432  ;;  %v431_v2 = vpop.permute.xlu0 %430  ;;  %vm2859_vm14 = vcmask 244736  }
  0xad   :  { %419 = vst [vmem:[#allocation2 + $0x86] ss:$8 sm:$0xf] %v413_v0  ;;  %420 = vst [vmem:[#allocation2 + $0x86] ss:$8 sm:$0xf0] %v413_v0 }
  0xae   :  { %v437_v4 = vrot.slane %v2053_v1, 1  ;;  %v436_v6 = vrot.slane %v431_v2, 1 }
  0xb0   :  { %v439_v7 = vsel %vm46_vm0, %v436_v6, %v437_v4  ;;  %v2060_v11 = vpop.permute.xlu1 %460  ;;  %v459_v13 = vpop.permute.xlu0 %458 }
  0xb1   :  { %v441_v8 = vsel %vm440_vm15, %v431_v2, %v439_v7  ;;  %v465_v14 = vrot.slane %v2060_v11, 1  ;;  %v464_v15 = vrot.slane %v459_v13, 1 }
  0xb2   :  { %447 = vst [vmem:[#allocation2 + $0x87] ss:$8 sm:$0xf] %v441_v8  ;;  %448 = vst [vmem:[#allocation2 + $0x87] ss:$8 sm:$0xf0] %v441_v8 }
  0xb3   :  { %v467_v17 = vsel %vm46_vm0, %v464_v15, %v465_v14 }
  0xb4   :  { %v469_v19 = vsel %vm2858_vm13, %v459_v13, %v467_v17  ;;  %v2067_v20 = vpop.permute.xlu1 %488  ;;  %v487_v21 = vpop.permute.xlu0 %486  ;;  %vm524_vm13 = vcmask 236544  }
  0xb5   :  { %475 = vst [vmem:[#allocation2 + $0x100] ss:$8 sm:$0xf] %v469_v19  ;;  %476 = vst [vmem:[#allocation2 + $0x100] ss:$8 sm:$0xf0] %v469_v19 }
  0xb6   :  { %v493_v23 = vrot.slane %v2067_v20, 1  ;;  %v492_v25 = vrot.slane %v487_v21, 1 }
  0xb8   :  { %v495_v28 = vsel %vm46_vm0, %v492_v25, %v493_v23  ;;  %v2074_v36 = vpop.permute.xlu1 %516  ;;  %v515_v38 = vpop.permute.xlu0 %514 }
  0xb9   :  { %v497_v34 = vsel %vm2859_vm14, %v487_v21, %v495_v28  ;;  %v714_v40 = vld [vmem:[#allocation2 + $0x88] sm:$0xff]  ;;  %v716_v42 = vld [vmem:[#allocation2 + $0x98] sm:$0xff]  ;;  %v713_v44 = vld [vmem:[#allocation2 + $0x80] sm:$0xff]  ;;  %v521_v45 = vrot.slane %v2074_v36, 1  ;;  %v520_v47 = vrot.slane %v515_v38, 1  ;;  %vm552_vm14 = vcmask 228352  }
  0xba   :  { %503 = vst [vmem:[#allocation2 + $0x101] ss:$8 sm:$0xf] %v497_v34  ;;  %504 = vst [vmem:[#allocation2 + $0x101] ss:$8 sm:$0xf0] %v497_v34  ;;  %v762_v50 = vpack.c.bf16 %v714_v40, %v698_v31  ;;  %v764_v52 = vpack.c.bf16 %v716_v42, %v700_v32  ;;  %v761_v60 = vpack.c.bf16 %v713_v44, %v697_v53 }
  0xbb   :  { %v715_v58 = vld [vmem:[#allocation2 + $0x90] sm:$0xff]  ;;  %v523_v0 = vsel %vm46_vm0, %v520_v47, %v521_v45 }
  0xbc   :  { %v763_v62 = vpack.c.bf16 %v715_v58, %v699_v55  ;;  %802 = vmatprep.subr.bf16.mxu0 %v762_v50  ;;  %843 = vmatprep.subr.bf16.mxu1 %v764_v52  ;;  %v525_v2 = vsel %vm524_vm13, %v515_v38, %v523_v0  ;;  %v2081_v6 = vpop.permute.xlu1 %544  ;;  %v543_v7 = vpop.permute.xlu0 %542 }
  0xbd   :  { %803 = vmatpush1.bf16.msra.mxu0 %v761_v60  ;;  %531 = vst [vmem:[#allocation2 + $0x102] ss:$8 sm:$0xf] %v525_v2  ;;  %532 = vst [vmem:[#allocation2 + $0x102] ss:$8 sm:$0xf0] %v525_v2 }
  0xbe   :  { %844 = vmatpush1.bf16.msra.mxu1 %v763_v62  ;;  %v549_v8 = vrot.slane %v2081_v6, 1  ;;  %v548_v13 = vrot.slane %v543_v7, 1 }
  0xc0   :  { %v551_v15 = vsel %vm46_vm0, %v548_v13, %v549_v8  ;;  %v2088_v19 = vpop.permute.xlu1 %580  ;;  %v579_v21 = vpop.permute.xlu0 %578 }
  0xc1   :  { %v553_v17 = vsel %vm552_vm14, %v543_v7, %v551_v15  ;;  %v585_v25 = vrot.slane %v2088_v19, 1  ;;  %v584_v28 = vrot.slane %v579_v21, 1 }
  0xc2   :  { %559 = vst [vmem:[#allocation2 + $0x103] ss:$8 sm:$0xf] %v553_v17  ;;  %560 = vst [vmem:[#allocation2 + $0x103] ss:$8 sm:$0xf0] %v553_v17 }
  0xc3   :  { %v587_v31 = vsel %vm46_vm0, %v584_v28, %v585_v25 }
  0xc4   :  { %v588_v32 = vsel %vm48_vm2, %v579_v21, %v587_v31  ;;  %v2095_v34 = vpop.permute.xlu1 %607  ;;  %v606_v38 = vpop.permute.xlu0 %605 }
  0xc5   :  { %594 = vst [vmem:[#allocation2 + $0x105] ss:$8 sm:$0xf] %v588_v32  ;;  %595 = vst [vmem:[#allocation2 + $0x105] ss:$8 sm:$0xf0] %v588_v32 }
  0xc6   :  { %v612_v40 = vrot.slane %v2095_v34, 1  ;;  %v611_v42 = vrot.slane %v606_v38, 1 }
  0xc8   :  { %v614_v44 = vsel %vm46_vm0, %v611_v42, %v612_v40  ;;  %v2102_v50 = vpop.permute.xlu1 %634  ;;  %v633_v52 = vpop.permute.xlu0 %632 }
  0xc9   :  { %v615_v47 = vsel %vm76_vm1, %v606_v38, %v614_v44  ;;  %v639_v53 = vrot.slane %v2102_v50, 1  ;;  %v638_v55 = vrot.slane %v633_v52, 1 }
  0xca   :  { %621 = vst [vmem:[#allocation2 + $0x106] ss:$8 sm:$0xf] %v615_v47  ;;  %622 = vst [vmem:[#allocation2 + $0x106] ss:$8 sm:$0xf0] %v615_v47 }
  0xcb   :  { %v641_v58 = vsel %vm46_vm0, %v638_v55, %v639_v53 }
  0xcc   :  { %v642_v60 = vsel %vm104_vm3, %v633_v52, %v641_v58  ;;  %v2109_v62 = vpop.permute.xlu1 %661  ;;  %v660_v0 = vpop.permute.xlu0 %659 }
  0xcd   :  { %648 = vst [vmem:[#allocation2 + $0x107] ss:$8 sm:$0xf] %v642_v60  ;;  %649 = vst [vmem:[#allocation2 + $0x107] ss:$8 sm:$0xf0] %v642_v60 }
  0xce   :  { %v666_v2 = vrot.slane %v2109_v62, 1  ;;  %v665_v7 = vrot.slane %v660_v0, 1  ;;  %v718_v60 = vld [vmem:[#allocation2 + $0xa8] sm:$0xff] }
  0xd0   :  { %v668_v13 = vsel %vm46_vm0, %v665_v7, %v666_v2  ;;  %v71_v17 = vpop.permute.xlu1 %70  ;;  %v42_v21 = vpop.permute.xlu0 %41  ;;  %v720_v7 = vld [vmem:[#allocation2 + $0xb8] sm:$0xff] }
  0xd1   :  { %v669_v15 = vsel %vm132_vm4, %v660_v0, %v668_v13  ;;  %v74_v28 = vrot.slane %v71_v17, 1  ;;  %v45_v31 = vrot.slane %v42_v21, 1 }
  0xd2   :  { %675 = vst [vmem:[#allocation2 + $0x180] ss:$8 sm:$0xf] %v669_v15  ;;  %676 = vst [vmem:[#allocation2 + $0x180] ss:$8 sm:$0xf0] %v669_v15 }
  0xd3   :  { %v78_v32 = vsel %vm46_vm0, %v73_v29, %v74_v28  ;;  %v50_v38 = vsel %vm46_vm0, %v44_v30, %v45_v31 }
  0xd4   :  { %v79_v42 = vsel %vm76_vm1, %v1919_v26, %v78_v32  ;;  %v51_v44 = vsel %vm48_vm2, %v1921_v27, %v50_v38  ;;  %v127_v47 = vpop.permute.xlu1 %126  ;;  %v99_v52 = vpop.permute.xlu0 %98  ;;  %v730_v30 = vld [vmem:[#allocation2 + $0x108] sm:$0xff]  ;;  %v732_v0 = vld [vmem:[#allocation2 + $0x118] sm:$0xff] }
  0xd5   :  { %86 = vst [vmem:[#allocation2 + $0x42] ss:$8 sm:$0xf] %v79_v42  ;;  %87 = vst [vmem:[#allocation2 + $0x42] ss:$8 sm:$0xf0] %v79_v42 }
  0xd6   :  { %58 = vst [vmem:[#allocation2 + $0x41] ss:$8 sm:$0xf] %v51_v44  ;;  %59 = vst [vmem:[#allocation2 + $0x41] ss:$8 sm:$0xf0] %v51_v44 }
  0xd7   :  { %v130_v55 = vrot.slane %v127_v47, 1  ;;  %v102_v58 = vrot.slane %v99_v52, 1  ;;  %v702_v27 = vld [vmem:[#allocation2 + $0x28] sm:$0xff]  ;;  %v729_v44 = vld [vmem:[#allocation2 + $0x100] sm:$0xff]  ;;  %v731_v47 = vld [vmem:[#allocation2 + $0x110] sm:$0xff] }
  0xd8   :  { %v183_v17 = vpop.permute.xlu1 %182  ;;  %v155_v21 = vpop.permute.xlu0 %154 }
  0xd9   :  { %v134_v29 = vsel %vm46_vm0, %v129_v48, %v130_v55  ;;  %v106_v26 = vsel %vm46_vm0, %v101_v39, %v102_v58  ;;  %v746_v28 = vld [vmem:[#allocation2 + $0x188] sm:$0xff]  ;;  %v748_v31 = vld [vmem:[#allocation2 + $0x198] sm:$0xff]  ;;  %v745_v32 = vld [vmem:[#allocation2 + $0x180] sm:$0xff]  ;;  %v186_v39 = vrot.slane %v183_v17, 1  ;;  %v158_v48 = vrot.slane %v155_v21, 1 }
  0xda   :  { %v135_v13 = vsel %vm132_vm4, %v1959_v46, %v134_v29  ;;  %v107_v15 = vsel %vm104_vm3, %v1941_v37, %v106_v26  ;;  %v778_v38 = vpack.c.bf16 %v746_v28, %v730_v30  ;;  %v780_v42 = vpack.c.bf16 %v748_v31, %v732_v0  ;;  %v747_v52 = vld [vmem:[#allocation2 + $0x190] sm:$0xff]  ;;  %v704_v37 = vld [vmem:[#allocation2 + $0x38] sm:$0xff]  ;;  %v717_v30 = vld [vmem:[#allocation2 + $0xa0] sm:$0xff] }
  0xdb   :  { %142 = vst [vmem:[#allocation2 + $0x44] ss:$8 sm:$0xf] %v135_v13  ;;  %143 = vst [vmem:[#allocation2 + $0x44] ss:$8 sm:$0xf0] %v135_v13  ;;  %v777_v46 = vpack.c.bf16 %v745_v32, %v729_v44  ;;  %v779_v55 = vpack.c.bf16 %v747_v52, %v731_v47  ;;  %v766_v58 = vpack.c.bf16 %v718_v60, %v702_v27 }
  0xdc   :  { %114 = vst [vmem:[#allocation2 + $0x43] ss:$8 sm:$0xf] %v107_v15  ;;  %115 = vst [vmem:[#allocation2 + $0x43] ss:$8 sm:$0xf0] %v107_v15  ;;  %v190_v29 = vsel %vm46_vm0, %v185_v63, %v186_v39  ;;  %v162_v26 = vsel %vm46_vm0, %v157_v56, %v158_v48  ;;  %804 = vmatprep.subr.bf16.mxu0 %v778_v38  ;;  %845 = vmatprep.subr.bf16.mxu1 %v780_v42  ;;  %v239_v27 = vpop.permute.xlu1 %238  ;;  %v211_v21 = vpop.permute.xlu0 %210 }
  0xdd   :  { %v768_v13 = vpack.c.bf16 %v720_v7, %v704_v37  ;;  %v719_v0 = vld [vmem:[#allocation2 + $0xb0] sm:$0xff]  ;;  %v750_v15 = vld [vmem:[#allocation2 + $0x1a8] sm:$0xff]  ;;  %v191_v17 = vsel %vm188_vm6, %v1986_v61, %v190_v29  ;;  %v163_v60 = vsel %vm160_vm5, %v1974_v54, %v162_v26  ;;  %805 = vmatpush1.bf16.msra.mxu0 %v777_v46  ;;  %846 = vmatpush1.bf16.msra.mxu1 %v779_v55  ;;  %v2149_v56 = vld [vmem:[%s2848_s1] sm:$0x7]  ;;  %v242_v7 = vrot.slane %v239_v27, 1 }
  0xde   :  { %v752_v63 = vld [vmem:[#allocation2 + $0x1b8] sm:$0xff]  ;;  %198 = vst [vmem:[#allocation2 + $0x46] ss:$8 sm:$0xf] %v191_v17  ;;  %v214_v28 = vrot.slane %v211_v21, 1  ;;  %884 = vmatprep.subr.bf16.mxu0 %v766_v58  ;;  %v701_v61 = vld [vmem:[#allocation2 + $0x20] sm:$0xff] }
  0xdf   :  { %199 = vst [vmem:[#allocation2 + $0x46] ss:$8 sm:$0xf0] %v191_v17  ;;  %170 = vst [vmem:[#allocation2 + $0x45] ss:$8 sm:$0xf] %v163_v60  ;;  %925 = vmatprep.subr.bf16.mxu1 %v768_v13  ;;  %v765_v32 = vpack.c.bf16 %v717_v30, %v701_v61  ;;  %v246_v42 = vsel %vm46_vm0, %v241_v12, %v242_v7 }
  0xe0   :  { %171 = vst [vmem:[#allocation2 + $0x45] ss:$8 sm:$0xf0] %v163_v60  ;;  %v703_v54 = vld [vmem:[#allocation2 + $0x30] sm:$0xff]  ;;  %v734_v31 = vld [vmem:[#allocation2 + $0x128] sm:$0xff]  ;;  %v736_v38 = vld [vmem:[#allocation2 + $0x138] sm:$0xff]  ;;  %v218_v44 = vsel %vm46_vm0, %v213_v5, %v214_v28  ;;  %1695 = vmatmul.mubr.msk.bf16.vlgmr.msra.gmra.mrb[0].mxu0 %vm440_vm15, %v2149_v56  ;;  %1696 = vmatmul.mubr.msk.bf16.vlgmr.msra.gmra.mrb[0].mxu1 %vm440_vm15, %v2149_v56  ;;  %v247_v55 = vsel %vm244_vm8, %v2001_v10, %v246_v42  ;;  %v295_v12 = vpop.permute.xlu1 %294  ;;  %v267_v37 = vpop.permute.xlu0 %266 }
  0xe1   :  { %v767_v39 = vpack.c.bf16 %v719_v0, %v703_v54  ;;  %v782_v48 = vpack.c.bf16 %v750_v15, %v734_v31  ;;  %v784_v47 = vpack.c.bf16 %v752_v63, %v736_v38  ;;  %v749_v52 = vld [vmem:[#allocation2 + $0x1a0] sm:$0xff]  ;;  %v751_v46 = vld [vmem:[#allocation2 + $0x1b0] sm:$0xff]  ;;  %v219_v58 = vsel %vm216_vm7, %v1994_v3, %v218_v44  ;;  %885 = vmatpush1.bf16.msra.mxu0 %v765_v32 }
  0xe2   :  { %254 = vst [vmem:[#allocation2 + $0xc0] ss:$8 sm:$0xf] %v247_v55  ;;  %255 = vst [vmem:[#allocation2 + $0xc0] ss:$8 sm:$0xf0] %v247_v55  ;;  %916 = vmatprep.mubr.bf16.mxu0 %v1748_v9  ;;  %957 = vmatprep.mubr.bf16.mxu1 %v1748_v9 }
  0xe3   :  { %926 = vmatpush1.bf16.msra.mxu1 %v767_v39  ;;  %226 = vst [vmem:[#allocation2 + $0x47] ss:$8 sm:$0xf] %v219_v58  ;;  %227 = vst [vmem:[#allocation2 + $0x47] ss:$8 sm:$0xf0] %v219_v58  ;;  %886 = vmatprep.subr.bf16.mxu0 %v782_v48 }
  0xe4   :  { %v298_v5 = vrot.slane %v295_v12, 1  ;;  %v270_v29 = vrot.slane %v267_v37, 1  ;;  %927 = vmatprep.subr.bf16.mxu1 %v784_v47  ;;  %v733_v26 = vld [vmem:[#allocation2 + $0x120] sm:$0xff]  ;;  %v735_v13 = vld [vmem:[#allocation2 + $0x130] sm:$0xff]  ;;  %v351_v60 = vpop.permute.xlu1 %350  ;;  %v323_v27 = vpop.permute.xlu0 %322  ;;  %vm2863_vm6 = vcmask 490496   ;;  %vm2864_vm7 = vcmask 498688  }
  0xe5   :  { %v781_v30 = vpack.c.bf16 %v749_v52, %v733_v26  ;;  %v783_v0 = vpack.c.bf16 %v751_v46, %v735_v13  ;;  %v354_v21 = vrot.slane %v351_v60, 1  ;;  %vm2865_vm8 = vcmask 252928  }
  0xe6   :  { %v302_v3 = vsel %vm46_vm0, %v297_v24, %v298_v5  ;;  %v274_v10 = vsel %vm46_vm0, %v269_v18, %v270_v29  ;;  %v326_v24 = vrot.slane %v323_v27, 1 }
  0xe7   :  { %v303_v15 = vsel %vm300_vm10, %v2015_v22, %v302_v3  ;;  %v275_v17 = vsel %vm272_vm9, %v2008_v16, %v274_v10  ;;  %887 = vmatpush1.bf16.msra.mxu0 %v781_v30  ;;  %928 = vmatpush1.bf16.msra.mxu1 %v783_v0  ;;  %v358_v18 = vsel %vm46_vm0, %v353_v43, %v354_v21  ;;  %vm2866_vm9 = vcmask 244736  }
  0xe8   :  { %310 = vst [vmem:[#allocation2 + $0xc2] ss:$8 sm:$0xf] %v303_v15  ;;  %311 = vst [vmem:[#allocation2 + $0xc2] ss:$8 sm:$0xf0] %v303_v15  ;;  %v330_v22 = vsel %vm46_vm0, %v325_v35, %v326_v24  ;;  %v359_v16 = vsel %vm356_vm12, %v2032_v41, %v358_v18  ;;  %v407_v7 = vpop.permute.xlu1 %406  ;;  %v379_v28 = vpop.permute.xlu0 %378 }
  0xe9   :  { %282 = vst [vmem:[#allocation2 + $0xc1] ss:$8 sm:$0xf] %v275_v17  ;;  %283 = vst [vmem:[#allocation2 + $0xc1] ss:$8 sm:$0xf0] %v275_v17  ;;  %v331_v63 = vsel %vm328_vm11, %v2025_v33, %v330_v22 }
  0xea   :  { %1697 = vmatmul.mubr.msk.bf16.vlgmr.msra.gmra.mrb[4].mxu0 %vm440_vm15, %v2149_v56  ;;  %1698 = vmatmul.mubr.msk.bf16.vlgmr.msra.gmra.mrb[4].mxu1 %vm440_vm15, %v2149_v56  ;;  %366 = vst [vmem:[#allocation2 + $0xc4] ss:$8 sm:$0xf] %v359_v16  ;;  %367 = vst [vmem:[#allocation2 + $0xc4] ss:$8 sm:$0xf0] %v359_v16 }
  0xeb   :  { %998 = vmatprep.mubr.bf16.mxu0 %v1748_v9  ;;  %1039 = vmatprep.mubr.bf16.mxu1 %v1748_v9  ;;  %338 = vst [vmem:[#allocation2 + $0xc3] ss:$8 sm:$0xf] %v331_v63  ;;  %339 = vst [vmem:[#allocation2 + $0xc3] ss:$8 sm:$0xf0] %v331_v63 }
  0xec   :  { %v410_v35 = vrot.slane %v407_v7, 1  ;;  %v382_v43 = vrot.slane %v379_v28, 1  ;;  %v463_v31 = vpop.permute.xlu1 %462  ;;  %v435_v32 = vpop.permute.xlu0 %434  ;;  %v708_v12 = vld [vmem:[#allocation2 + $0x58] sm:$0xff]  ;;  %v705_v10 = vld [vmem:[#allocation2 + $0x40] sm:$0xff]  ;;  %v707_v15 = vld [vmem:[#allocation2 + $0x50] sm:$0xff] }
  0xed   :  { %v466_v39 = vrot.slane %v463_v31, 1  ;;  %v438_v48 = vrot.slane %v435_v32, 1 }
  0xee   :  { %v414_v61 = vsel %vm46_vm0, %v409_v59, %v410_v35  ;;  %v386_v33 = vsel %vm46_vm0, %v381_v51, %v382_v43 }
  0xef   :  { %v415_v41 = vsel %vm2863_vm6, %v2046_v57, %v414_v61  ;;  %v387_v54 = vsel %vm2864_vm7, %v2039_v49, %v386_v33  ;;  %v470_v59 = vsel %vm46_vm0, %v465_v14, %v466_v39  ;;  %v442_v51 = vsel %vm46_vm0, %v437_v4, %v438_v48  ;;  %v712_v39 = vld [vmem:[#allocation2 + $0x78] sm:$0xff] }
  0xf0   :  { %422 = vst [vmem:[#allocation2 + $0xc6] ss:$8 sm:$0xf] %v415_v41  ;;  %423 = vst [vmem:[#allocation2 + $0xc6] ss:$8 sm:$0xf0] %v415_v41  ;;  %v471_v57 = vsel %vm2865_vm8, %v2060_v11, %v470_v59  ;;  %v443_v49 = vsel %vm440_vm15, %v2053_v1, %v442_v51  ;;  %v519_v38 = vpop.permute.xlu1 %518  ;;  %v491_v42 = vpop.permute.xlu0 %490 }
  0xf1   :  { %394 = vst [vmem:[#allocation2 + $0xc5] ss:$8 sm:$0xf] %v387_v54  ;;  %395 = vst [vmem:[#allocation2 + $0xc5] ss:$8 sm:$0xf0] %v387_v54 }
  0xf2   :  { %478 = vst [vmem:[#allocation2 + $0x140] ss:$8 sm:$0xf] %v471_v57  ;;  %479 = vst [vmem:[#allocation2 + $0x140] ss:$8 sm:$0xf0] %v471_v57 }
  0xf3   :  { %450 = vst [vmem:[#allocation2 + $0xc7] ss:$8 sm:$0xf] %v443_v49  ;;  %451 = vst [vmem:[#allocation2 + $0xc7] ss:$8 sm:$0xf0] %v443_v49 }
  0xf4   :  { %v522_v44 = vrot.slane %v519_v38, 1  ;;  %v494_v47 = vrot.slane %v491_v42, 1  ;;  %v583_v52 = vpop.permute.xlu1 %582  ;;  %v547_v46 = vpop.permute.xlu0 %546  ;;  %v709_v38 = vld [vmem:[#allocation2 + $0x60] sm:$0xff]  ;;  %v711_v42 = vld [vmem:[#allocation2 + $0x70] sm:$0xff] }
  0xf5   :  { %v586_v55 = vrot.slane %v583_v52, 1  ;;  %v550_v58 = vrot.slane %v547_v46, 1 }
  0xf6   :  { %v526_v14 = vsel %vm46_vm0, %v521_v45, %v522_v44  ;;  %v498_v4 = vsel %vm46_vm0, %v493_v23, %v494_v47 }
  0xf7   :  { %v527_v11 = vsel %vm524_vm13, %v2074_v36, %v526_v14  ;;  %v499_v1 = vsel %vm2866_vm9, %v2067_v20, %v498_v4  ;;  %v589_v45 = vsel %vm46_vm0, %v585_v25, %v586_v55  ;;  %v554_v23 = vsel %vm46_vm0, %v549_v8, %v550_v58  ;;  %v706_v36 = vld [vmem:[#allocation2 + $0x48] sm:$0xff] }
  0xf8   :  { %534 = vst [vmem:[#allocation2 + $0x142] ss:$8 sm:$0xf] %v527_v11  ;;  %535 = vst [vmem:[#allocation2 + $0x142] ss:$8 sm:$0xf0] %v527_v11  ;;  %v590_v20 = vsel %vm48_vm2, %v2088_v19, %v589_v45  ;;  %v555_v37 = vsel %vm552_vm14, %v2081_v6, %v554_v23  ;;  %v637_v5 = vpop.permute.xlu1 %636  ;;  %v610_v29 = vpop.permute.xlu0 %609 }
  0xf9   :  { %506 = vst [vmem:[#allocation2 + $0x141] ss:$8 sm:$0xf] %v499_v1  ;;  %507 = vst [vmem:[#allocation2 + $0x141] ss:$8 sm:$0xf0] %v499_v1 }
  0xfa   :  { %v722_v26 = vld [vmem:[#allocation2 + $0xc8] sm:$0xff]  ;;  %v724_v13 = vld [vmem:[#allocation2 + $0xd8] sm:$0xff]  ;;  %v721_v30 = vld [vmem:[#allocation2 + $0xc0] sm:$0xff]  ;;  %597 = vst [vmem:[#allocation2 + $0x145] ss:$8 sm:$0xf] %v590_v20 }
  0xfb   :  { %598 = vst [vmem:[#allocation2 + $0x145] ss:$8 sm:$0xf0] %v590_v20  ;;  %562 = vst [vmem:[#allocation2 + $0x143] ss:$8 sm:$0xf] %v555_v37  ;;  %v770_v8 = vpack.c.bf16 %v722_v26, %v706_v36  ;;  %v772_v3 = vpack.c.bf16 %v724_v13, %v708_v12  ;;  %v769_v19 = vpack.c.bf16 %v721_v30, %v705_v10  ;;  %v1134_v30 = vlaneseq }
  0xfc   :  { %563 = vst [vmem:[#allocation2 + $0x143] ss:$8 sm:$0xf0] %v555_v37  ;;  %v640_v25 = vrot.slane %v637_v5, 1  ;;  %v613_v0 = vrot.slane %v610_v29, 1  ;;  %v723_v17 = vld [vmem:[#allocation2 + $0xd0] sm:$0xff]  ;;  %v664_v18 = vpop.permute.xlu0 %663 }
  0xfd   :  { %v771_v60 = vpack.c.bf16 %v723_v17, %v707_v15  ;;  %966 = vmatprep.subr.bf16.mxu0 %v770_v8  ;;  %1007 = vmatprep.subr.bf16.mxu1 %v772_v3  ;;  %v728_v16 = vld [vmem:[#allocation2 + $0xf8] sm:$0xff]  ;;  %v725_v59 = vld [vmem:[#allocation2 + $0xe0] sm:$0xff]  ;;  %v727_v51 = vld [vmem:[#allocation2 + $0xf0] sm:$0xff] }
  0xfe   :  { %v643_v6 = vsel %vm46_vm0, %v639_v53, %v640_v25  ;;  %v616_v27 = vsel %vm46_vm0, %v612_v40, %v613_v0  ;;  %967 = vmatpush1.bf16.msra.mxu0 %v769_v19  ;;  %v667_v53 = vrot.slane %v664_v18, 1  ;;  %v776_v48 = vpack.c.bf16 %v728_v16, %v712_v39 }
  0xff   :  { %v644_v21 = vsel %vm104_vm3, %v2102_v50, %v643_v6  ;;  %v617_v24 = vsel %vm76_vm1, %v2095_v34, %v616_v27  ;;  %1008 = vmatpush1.bf16.msra.mxu1 %v771_v60  ;;  %v726_v50 = vld [vmem:[#allocation2 + $0xe8] sm:$0xff]  ;;  %v773_v44 = vpack.c.bf16 %v725_v59, %v709_v38  ;;  %v775_v47 = vpack.c.bf16 %v727_v51, %v711_v42  ;;  %v1130_v27 = vld [vmem:[%s2849_s5] sm:$0xff] }
 0x100   :  { %651 = vst [vmem:[#allocation2 + $0x147] ss:$8 sm:$0xf] %v644_v21  ;;  %652 = vst [vmem:[#allocation2 + $0x147] ss:$8 sm:$0xf0] %v644_v21  ;;  %v670_v40 = vsel %vm46_vm0, %v666_v2, %v667_v53 }
 0x101   :  { %624 = vst [vmem:[#allocation2 + $0x146] ss:$8 sm:$0xf] %v617_v24  ;;  %625 = vst [vmem:[#allocation2 + $0x146] ss:$8 sm:$0xf0] %v617_v24  ;;  %v671_v22 = vsel %vm132_vm4, %v2109_v62, %v670_v40 }
 0x102   :  { %678 = vst [vmem:[#allocation2 + $0x1c0] ss:$8 sm:$0xf] %v671_v22  ;;  %679 = vst [vmem:[#allocation2 + $0x1c0] ss:$8 sm:$0xf0] %v671_v22 }
 0x103   :  { %v710_v2 = vld [vmem:[#allocation2 + $0x68] sm:$0xff]  ;;  %vm1230_vm0 = vcmask 1045504  }
 0x104   :  { %v774_v62 = vpack.c.bf16 %v726_v50, %v710_v2 }
 0x108   :  { %v738_v34 = vld [vmem:[#allocation2 + $0x148] sm:$0xff]  ;;  %v740_v63 = vld [vmem:[#allocation2 + $0x158] sm:$0xff]  ;;  %v737_v7 = vld [vmem:[#allocation2 + $0x140] sm:$0xff] }
 0x109   :  { %v754_v28 = vld [vmem:[#allocation2 + $0x1c8] sm:$0xff]  ;;  %v756_v35 = vld [vmem:[#allocation2 + $0x1d8] sm:$0xff]  ;;  %v753_v43 = vld [vmem:[#allocation2 + $0x1c0] sm:$0xff]  ;;  %v2262_v6 = vpop.permute.xlu1 %796 }
 0x10a   :  { %v786_v61 = vpack.c.bf16 %v754_v28, %v738_v34  ;;  %v788_v33 = vpack.c.bf16 %v756_v35, %v740_v63  ;;  %v785_v41 = vpack.c.bf16 %v753_v43, %v737_v7  ;;  %v739_v54 = vld [vmem:[#allocation2 + $0x150] sm:$0xff]  ;;  %v758_v57 = vld [vmem:[#allocation2 + $0x1e8] sm:$0xff]  ;;  %v760_v49 = vld [vmem:[#allocation2 + $0x1f8] sm:$0xff] }
 0x10b   :  { %v755_v31 = vld [vmem:[#allocation2 + $0x1d0] sm:$0xff]  ;;  %v742_v14 = vld [vmem:[#allocation2 + $0x168] sm:$0xff]  ;;  %v744_v4 = vld [vmem:[#allocation2 + $0x178] sm:$0xff] }
 0x10c   :  { %v787_v32 = vpack.c.bf16 %v755_v31, %v739_v54  ;;  %968 = vmatprep.subr.bf16.mxu0 %v786_v61  ;;  %1009 = vmatprep.subr.bf16.mxu1 %v788_v33  ;;  %v790_v11 = vpack.c.bf16 %v758_v57, %v742_v14  ;;  %v792_v1 = vpack.c.bf16 %v760_v49, %v744_v4  ;;  %v757_v52 = vld [vmem:[#allocation2 + $0x1e0] sm:$0xff]  ;;  %v759_v46 = vld [vmem:[#allocation2 + $0x1f0] sm:$0xff] }
 0x10d   :  { %969 = vmatpush1.bf16.msra.mxu0 %v785_v41  ;;  %v741_v55 = vld [vmem:[#allocation2 + $0x160] sm:$0xff]  ;;  %v743_v58 = vld [vmem:[#allocation2 + $0x170] sm:$0xff] }
 0x10e   :  { %1010 = vmatpush1.bf16.msra.mxu1 %v787_v32  ;;  %1048 = vmatprep.subr.bf16.mxu0 %v774_v62  ;;  %v789_v45 = vpack.c.bf16 %v757_v52, %v741_v55  ;;  %v791_v23 = vpack.c.bf16 %v759_v46, %v743_v58 }
 0x10f   :  { %1089 = vmatprep.subr.bf16.mxu1 %v776_v48 }
 0x110   :  { %1699 = vmatmul.mubr.msk.bf16.vlgmr.msra.gmra.mrb[8].mxu0 %vm440_vm15, %v2149_v56 }
 0x111   :  { %1700 = vmatmul.mubr.msk.bf16.vlgmr.msra.gmra.mrb[8].mxu1 %vm440_vm15, %v2149_v56  ;;  %1049 = vmatpush1.bf16.msra.mxu0 %v773_v44 }
 0x112   :  { %1090 = vmatpush1.bf16.msra.mxu1 %v775_v47  ;;  %1050 = vmatprep.subr.bf16.mxu0 %v790_v11 }
 0x113   :  { %1091 = vmatprep.subr.bf16.mxu1 %v792_v1  ;;  %1080 = vmatprep.mubr.bf16.mxu0 %v1748_v9 }
 0x114   :  { %1121 = vmatprep.mubr.bf16.mxu1 %v1748_v9  ;;  %v2258_v9 = vshrl.u32 %v1134_v30, 7 }
 0x115   :  { %1051 = vmatpush1.bf16.msra.mxu0 %v789_v45  ;;  %v1131_v45 = vld [vmem:[%s2849_s5 + $0x8] sm:$0xff] }
 0x116   :  { %1092 = vmatpush1.bf16.msra.mxu1 %v791_v23  ;;  %v1140_v60 = vsub.s32 1, %v2258_v9  ;;  %v1144_v21 = vsub.s32 2, %v2258_v9  ;;  %v1148_v22 = vsub.s32 3, %v2258_v9  ;;  %v1152_v28 = vsub.s32 4, %v2258_v9 }
 0x117   :  { %v1156_v39 = vsub.s32 5, %v2258_v9  ;;  %v1160_v48 = vsub.s32 6, %v2258_v9  ;;  %v1164_v4 = vsub.s32 7, %v2258_v9 }
 0x118   :  { %1701 = vmatmul.mubr.msk.bf16.vlgmr.msra.gmra.mrb[12].mxu0 %vm440_vm15, %v2149_v56  ;;  %v2276_v40 = vrot.slane %v1130_v27, %v1140_v60  ;;  %v2286_v63 = vrot.slane %v1130_v27, %v1144_v21  ;;  %v2288_v7 = vrot.slane %v1130_v27, %v1148_v22  ;;  %v2298_v54 = vrot.slane %v1130_v27, %v1152_v28 }
 0x119   :  { %1702 = vmatmul.mubr.msk.bf16.vlgmr.msra.gmra.mrb[12].mxu1 %vm440_vm15, %v2149_v56  ;;  %v1136_v56 = vsub.s32 0, %v2258_v9  ;;  %v2314_v49 = vrot.slane %v1130_v27, %v1156_v39  ;;  %v2316_v42 = vrot.slane %v1130_v27, %v1160_v48  ;;  %v2331_v55 = vrot.slane %v1130_v27, %v1164_v4 }
 0x11b   :  { %v2274_v53 = vrot.slane %v1130_v27, %v1136_v56 }
 0x1b3   :  { %v836_v36 = vpop.f32.mrb[0].mxu0  ;;  %v877_v12 = vpop.f32.mrb[0].mxu1 }
 0x1b4   :  { %v838_v20 = vpop.f32.mrb[1].mxu0  ;;  %v879_v37 = vpop.f32.mrb[1].mxu1  ;;  %v2269_v24 = vadd.f32 %v836_v36, %v2262_v6  ;;  %v2284_v34 = vadd.f32 %v877_v12, %v2262_v6  ;;  %v2339_v12 = vrot.slane %v1131_v45, %v1136_v56 }
 0x1b5   :  { %v840_v5 = vpop.f32.mrb[2].mxu0  ;;  %v881_v29 = vpop.f32.mrb[2].mxu1  ;;  %v2272_v18 = vadd.f32 %v838_v20, %v2262_v6  ;;  %v2296_v33 = vadd.f32 %v879_v37, %v2262_v6 }
 0x1b6   :  { %v841_v26 = vpop.f32.mrb[3].mxu0  ;;  %v882_v13 = vpop.f32.mrb[3].mxu1  ;;  %v1214_v50 = vmul.f32 %v2274_v53, %v2269_v24  ;;  %v1216_v61 = vmul.f32 %v2286_v63, %v2284_v34  ;;  %v2341_v29 = vrot.slane %v1131_v45, %v1140_v60 }
 0x1b7   :  { %v1215_v16 = vmul.f32 %v2276_v40, %v2272_v18  ;;  %v1217_v32 = vmul.f32 %v2288_v7, %v2296_v33 }
 0x1b8   :  { %v1231_v35 = vsel %vm1230_vm0, %v1214_v50, 0.0  ;;  %v1234_v31 = vsel %vm1230_vm0, %v1216_v61, 0.0 }
 0x1b9   :  { %v1232_v43 = vsel %vm1230_vm0, %v1215_v16, 0.0  ;;  %v1236_v59 = vsel %vm1230_vm0, %v1217_v32, 0.0 }
 0x1ba   :  { %v1233_v41 = vadd.f32 %v1232_v43, %v1231_v35 }
 0x1bc   :  { %v1235_v62 = vadd.f32 %v1234_v31, %v1233_v41  ;;  %v2370_v41 = vrot.slane %v1131_v45, %v1152_v28 }
 0x1bd   :  { %v918_v25 = vpop.f32.mrb[4].mxu0  ;;  %v959_v0 = vpop.f32.mrb[4].mxu1 }
 0x1be   :  { %v920_v8 = vpop.f32.mrb[5].mxu0  ;;  %v961_v3 = vpop.f32.mrb[5].mxu1  ;;  %v2304_v2 = vadd.f32 %v918_v25, %v2262_v6  ;;  %v1237_v38 = vadd.f32 %v1236_v59, %v1235_v62  ;;  %v2322_v14 = vadd.f32 %v959_v0, %v2262_v6  ;;  %v2350_v25 = vrot.slane %v1131_v45, %v1144_v21 }
 0x1bf   :  { %v922_v10 = vpop.f32.mrb[6].mxu0  ;;  %v963_v15 = vpop.f32.mrb[6].mxu1  ;;  %v2312_v57 = vadd.f32 %v920_v8, %v2262_v6  ;;  %v2329_v46 = vadd.f32 %v961_v3, %v2262_v6  ;;  %v2372_v62 = vrot.slane %v1131_v45, %v1156_v39 }
 0x1c0   :  { %v923_v17 = vpop.f32.mrb[7].mxu0  ;;  %v964_v19 = vpop.f32.mrb[7].mxu1  ;;  %v1218_v51 = vmul.f32 %v2298_v54, %v2304_v2  ;;  %v1220_v52 = vmul.f32 %v2316_v42, %v2322_v14 }
 0x1c1   :  { %v1219_v47 = vmul.f32 %v2314_v49, %v2312_v57  ;;  %v1221_v36 = vmul.f32 %v2331_v55, %v2329_v46  ;;  %v2360_v19 = vrot.slane %v1131_v45, %v1148_v22 }
 0x1c2   :  { %v1238_v44 = vsel %vm1230_vm0, %v1218_v51, 0.0  ;;  %v1242_v23 = vsel %vm1230_vm0, %v1220_v52, 0.0 }
 0x1c3   :  { %v1239_v11 = vadd.f32 %v1238_v44, %v1237_v38  ;;  %v1240_v1 = vsel %vm1230_vm0, %v1219_v47, 0.0  ;;  %v1244_v26 = vsel %vm1230_vm0, %v1221_v36, 0.0  ;;  %v2381_v44 = vrot.slane %v1131_v45, %v1160_v48 }
 0x1c5   :  { %v1241_v58 = vadd.f32 %v1240_v1, %v1239_v11 }
 0x1c7   :  { %v1243_v20 = vadd.f32 %v1242_v23, %v1241_v58 }
 0x1c9   :  { %v1245_v27 = vadd.f32 %v1244_v26, %v1243_v20  ;;  %v2392_v20 = vrot.slane %v1131_v45, %v1164_v4 }
 0x1e3   :  { %v1000_v37 = vpop.f32.mrb[8].mxu0 }
 0x1e4   :  { %v1041_v5 = vpop.f32.mrb[8].mxu1  ;;  %v2345_v13 = vadd.f32 %v1000_v37, %v2262_v6  ;;  %v1002_v0 = vpop.f32.mrb[9].mxu0 }
 0x1e5   :  { %v2348_v30 = vadd.f32 %v1041_v5, %v2262_v6  ;;  %v1043_v9 = vpop.f32.mrb[9].mxu1  ;;  %v2353_v8 = vadd.f32 %v1002_v0, %v2262_v6  ;;  %v1004_v3 = vpop.f32.mrb[10].mxu0 }
 0x1e6   :  { %v1045_v10 = vpop.f32.mrb[10].mxu1  ;;  %v1222_v15 = vmul.f32 %v2339_v12, %v2345_v13  ;;  %v2358_v17 = vadd.f32 %v1043_v9, %v2262_v6  ;;  %v1005_v56 = vpop.f32.mrb[11].mxu0 }
 0x1e7   :  { %v1046_v60 = vpop.f32.mrb[11].mxu1  ;;  %v1223_v21 = vmul.f32 %v2341_v29, %v2353_v8  ;;  %v1224_v16 = vmul.f32 %v2350_v25, %v2348_v30 }
 0x1e8   :  { %v1246_v50 = vsel %vm1230_vm0, %v1222_v15, 0.0  ;;  %v1225_v61 = vmul.f32 %v2360_v19, %v2358_v17 }
 0x1e9   :  { %v1247_v35 = vadd.f32 %v1246_v50, %v1245_v27  ;;  %v1248_v43 = vsel %vm1230_vm0, %v1223_v21, 0.0  ;;  %v1250_v59 = vsel %vm1230_vm0, %v1224_v16, 0.0  ;;  %v1365_v27 = vld [vmem:[%s2850_s3] sm:$0x3f] }
 0x1ea   :  { %v1252_v39 = vsel %vm1230_vm0, %v1225_v61, 0.0 }
 0x1eb   :  { %v1249_v22 = vadd.f32 %v1248_v43, %v1247_v35  ;;  %v1082_v31 = vpop.f32.mrb[12].mxu0 }
 0x1ec   :  { %v1123_v32 = vpop.f32.mrb[12].mxu1  ;;  %v2376_v51 = vadd.f32 %v1082_v31, %v2262_v6  ;;  %v1084_v47 = vpop.f32.mrb[13].mxu0 }
 0x1ed   :  { %v2379_v38 = vadd.f32 %v1123_v32, %v2262_v6  ;;  %v1125_v11 = vpop.f32.mrb[13].mxu1  ;;  %v1251_v1 = vadd.f32 %v1250_v59, %v1249_v22  ;;  %v2384_v28 = vadd.f32 %v1084_v47, %v2262_v6  ;;  %v1086_v52 = vpop.f32.mrb[14].mxu0 }
 0x1ee   :  { %v1127_v58 = vpop.f32.mrb[14].mxu1  ;;  %v1226_v23 = vmul.f32 %v2370_v41, %v2376_v51  ;;  %v2390_v36 = vadd.f32 %v1125_v11, %v2262_v6  ;;  %v1087_v48 = vpop.f32.mrb[15].mxu0 }
 0x1ef   :  { %v1128_v37 = vpop.f32.mrb[15].mxu1  ;;  %v1253_v5 = vadd.f32 %v1252_v39, %v1251_v1  ;;  %v1227_v26 = vmul.f32 %v2372_v62, %v2384_v28  ;;  %v1228_v9 = vmul.f32 %v2381_v44, %v2379_v38 }
 0x1f0   :  { %v1254_v0 = vsel %vm1230_vm0, %v1226_v23, 0.0  ;;  %v1229_v6 = vmul.f32 %v2392_v20, %v2390_v36 }
 0x1f1   :  { %v1255_v3 = vadd.f32 %v1254_v0, %v1253_v5  ;;  %v1256_v10 = vsel %vm1230_vm0, %v1227_v26, 0.0  ;;  %v1258_v4 = vsel %vm1230_vm0, %v1228_v9, 0.0 }
 0x1f2   :  { %v1260_v56 = vsel %vm1230_vm0, %v1229_v6, 0.0 }
 0x1f3   :  { %v1257_v15 = vadd.f32 %v1256_v10, %v1255_v3 }
 0x1f5   :  { %v1259_v45 = vadd.f32 %v1258_v4, %v1257_v15 }
 0x1f7   :  { %v1261_v60 = vadd.f32 %v1260_v56, %v1259_v45 }
 0x1f9   :  { %1262 = vadd.xlane.f32.xlu0 %v1261_v60 }
 0x20f   :  { %1368 = vperm.xlu0 %1725, %v1365_v27  }
 0x286   :  { %v1263_v21 = vpop.xlane.xlu0 %1262 }
 0x287   :  { %v1264_v50 = vmul.f32 0.0006377551, %v1263_v21 }
 0x289   :  { %v2408_v16 = vsub.f32 %v2269_v24, %v1264_v50  ;;  %v2411_v35 = vsub.f32 %v2272_v18, %v1264_v50  ;;  %v2414_v43 = vsub.f32 %v2284_v34, %v1264_v50  ;;  %v2417_v61 = vsub.f32 %v2296_v33, %v1264_v50 }
 0x28a   :  { %v2424_v32 = vsub.f32 %v2304_v2, %v1264_v50  ;;  %v2429_v18 = vsub.f32 %v2312_v57, %v1264_v50  ;;  %v2436_v47 = vsub.f32 %v2322_v14, %v1264_v50  ;;  %v2442_v1 = vsub.f32 %v2329_v46, %v1264_v50 }
 0x28b   :  { %v1281_v22 = vmul.f32 %v2408_v16, %v2408_v16  ;;  %v1282_v31 = vmul.f32 %v2411_v35, %v2411_v35  ;;  %v1283_v24 = vmul.f32 %v2414_v43, %v2414_v43  ;;  %v1284_v34 = vmul.f32 %v2417_v61, %v2417_v61 }
 0x28c   :  { %v1285_v2 = vmul.f32 %v2424_v32, %v2424_v32  ;;  %v1286_v57 = vmul.f32 %v2429_v18, %v2429_v18  ;;  %v2450_v14 = vsub.f32 %v2345_v13, %v1264_v50  ;;  %v1287_v39 = vmul.f32 %v2436_v47, %v2436_v47 }
 0x28d   :  { %v1297_v33 = vmul.f32 %v1281_v22, %v2274_v53  ;;  %v1298_v59 = vmul.f32 %v1282_v31, %v2276_v40  ;;  %v1299_v11 = vmul.f32 %v1283_v24, %v2286_v63  ;;  %v1300_v52 = vmul.f32 %v1284_v34, %v2288_v7 }
 0x28e   :  { %v1301_v63 = vmul.f32 %v1285_v2, %v2298_v54  ;;  %v2457_v48 = vsub.f32 %v2353_v8, %v1264_v50  ;;  %v1288_v7 = vmul.f32 %v2442_v1, %v2442_v1  ;;  %v1302_v37 = vmul.f32 %v1286_v57, %v2314_v49 }
 0x28f   :  { %v1313_v53 = vsel %vm1230_vm0, %v1297_v33, 0.0  ;;  %v1314_v40 = vsel %vm1230_vm0, %v1298_v59, 0.0  ;;  %v1316_v46 = vsel %vm1230_vm0, %v1299_v11, 0.0  ;;  %v1318_v5 = vsel %vm1230_vm0, %v1300_v52, 0.0 }
 0x290   :  { %v1315_v58 = vadd.f32 %v1314_v40, %v1313_v53  ;;  %v1275_v26 = vsub.f32 %v2348_v30, %v1264_v50  ;;  %v1289_v0 = vmul.f32 %v2450_v14, %v2450_v14  ;;  %v1303_v54 = vmul.f32 %v1287_v39, %v2316_v42 }
 0x291   :  { %v1320_v9 = vsel %vm1230_vm0, %v1301_v63, 0.0  ;;  %v2469_v8 = vsub.f32 %v2358_v17, %v1264_v50  ;;  %v1290_v10 = vmul.f32 %v2457_v48, %v2457_v48  ;;  %v1304_v49 = vmul.f32 %v1288_v7, %v2331_v55 }
 0x292   :  { %v1317_v23 = vadd.f32 %v1316_v46, %v1315_v58  ;;  %v1322_v6 = vsel %vm1230_vm0, %v1302_v37, 0.0  ;;  %v1277_v30 = vsub.f32 %v2376_v51, %v1264_v50  ;;  %v1291_v4 = vmul.f32 %v1275_v26, %v1275_v26 }
 0x293   :  { %v1305_v45 = vmul.f32 %v1289_v0, %v2339_v12  ;;  %v1324_v42 = vsel %vm1230_vm0, %v1303_v54, 0.0  ;;  %v2479_v60 = vsub.f32 %v2384_v28, %v1264_v50  ;;  %v1292_v17 = vmul.f32 %v2469_v8, %v2469_v8 }
 0x294   :  { %v1319_v13 = vadd.f32 %v1318_v5, %v1317_v23  ;;  %v1306_v27 = vmul.f32 %v1290_v10, %v2341_v29  ;;  %v1326_v55 = vsel %vm1230_vm0, %v1304_v49, 0.0  ;;  %v2486_v22 = vsub.f32 %v2379_v38, %v1264_v50 }
 0x295   :  { %v1293_v51 = vmul.f32 %v1277_v30, %v1277_v30  ;;  %v1307_v12 = vmul.f32 %v1291_v4, %v2350_v25  ;;  %v1328_v31 = vsel %vm1230_vm0, %v1305_v45, 0.0  ;;  %v2491_v28 = vsub.f32 %v2390_v36, %v1264_v50 }
 0x296   :  { %v1321_v3 = vadd.f32 %v1320_v9, %v1319_v13  ;;  %v1294_v34 = vmul.f32 %v2479_v60, %v2479_v60  ;;  %v1308_v29 = vmul.f32 %v1292_v17, %v2360_v19  ;;  %v1330_v33 = vsel %vm1230_vm0, %v1306_v27, 0.0  ;;  %v1369_v13 = vpop.permute.xlu0 %1368 }
 0x297   :  { %v1295_v38 = vmul.f32 %v2486_v22, %v2486_v22  ;;  %v1309_v2 = vmul.f32 %v1293_v51, %v2370_v41  ;;  %v1332_v25 = vsel %vm1230_vm0, %v1307_v12, 0.0  ;;  %v1296_v36 = vmul.f32 %v2491_v28, %v2491_v28 }
 0x298   :  { %v1323_v15 = vadd.f32 %v1322_v6, %v1321_v3  ;;  %v1310_v50 = vmul.f32 %v1294_v34, %v2372_v62  ;;  %v1334_v57 = vsel %vm1230_vm0, %v1308_v29, 0.0  ;;  %v1387_v62 = vld [vmem:[%s2851_s4] sm:$0x3f] }
 0x299   :  { %v1311_v19 = vmul.f32 %v1295_v38, %v2381_v44  ;;  %v1336_v53 = vsel %vm1230_vm0, %v1309_v2, 0.0  ;;  %v1312_v58 = vmul.f32 %v1296_v36, %v2392_v20 }
 0x29a   :  { %v1325_v56 = vadd.f32 %v1324_v42, %v1323_v15  ;;  %v1338_v41 = vsel %vm1230_vm0, %v1310_v50, 0.0 }
 0x29b   :  { %v1340_v63 = vsel %vm1230_vm0, %v1311_v19, 0.0  ;;  %v1342_v23 = vsel %vm1230_vm0, %v1312_v58, 0.0 }
 0x29c   :  { %v1327_v21 = vadd.f32 %v1326_v55, %v1325_v56 }
 0x29e   :  { %v1329_v24 = vadd.f32 %v1328_v31, %v1327_v21 }
 0x2a0   :  { %v1331_v59 = vadd.f32 %v1330_v33, %v1329_v24 }
 0x2a2   :  { %v1333_v11 = vadd.f32 %v1332_v25, %v1331_v59 }
 0x2a4   :  { %v1335_v52 = vadd.f32 %v1334_v57, %v1333_v11 }
 0x2a6   :  { %v1337_v40 = vadd.f32 %v1336_v53, %v1335_v52 }
 0x2a8   :  { %v1339_v39 = vadd.f32 %v1338_v41, %v1337_v40 }
 0x2aa   :  { %v1341_v46 = vadd.f32 %v1340_v63, %v1339_v39 }
 0x2ac   :  { %v1343_v7 = vadd.f32 %v1342_v23, %v1341_v46 }
 0x2ae   :  { %1344 = vadd.xlane.f32.xlu1 %v1343_v7 }
 0x2bf   :  { %1390 = vperm.xlu1 %1724, %v1387_v62  }
 0x33b   :  { %v1345_v44 = vpop.xlane.xlu1 %1344 }
 0x33c   :  { %v1346_v37 = vmul.f32 0.0006377551, %v1345_v44 }
 0x33e   :  { %v1347_v5 = vadd.f32 1e-05, %v1346_v37 }
 0x33f   :  { %v1391_v17 = vpop.permute.xlu1 %1390 }
 0x340   :  { %1726 = vrsqrt.f32 %v1347_v5 }
 0x34a   :  { %v1727_v20 = vpop.eup %1726 }
 0x34b   :  { %v1355_v0 = vmul.f32 %v1727_v20, %v2436_v47  ;;  %v1349_v54 = vmul.f32 %v1727_v20, %v2408_v16  ;;  %v1357_v9 = vmul.f32 %v1727_v20, %v2450_v14  ;;  %v1350_v3 = vmul.f32 %v1727_v20, %v2411_v35 }
 0x34c   :  { %v1359_v10 = vmul.f32 %v1727_v20, %v1275_v26  ;;  %v1351_v49 = vmul.f32 %v1727_v20, %v2414_v43  ;;  %v1361_v6 = vmul.f32 %v1727_v20, %v1277_v30  ;;  %v1352_v15 = vmul.f32 %v1727_v20, %v2417_v61 }
 0x34d   :  { %v1377_v4 = vmul.f32 %v1369_v13, %v1355_v0  ;;  %v1371_v45 = vmul.f32 %v1369_v13, %v1349_v54  ;;  %v1379_v42 = vmul.f32 %v1369_v13, %v1357_v9  ;;  %v1372_v56 = vmul.f32 %v1369_v13, %v1350_v3 }
 0x34e   :  { %v1381_v27 = vmul.f32 %v1369_v13, %v1359_v10  ;;  %v1373_v55 = vmul.f32 %v1369_v13, %v1351_v49  ;;  %v1383_v47 = vmul.f32 %v1369_v13, %v1361_v6  ;;  %v1374_v21 = vmul.f32 %v1369_v13, %v1352_v15 }
 0x34f   :  { %v2520_v16 = vadd.f32 %v1391_v17, %v1377_v4  ;;  %v2522_v14 = vadd.f32 %v1391_v17, %v1371_v45  ;;  %v2524_v35 = vadd.f32 %v1391_v17, %v1379_v42  ;;  %v2526_v26 = vadd.f32 %v1391_v17, %v1372_v56  ;;  %v2633_v56 = vld [vmem:[#allocation3 + $0x80] sm:$0x3f] }
 0x350   :  { %v2528_v43 = vadd.f32 %v1391_v17, %v1381_v27  ;;  %v2530_v61 = vadd.f32 %v1391_v17, %v1373_v55  ;;  %v2532_v30 = vadd.f32 %v1391_v17, %v1383_v47  ;;  %v2534_v51 = vadd.f32 %v1391_v17, %v1374_v21 }
 0x351   :  { %v1415_v12 = vmax.f32 %v2520_v16, 0.0  ;;  %v1409_v31 = vmax.f32 %v2522_v14, 0.0  ;;  %v1417_v24 = vmax.f32 %v2524_v35, 0.0  ;;  %v1410_v34 = vmax.f32 %v2526_v26, 0.0 }
 0x352   :  { %v1419_v29 = vmax.f32 %v2528_v43, 0.0  ;;  %v1411_v33 = vmax.f32 %v2530_v61, 0.0  ;;  %v1421_v59 = vmax.f32 %v2532_v30, 0.0  ;;  %v1412_v38 = vmax.f32 %v2534_v51, 0.0 }
 0x353   :  { %1431 = vst [vmem:[#allocation3 + $0x30] sm:$0x3f] %v1415_v12  ;;  %1425 = vst [vmem:[#allocation3] sm:$0x3f] %v1409_v31  ;;  %v1363_v2 = vmul.f32 %v1727_v20, %v2486_v22  ;;  %v1353_v25 = vmul.f32 %v1727_v20, %v2424_v32  ;;  %v1354_v11 = vmul.f32 %v1727_v20, %v2429_v18 }
 0x354   :  { %1433 = vst [vmem:[#allocation3 + $0x40] sm:$0x3f] %v1417_v24  ;;  %1426 = vst [vmem:[#allocation3 + $0x8] sm:$0x3f] %v1410_v34  ;;  %v1356_v36 = vmul.f32 %v1727_v20, %v2442_v1  ;;  %v1358_v22 = vmul.f32 %v1727_v20, %v2457_v48  ;;  %v1360_v32 = vmul.f32 %v1727_v20, %v2469_v8 }
 0x355   :  { %1435 = vst [vmem:[#allocation3 + $0x50] sm:$0x3f] %v1419_v29  ;;  %1427 = vst [vmem:[#allocation3 + $0x10] sm:$0x3f] %v1411_v33  ;;  %v1362_v18 = vmul.f32 %v1727_v20, %v2479_v60  ;;  %v1364_v1 = vmul.f32 %v1727_v20, %v2491_v28  ;;  %v1385_v50 = vmul.f32 %v1369_v13, %v1363_v2 }
 0x356   :  { %1437 = vst [vmem:[#allocation3 + $0x60] sm:$0x3f] %v1421_v59  ;;  %1428 = vst [vmem:[#allocation3 + $0x18] sm:$0x3f] %v1412_v38  ;;  %v1375_v57 = vmul.f32 %v1369_v13, %v1353_v25  ;;  %v1376_v52 = vmul.f32 %v1369_v13, %v1354_v11  ;;  %v1378_v19 = vmul.f32 %v1369_v13, %v1356_v36 }
 0x357   :  { %v1380_v53 = vmul.f32 %v1369_v13, %v1358_v22  ;;  %v1382_v40 = vmul.f32 %v1369_v13, %v1360_v32  ;;  %v1384_v58 = vmul.f32 %v1369_v13, %v1362_v18  ;;  %v1386_v41 = vmul.f32 %v1369_v13, %v1364_v1 }
 0x358   :  { %v2568_v39 = vadd.f32 %v1391_v17, %v1385_v50  ;;  %v2570_v63 = vadd.f32 %v1391_v17, %v1375_v57  ;;  %v2572_v46 = vadd.f32 %v1391_v17, %v1376_v52  ;;  %v2574_v48 = vadd.f32 %v1391_v17, %v1378_v19 }
 0x359   :  { %v2576_v8 = vadd.f32 %v1391_v17, %v1380_v53  ;;  %v2578_v60 = vadd.f32 %v1391_v17, %v1382_v40  ;;  %v2580_v28 = vadd.f32 %v1391_v17, %v1384_v58  ;;  %v2582_v23 = vadd.f32 %v1391_v17, %v1386_v41 }
 0x35a   :  { %v1423_v7 = vmax.f32 %v2568_v39, 0.0  ;;  %v1413_v62 = vmax.f32 %v2570_v63, 0.0  ;;  %v1414_v44 = vmax.f32 %v2572_v46, 0.0  ;;  %v1416_v37 = vmax.f32 %v2574_v48, 0.0  ;;  %v2588_v5 = vld [vmem:[#allocation3 + $0x30] sm:$0x3f] }
 0x35b   :  { %v1442_v20 = vld [vmem:[#allocation3] sm:$0x3f]  ;;  %1488 = vrot.lane.b32.xlu0 %v2588_v5, %s1729_s24  ;;  %v1418_v13 = vmax.f32 %v2576_v8, 0.0  ;;  %v1420_v0 = vmax.f32 %v2578_v60, 0.0  ;;  %v1422_v54 = vmax.f32 %v2580_v28, 0.0  ;;  %v1424_v9 = vmax.f32 %v2582_v23, 0.0 }
 0x35c   :  { %1476 = vrot.lane.b32.xlu1 %v1442_v20, %s1729_s24  ;;  %1439 = vst [vmem:[#allocation3 + $0x70] sm:$0x3f] %v1423_v7  ;;  %1429 = vst [vmem:[#allocation3 + $0x20] sm:$0x3f] %v1413_v62  ;;  %v2605_v3 = vld [vmem:[#allocation3 + $0x40] sm:$0x3f] }
 0x35d   :  { %1430 = vst [vmem:[#allocation3 + $0x28] sm:$0x3f] %v1414_v44  ;;  %1432 = vst [vmem:[#allocation3 + $0x38] sm:$0x3f] %v1416_v37  ;;  %v1443_v10 = vld [vmem:[#allocation3 + $0x8] sm:$0x3f] }
 0x35e   :  { %1434 = vst [vmem:[#allocation3 + $0x48] sm:$0x3f] %v1418_v13  ;;  %1436 = vst [vmem:[#allocation3 + $0x58] sm:$0x3f] %v1420_v0  ;;  %v2618_v49 = vld [vmem:[#allocation3 + $0x50] sm:$0x3f] }
 0x35f   :  { %1492 = vrot.lane.b32.xlu0 %v2605_v3, %s1729_s24  ;;  %1438 = vst [vmem:[#allocation3 + $0x68] sm:$0x3f] %v1422_v54  ;;  %1440 = vst [vmem:[#allocation3 + $0x78] sm:$0x3f] %v1424_v9  ;;  %v1444_v6 = vld [vmem:[#allocation3 + $0x10] sm:$0x3f] }
 0x360   :  { %1478 = vrot.lane.b32.xlu1 %v1443_v10, %s1729_s24  ;;  %v2623_v15 = vld [vmem:[#allocation3 + $0x60] sm:$0x3f]  ;;  %v1445_v4 = vld [vmem:[#allocation3 + $0x18] sm:$0x3f] }
 0x363   :  { %1496 = vrot.lane.b32.xlu0 %v2618_v49, %s1729_s24  ;;  %v2628_v45 = vld [vmem:[#allocation3 + $0x70] sm:$0x3f]  ;;  %v1446_v42 = vld [vmem:[#allocation3 + $0x20] sm:$0x3f] }
 0x364   :  { %1480 = vrot.lane.b32.xlu1 %v1444_v6, %s1729_s24  ;;  %v1447_v17 = vld [vmem:[#allocation3 + $0x28] sm:$0x3f]  ;;  %v1449_v27 = vld [vmem:[#allocation3 + $0x38] sm:$0x3f] }
 0x365   :  { %v1451_v55 = vld [vmem:[#allocation3 + $0x48] sm:$0x3f]  ;;  %v1453_v47 = vld [vmem:[#allocation3 + $0x58] sm:$0x3f] }
 0x366   :  { %v1455_v21 = vld [vmem:[#allocation3 + $0x68] sm:$0x3f]  ;;  %v2642_v2 = vld [vmem:[#allocation3 + $0x78] sm:$0x3f] }
 0x367   :  { %1500 = vrot.lane.b32.xlu0 %v2623_v15, %s1729_s24 }
 0x368   :  { %1482 = vrot.lane.b32.xlu1 %v1445_v4, %s1729_s24 }
 0x36b   :  { %1504 = vrot.lane.b32.xlu0 %v2628_v45, %s1729_s24 }
 0x36c   :  { %1484 = vrot.lane.b32.xlu1 %v1446_v42, %s1729_s24 }
 0x36f   :  { %1508 = vrot.lane.b32.xlu0 %v2633_v56, %s1729_s24 }
 0x370   :  { %1486 = vrot.lane.b32.xlu1 %v1447_v17, %s1729_s24 }
 0x374   :  { %1490 = vrot.lane.b32.xlu1 %v1449_v27, %s1729_s24 }
 0x378   :  { %1494 = vrot.lane.b32.xlu1 %v1451_v55, %s1729_s24 }
 0x37c   :  { %1498 = vrot.lane.b32.xlu1 %v1453_v47, %s1729_s24 }
 0x380   :  { %1502 = vrot.lane.b32.xlu1 %v1455_v21, %s1729_s24 }
 0x384   :  { %1506 = vrot.lane.b32.xlu1 %v2642_v2, %s1729_s24 }
 0x3cd   :  { %v1489_v1 = vpop.permute.xlu0 %1488 }
 0x3ce   :  { %v1477_v25 = vpop.permute.xlu1 %1476 }
 0x3d1   :  { %v1493_v53 = vpop.permute.xlu0 %1492 }
 0x3d2   :  { %v1479_v11 = vpop.permute.xlu1 %1478 }
 0x3d3   :  { %v2647_v36 = vsel %vm48_vm2, %v1477_v25, %v1479_v11 }
 0x3d4   :  { %v1559_v22 = vmax.f32 %v1442_v20, %v2647_v36 }
 0x3d6   :  { %1593 = vrot.lane.b32.xlu1 %v1559_v22, %s1732_s7  ;;  %v1481_v32 = vpop.permute.xlu1 %1480 }
 0x3d7   :  { %v2652_v18 = vsel %vm48_vm2, %v1479_v11, %v1481_v32  ;;  %v1497_v11 = vpop.permute.xlu0 %1496 }
 0x3d8   :  { %v1560_v50 = vmax.f32 %v1443_v10, %v2652_v18 }
 0x3da   :  { %1595 = vrot.lane.b32.xlu0 %v1560_v50, %s1732_s7  ;;  %v1483_v57 = vpop.permute.xlu1 %1482 }
 0x3db   :  { %v2657_v52 = vsel %vm48_vm2, %v1481_v32, %v1483_v57 }
 0x3dc   :  { %v1561_v19 = vmax.f32 %v1444_v6, %v2657_v52  ;;  %v1544_v14 = vmax.f32 %v1411_v33, %v2657_v52 }
 0x3de   :  { %1597 = vrot.lane.b32.xlu1 %v1561_v19, %s1732_s7  ;;  %v1485_v40 = vpop.permute.xlu1 %1484 }
 0x3df   :  { %v2662_v58 = vsel %vm48_vm2, %v1483_v57, %v1485_v40 }
 0x3e0   :  { %v1562_v41 = vmax.f32 %v1445_v4, %v2662_v58 }
 0x3e2   :  { %1599 = vrot.lane.b32.xlu0 %v1562_v41, %s1732_s7  ;;  %v1487_v20 = vpop.permute.xlu1 %1486 }
 0x3e3   :  { %v2667_v10 = vsel %vm48_vm2, %v1485_v40, %v1487_v20  ;;  %v2670_v25 = vsel %vm48_vm2, %v1487_v20, %v1489_v1  ;;  %v1501_v40 = vpop.permute.xlu0 %1500 }
 0x3e4   :  { %v1563_v6 = vmax.f32 %v1446_v42, %v2667_v10  ;;  %v1564_v22 = vmax.f32 %v1447_v17, %v2670_v25  ;;  %v1547_v51 = vmax.f32 %v1414_v44, %v2670_v25 }
 0x3e6   :  { %1603 = vrot.lane.b32.xlu0 %v1564_v22, %s1732_s7  ;;  %1601 = vrot.lane.b32.xlu1 %v1563_v6, %s1732_s7  ;;  %v1491_v32 = vpop.permute.xlu1 %1490 }
 0x3e7   :  { %v2677_v4 = vsel %vm48_vm2, %v1489_v1, %v1491_v32  ;;  %v2680_v50 = vsel %vm48_vm2, %v1491_v32, %v1493_v53 }
 0x3e8   :  { %v1565_v57 = vmax.f32 %v2588_v5, %v2677_v4  ;;  %v1566_v19 = vmax.f32 %v1449_v27, %v2680_v50  ;;  %v1549_v16 = vmax.f32 %v1416_v37, %v2680_v50 }
 0x3ea   :  { %1607 = vrot.lane.b32.xlu0 %v1566_v19, %s1732_s7  ;;  %1605 = vrot.lane.b32.xlu1 %v1565_v57, %s1732_s7  ;;  %v1495_v42 = vpop.permute.xlu1 %1494 }
 0x3eb   :  { %v2688_v17 = vsel %vm48_vm2, %v1493_v53, %v1495_v42  ;;  %v2691_v1 = vsel %vm48_vm2, %v1495_v42, %v1497_v11  ;;  %v1505_v53 = vpop.permute.xlu0 %1504 }
 0x3ec   :  { %v1567_v41 = vmax.f32 %v2605_v3, %v2688_v17  ;;  %v1568_v20 = vmax.f32 %v1451_v55, %v2691_v1  ;;  %v1551_v35 = vmax.f32 %v1418_v13, %v2691_v1 }
 0x3ee   :  { %1611 = vrot.lane.b32.xlu0 %v1568_v20, %s1732_s7  ;;  %1609 = vrot.lane.b32.xlu1 %v1567_v41, %s1732_s7  ;;  %v1499_v5 = vpop.permute.xlu1 %1498  ;;  %v1542_v20 = vmax.f32 %v1409_v31, %v2647_v36  ;;  %v1545_v36 = vmax.f32 %v1412_v38, %v2662_v58  ;;  %v1548_v38 = vmax.f32 %v1415_v12, %v2677_v4 }
 0x3ef   :  { %v2699_v27 = vsel %vm48_vm2, %v1497_v11, %v1499_v5  ;;  %v2702_v6 = vsel %vm48_vm2, %v1499_v5, %v1501_v40  ;;  %v1509_v42 = vpop.permute.xlu0 %1508  ;;  %v1550_v12 = vmax.f32 %v1417_v24, %v2688_v17 }
 0x3f0   :  { %v1569_v22 = vmax.f32 %v2618_v49, %v2699_v27  ;;  %v1570_v32 = vmax.f32 %v1453_v47, %v2702_v6  ;;  %v1552_v24 = vmax.f32 %v1419_v29, %v2699_v27  ;;  %v1553_v43 = vmax.f32 %v1420_v0, %v2702_v6 }
 0x3f2   :  { %1615 = vrot.lane.b32.xlu0 %v1570_v32, %s1732_s7  ;;  %1613 = vrot.lane.b32.xlu1 %v1569_v22, %s1732_s7  ;;  %v1503_v3 = vpop.permute.xlu1 %1502 }
 0x3f3   :  { %v2710_v55 = vsel %vm48_vm2, %v1501_v40, %v1503_v3  ;;  %v2713_v11 = vsel %vm48_vm2, %v1503_v3, %v1505_v53 }
 0x3f4   :  { %v1571_v57 = vmax.f32 %v2623_v15, %v2710_v55  ;;  %v1572_v19 = vmax.f32 %v1455_v21, %v2713_v11  ;;  %v1575_v21 = vmax.f32 %v2633_v56, %v1509_v42  ;;  %v1554_v29 = vmax.f32 %v1421_v59, %v2710_v55 }
 0x3f5   :  { %v1555_v30 = vmax.f32 %v1422_v54, %v2713_v11 }
 0x3f6   :  { %1619 = vrot.lane.b32.xlu0 %v1572_v19, %s1732_s7  ;;  %1617 = vrot.lane.b32.xlu1 %v1571_v57, %s1732_s7  ;;  %v1507_v49 = vpop.permute.xlu1 %1506 }
 0x3f7   :  { %v2721_v47 = vsel %vm48_vm2, %v1505_v53, %v1507_v49  ;;  %v2724_v40 = vsel %vm48_vm2, %v1507_v49, %v1509_v42 }
 0x3f8   :  { %v1573_v41 = vmax.f32 %v2628_v45, %v2721_v47  ;;  %v1574_v15 = vmax.f32 %v2642_v2, %v2724_v40  ;;  %v1543_v2 = vmax.f32 %v1410_v34, %v2652_v18  ;;  %v1546_v18 = vmax.f32 %v1413_v62, %v2667_v10 }
 0x3f9   :  { %v1556_v59 = vmax.f32 %v1423_v7, %v2721_v47  ;;  %v1557_v39 = vmax.f32 %v1424_v9, %v2724_v40 }
 0x3fa   :  { %1623 = vrot.lane.b32.xlu0 %v1574_v15, %s1732_s7  ;;  %1621 = vrot.lane.b32.xlu1 %v1573_v41, %s1732_s7 }
 0x3fe   :  { %1625 = vrot.lane.b32.xlu1 %v1575_v21, %s1732_s7 }
 0x448   :  { %v1594_v5 = vpop.permute.xlu1 %1593 }
 0x44c   :  { %v1596_v53 = vpop.permute.xlu0 %1595 }
 0x44d   :  { %v1627_v22 = vsel %vm160_vm5, %v1594_v5, %v1596_v53 }
 0x44e   :  { %v1659_v45 = vmax.f32 %v1542_v20, %v1627_v22 }
 0x450   :  { %1675 = vst [vmem:[%s2852_s6] sm:$0x3f] %v1659_v45  ;;  %v1598_v56 = vpop.permute.xlu1 %1597 }
 0x451   :  { %v1628_v32 = vsel %vm160_vm5, %v1596_v53, %v1598_v56 }
 0x452   :  { %v1660_v3 = vmax.f32 %v1543_v2, %v1628_v32 }
 0x454   :  { %1676 = vst [vmem:[%s2852_s6 + $0x8] sm:$0x3f] %v1660_v3  ;;  %v1600_v31 = vpop.permute.xlu0 %1599 }
 0x455   :  { %v1629_v26 = vsel %vm160_vm5, %v1598_v56, %v1600_v31 }
 0x456   :  { %v1661_v34 = vmax.f32 %v1544_v14, %v1629_v26 }
 0x458   :  { %1677 = vst [vmem:[%s2852_s6 + $0x10] sm:$0x3f] %v1661_v34  ;;  %v1604_v61 = vpop.permute.xlu0 %1603  ;;  %v1602_v33 = vpop.permute.xlu1 %1601 }
 0x459   :  { %v1630_v52 = vsel %vm160_vm5, %v1600_v31, %v1602_v33  ;;  %v1631_v57 = vsel %vm160_vm5, %v1602_v33, %v1604_v61 }
 0x45a   :  { %v1662_v19 = vmax.f32 %v1545_v36, %v1630_v52  ;;  %v1663_v42 = vmax.f32 %v1546_v18, %v1631_v57 }
 0x45c   :  { %1678 = vst [vmem:[%s2852_s6 + $0x18] sm:$0x3f] %v1662_v19  ;;  %1679 = vst [vmem:[%s2852_s6 + $0x20] sm:$0x3f] %v1663_v42  ;;  %v1608_v63 = vpop.permute.xlu0 %1607  ;;  %v1606_v62 = vpop.permute.xlu1 %1605 }
 0x45d   :  { %v1632_v58 = vsel %vm160_vm5, %v1604_v61, %v1606_v62  ;;  %v1633_v10 = vsel %vm160_vm5, %v1606_v62, %v1608_v63 }
 0x45e   :  { %v1664_v46 = vmax.f32 %v1547_v51, %v1632_v58  ;;  %v1665_v44 = vmax.f32 %v1548_v38, %v1633_v10 }
 0x460   :  { %1680 = vst [vmem:[%s2852_s6 + $0x28] sm:$0x3f] %v1664_v46  ;;  %1681 = vst [vmem:[%s2852_s6 + $0x30] sm:$0x3f] %v1665_v44  ;;  %v1612_v25 = vpop.permute.xlu0 %1611  ;;  %v1610_v4 = vpop.permute.xlu1 %1609 }
 0x461   :  { %v1634_v49 = vsel %vm160_vm5, %v1608_v63, %v1610_v4  ;;  %v1635_v41 = vsel %vm160_vm5, %v1610_v4, %v1612_v25 }
 0x462   :  { %v1666_v48 = vmax.f32 %v1549_v16, %v1634_v49  ;;  %v1667_v37 = vmax.f32 %v1550_v12, %v1635_v41 }
 0x464   :  { %1682 = vst [vmem:[%s2852_s6 + $0x38] sm:$0x3f] %v1666_v48  ;;  %1683 = vst [vmem:[%s2852_s6 + $0x40] sm:$0x3f] %v1667_v37  ;;  %v1616_v50 = vpop.permute.xlu0 %1615  ;;  %v1614_v17 = vpop.permute.xlu1 %1613 }
 0x465   :  { %v1636_v15 = vsel %vm160_vm5, %v1612_v25, %v1614_v17  ;;  %v1637_v21 = vsel %vm160_vm5, %v1614_v17, %v1616_v50 }
 0x466   :  { %v1668_v8 = vmax.f32 %v1551_v35, %v1636_v15  ;;  %v1669_v13 = vmax.f32 %v1552_v24, %v1637_v21 }
 0x468   :  { %1684 = vst [vmem:[%s2852_s6 + $0x48] sm:$0x3f] %v1668_v8  ;;  %1685 = vst [vmem:[%s2852_s6 + $0x50] sm:$0x3f] %v1669_v13  ;;  %v1620_v1 = vpop.permute.xlu0 %1619  ;;  %v1618_v27 = vpop.permute.xlu1 %1617 }
 0x469   :  { %v1638_v20 = vsel %vm160_vm5, %v1616_v50, %v1618_v27  ;;  %v1639_v5 = vsel %vm160_vm5, %v1618_v27, %v1620_v1 }
 0x46a   :  { %v1670_v60 = vmax.f32 %v1553_v43, %v1638_v20  ;;  %v1671_v0 = vmax.f32 %v1554_v29, %v1639_v5 }
 0x46c   :  { %1686 = vst [vmem:[%s2852_s6 + $0x58] sm:$0x3f] %v1670_v60  ;;  %1687 = vst [vmem:[%s2852_s6 + $0x60] sm:$0x3f] %v1671_v0  ;;  %v1624_v6 = vpop.permute.xlu0 %1623  ;;  %v1622_v55 = vpop.permute.xlu1 %1621 }
 0x46d   :  { %v1640_v53 = vsel %vm160_vm5, %v1620_v1, %v1622_v55  ;;  %v1641_v22 = vsel %vm160_vm5, %v1622_v55, %v1624_v6 }
 0x46e   :  { %v1672_v28 = vmax.f32 %v1555_v30, %v1640_v53  ;;  %v1673_v54 = vmax.f32 %v1556_v59, %v1641_v22 }
 0x470   :  { %1688 = vst [vmem:[%s2852_s6 + $0x68] sm:$0x3f] %v1672_v28  ;;  %1689 = vst [vmem:[%s2852_s6 + $0x70] sm:$0x3f] %v1673_v54  ;;  %v1626_v7 = vpop.permute.xlu1 %1625 }
 0x471   :  { %v1642_v11 = vsel %vm160_vm5, %v1624_v6, %v1626_v7 }
 0x472   :  { %v1674_v47 = vmax.f32 %v1557_v39, %v1642_v11 }
 0x474   :  { %1690 = vst [vmem:[%s2852_s6 + $0x78] sm:$0x3f] %v1674_v47 }

// kernel: cnn_forward.3
= control target key start
LH: loop header
LB: loop body
LE: loop exit
PB: predicated region body
PF: predicated region fallthrough
CT: control target
= control target key end

     0   :  { %s2017_s29 = smov 126   ;;  %s2018_s30 = smov 127   ;;  %vm123_vm0 = vcmask 1031168   ;;  %vm67_vm1 = vcmask 1039360   ;;  %vm179_vm2 = vcmask 1022976   ;;  %vm222_vm3 = vcmask 1014784   ;;  %s3277_s0 = inlined_call_operand.vmem [shape: f32[6,776], index: 0, kind: input, shape index: {}]   ;;  %s3278_s1 = inlined_call_operand.vmem [shape: bf16[16,152], index: 1, kind: input, shape index: {}]   ;;  %s3279_s2 = inlined_call_operand.vmem [shape: f32[16,1], index: 2, kind: input, shape index: {}]   ;;  %s3280_s5 = inlined_call_operand.vmem [shape: f32[1,648], index: 5, kind: input, shape index: {}]   ;;  %s3281_s3 = inlined_call_operand.vmem [shape: f32[16,1], index: 3, kind: input, shape index: {}]   ;;  %s3282_s4 = inlined_call_operand.vmem [shape: f32[16,1], index: 4, kind: input, shape index: {}]   ;;  %s3283_s6 = inlined_call_operand.vmem [shape: f32[16,648], index: 6, kind: output, shape index: {}]  }
   0x1   :  { %v94_v0 = vld [vmem:[%s3277_s0 + $0x8] sm:$0x3f]  ;;  %v95_v2 = vld [vmem:[%s3277_s0 + $0x10] sm:$0x3f]  ;;  %v93_v8 = vld [vmem:[%s3277_s0] sm:$0x3f] }
   0x2   :  { %v38_v1 = vld [vmem:[%s3277_s0 + $0x8] sm:$0x3f]  ;;  %v106_v3 = vrot.slane %v94_v0, 4  ;;  %v39_v5 = vld [vmem:[%s3277_s0 + $0x10] sm:$0x3f]  ;;  %v107_v6 = vrot.slane %v95_v2, 4 }
   0x3   :  { %v50_v4 = vrot.slane %v38_v1, 2  ;;  %v51_v7 = vrot.slane %v39_v5, 2  ;;  %v37_v9 = vld [vmem:[%s3277_s0] sm:$0x3f]  ;;  %v105_v10 = vrot.slane %v93_v8, 4  ;;  %s2019_s15 = smov 125  }
   0x4   :  { %113 = vrot.lane.b32.xlu1 %v106_v3, %s2017_s29  ;;  %v49_v11 = vrot.slane %v37_v9, 2  ;;  %v151_v12 = vld [vmem:[%s3277_s0 + $0x10] sm:$0x3f]  ;;  %v150_v13 = vld [vmem:[%s3277_s0 + $0x8] sm:$0x3f]  ;;  %s2020_s24 = smov 124  }
   0x5   :  { %57 = vrot.lane.b32.xlu0 %v50_v4, %s2018_s30  ;;  %v163_v14 = vrot.slane %v151_v12, 6  ;;  %v162_v15 = vrot.slane %v150_v13, 6  ;;  %v200_v16 = vld [vmem:[%s3277_s0 + $0x10] sm:$0x3f]  ;;  %v199_v17 = vld [vmem:[%s3277_s0 + $0x8] sm:$0x3f] }
   0x6   :  { %v242_v18 = vld [vmem:[%s3277_s0 + $0x10] sm:$0x3f]  ;;  %v241_v19 = vld [vmem:[%s3277_s0 + $0x8] sm:$0x3f]  ;;  %v149_v22 = vld [vmem:[%s3277_s0] sm:$0x3f] }
   0x7   :  { %v254_v20 = vrot.slane %v242_v18, 2  ;;  %v253_v21 = vrot.slane %v241_v19, 2  ;;  %s2021_s27 = smov 110   ;;  %v161_v23 = vrot.slane %v149_v22, 6  ;;  %v198_v24 = vld [vmem:[%s3277_s0] sm:$0x3f] }
   0x8   :  { %115 = vrot.lane.b32.xlu1 %v107_v6, %s2017_s29  ;;  %v295_v25 = vld [vmem:[%s3277_s0 + $0x8] sm:$0x3f]  ;;  %v240_v26 = vld [vmem:[%s3277_s0] sm:$0x3f]  ;;  %v296_v30 = vld [vmem:[%s3277_s0 + $0x10] sm:$0x3f] }
   0x9   :  { %59 = vrot.lane.b32.xlu0 %v51_v7, %s2018_s30  ;;  %v307_v27 = vrot.slane %v295_v25, 4  ;;  %v252_v28 = vrot.slane %v240_v26, 2  ;;  %v349_v29 = vld [vmem:[%s3277_s0 + $0x8] sm:$0x3f]  ;;  %s2022_s17 = smov 109   ;;  %v308_v32 = vrot.slane %v296_v30, 4 }
   0xa   :  { %v361_v31 = vrot.slane %v349_v29, 6  ;;  %v294_v33 = vld [vmem:[%s3277_s0] sm:$0x3f]  ;;  %v350_v34 = vld [vmem:[%s3277_s0 + $0x10] sm:$0x3f]  ;;  %s2023_s25 = smov 108  }
   0xb   :  { %v25_v35 = vld [vmem:[%s3277_s0 + $0x8] sm:$0x3f]  ;;  %v306_v36 = vrot.slane %v294_v33, 4  ;;  %v362_v37 = vrot.slane %v350_v34, 6  ;;  %v24_v38 = vld [vmem:[%s3277_s0] sm:$0x3f] }
   0xc   :  { %111 = vrot.lane.b32.xlu1 %v105_v10, %s2017_s29  ;;  %31 = vst [vmem:[#allocation2 + $0x8] sm:$0x3f] %v25_v35  ;;  %v348_v39 = vld [vmem:[%s3277_s0] sm:$0x3f]  ;;  %30 = vst [vmem:[#allocation2] sm:$0x3f] %v24_v38 }
   0xd   :  { %55 = vrot.lane.b32.xlu0 %v49_v11, %s2018_s30  ;;  %v360_v40 = vrot.slane %v348_v39, 6  ;;  %v397_v41 = vld [vmem:[%s3277_s0 + $0x8] sm:$0x3f]  ;;  %s2024_s13 = smov 107   ;;  %v398_v44 = vld [vmem:[%s3277_s0 + $0x10] sm:$0x3f] }
   0xe   :  { %v439_v42 = vld [vmem:[%s3277_s0 + $0x8] sm:$0x3f]  ;;  %v440_v46 = vld [vmem:[%s3277_s0 + $0x10] sm:$0x3f]  ;;  %s2025_s22 = smov 106   ;;  %s2026_s28 = smov 92  }
   0xf   :  { %v451_v43 = vrot.slane %v439_v42, 2  ;;  %v493_v45 = vld [vmem:[%s3277_s0 + $0x8] sm:$0x3f]  ;;  %v452_v48 = vrot.slane %v440_v46, 2  ;;  %v494_v49 = vld [vmem:[%s3277_s0 + $0x10] sm:$0x3f] }
  0x10   :  { %171 = vrot.lane.b32.xlu1 %v163_v14, %s2019_s15  ;;  %v505_v47 = vrot.slane %v493_v45, 4  ;;  %v506_v50 = vrot.slane %v494_v49, 4  ;;  %v396_v51 = vld [vmem:[%s3277_s0] sm:$0x3f]  ;;  %v548_v56 = vld [vmem:[%s3277_s0 + $0x10] sm:$0x3f] }
  0x11   :  { %169 = vrot.lane.b32.xlu0 %v162_v15, %s2019_s15  ;;  %v492_v52 = vld [vmem:[%s3277_s0] sm:$0x3f]  ;;  %v547_v57 = vld [vmem:[%s3277_s0 + $0x8] sm:$0x3f]  ;;  %v560_v58 = vrot.slane %v548_v56, 6  ;;  %s2027_s20 = smov 91  }
  0x12   :  { %v438_v53 = vld [vmem:[%s3277_s0] sm:$0x3f]  ;;  %v504_v54 = vrot.slane %v492_v52, 4  ;;  %v559_v59 = vrot.slane %v547_v57, 6  ;;  %v596_v60 = vld [vmem:[%s3277_s0 + $0x10] sm:$0x3f] }
  0x13   :  { %v450_v55 = vrot.slane %v438_v53, 2  ;;  %v595_v61 = vld [vmem:[%s3277_s0 + $0x8] sm:$0x3f]  ;;  %v638_v62 = vld [vmem:[%s3277_s0 + $0x10] sm:$0x3f]  ;;  %s2028_s12 = smov 90  }
  0x14   :  { %214 = vrot.lane.b32.xlu1 %v200_v16, %s2020_s24  ;;  %v637_v63 = vld [vmem:[%s3277_s0 + $0x8] sm:$0x3f]  ;;  %v650_v0 = vrot.slane %v638_v62, 2  ;;  %v546_v2 = vld [vmem:[%s3277_s0] sm:$0x3f]  ;;  %s2029_s18 = smov 89  }
  0x15   :  { %212 = vrot.lane.b32.xlu0 %v199_v17, %s2020_s24  ;;  %v649_v1 = vrot.slane %v637_v63, 2  ;;  %v558_v3 = vrot.slane %v546_v2, 6  ;;  %v594_v4 = vld [vmem:[%s3277_s0] sm:$0x3f]  ;;  %v691_v5 = vld [vmem:[%s3277_s0 + $0x8] sm:$0x3f] }
  0x16   :  { %v636_v6 = vld [vmem:[%s3277_s0] sm:$0x3f]  ;;  %v703_v7 = vrot.slane %v691_v5, 4  ;;  %v745_v9 = vld [vmem:[%s3277_s0 + $0x8] sm:$0x3f]  ;;  %s3286_s16 = smov 88  }
  0x17   :  { %v648_v8 = vrot.slane %v636_v6, 2  ;;  %v692_v10 = vld [vmem:[%s3277_s0 + $0x10] sm:$0x3f]  ;;  %v757_v11 = vrot.slane %v745_v9, 6  ;;  %v690_v13 = vld [vmem:[%s3277_s0] sm:$0x3f] }
  0x18   :  { %262 = vrot.lane.b32.xlu1 %v254_v20, %s2021_s27  ;;  %v704_v12 = vrot.slane %v692_v10, 4  ;;  %v746_v14 = vld [vmem:[%s3277_s0 + $0x10] sm:$0x3f]  ;;  %s3284_s7 = smov 74   ;;  %v702_v15 = vrot.slane %v690_v13, 4  ;;  %s2032_s21 = smov 73  }
  0x19   :  { %260 = vrot.lane.b32.xlu0 %v253_v21, %s2021_s27  ;;  %v758_v16 = vrot.slane %v746_v14, 6  ;;  %v744_v17 = vld [vmem:[%s3277_s0] sm:$0x3f]  ;;  %v793_v19 = vld [vmem:[%s3277_s0 + $0x8] sm:$0x3f]  ;;  %s3290_s14 = smov 72  }
  0x1a   :  { %v756_v18 = vrot.slane %v744_v17, 6  ;;  %v835_v20 = vld [vmem:[%s3277_s0 + $0x8] sm:$0x3f]  ;;  %v794_v22 = vld [vmem:[%s3277_s0 + $0x10] sm:$0x3f]  ;;  %s3288_s23 = smov 71  }
  0x1b   :  { %v847_v21 = vrot.slane %v835_v20, 2  ;;  %v792_v29 = vld [vmem:[%s3277_s0] sm:$0x3f]  ;;  %v944_v34 = vld [vmem:[%s3277_s0 + $0x10] sm:$0x3f]  ;;  %s3292_s11 = smov 55  }
  0x1c   :  { %210 = vrot.lane.b32.xlu1 %v198_v24, %s2020_s24  ;;  %v836_v24 = vld [vmem:[%s3277_s0 + $0x10] sm:$0x3f]  ;;  %v888_v30 = vld [vmem:[%s3277_s0] sm:$0x3f]  ;;  %v943_v35 = vld [vmem:[%s3277_s0 + $0x8] sm:$0x3f] }
  0x1d   :  { %167 = vrot.lane.b32.xlu0 %v161_v23, %s2019_s15  ;;  %v889_v23 = vld [vmem:[%s3277_s0 + $0x8] sm:$0x3f]  ;;  %v848_v26 = vrot.slane %v836_v24, 2  ;;  %v992_v38 = vld [vmem:[%s3277_s0 + $0x10] sm:$0x3f]  ;;  %s3296_s9 = smov 54  }
  0x1e   :  { %v901_v25 = vrot.slane %v889_v23, 4  ;;  %v991_v39 = vld [vmem:[%s3277_s0 + $0x8] sm:$0x3f]  ;;  %v26_v63 = vld [vmem:[%s3277_s0 + $0x10] sm:$0x3f]  ;;  %s3294_s26 = smov 53  }
  0x1f   :  { %v1087_v49 = vld [vmem:[%s3277_s0 + $0x8] sm:$0x3f]  ;;  %32 = vst [vmem:[#allocation2 + $0x10] sm:$0x3f] %v26_v63  ;;  %v1086_v2 = vld [vmem:[%s3277_s0] sm:$0x3f] }
  0x20   :  { %314 = vrot.lane.b32.xlu1 %v307_v27, %s2022_s17  ;;  %v890_v27 = vld [vmem:[%s3277_s0 + $0x10] sm:$0x3f]  ;;  %v1141_v57 = vld [vmem:[%s3277_s0 + $0x8] sm:$0x3f]  ;;  %v1098_v10 = vrot.slane %v1086_v2, 4  ;;  %vm270_vm4 = vcmask 900096  }
  0x21   :  { %258 = vrot.lane.b32.xlu0 %v252_v28, %s2021_s27  ;;  %v902_v28 = vrot.slane %v890_v27, 4  ;;  %v40_v13 = vld [vmem:[%s3277_s0 + $0x18] sm:$0x3f]  ;;  %v1140_v14 = vld [vmem:[%s3277_s0] sm:$0x3f]  ;;  %s2041_s10 = smov 52  }
  0x22   :  { %v96_v23 = vld [vmem:[%s3277_s0 + $0x18] sm:$0x3f]  ;;  %v41_v24 = vld [vmem:[%s3277_s0 + $0x20] sm:$0x3f]  ;;  %vm324_vm5 = vcmask 891904   ;;  %vm378_vm6 = vcmask 883712  }
  0x23   :  { %vm84_vm7 = vcmask 64518   ;;  %vm35_vm8 = vcmask 62464   ;;  %v244_v2 = vld [vmem:[%s3277_s0 + $0x20] sm:$0x3f]  ;;  %vm420_vm9 = vcmask 875520   ;;  %vm468_vm10 = vcmask 867328  }
  0x24   :  { %368 = vrot.lane.b32.xlu1 %v361_v31, %s2023_s25  ;;  %v834_v31 = vld [vmem:[%s3277_s0] sm:$0x3f]  ;;  %vm1433_vm11 = vcmask 195584   ;;  %vm3314_vm12 = vcmask 752640   ;;  %vm3304_vm13 = vcmask 744448   ;;  %vm3300_vm14 = vcmask 736256  }
  0x25   :  { %316 = vrot.lane.b32.xlu0 %v308_v32, %s2022_s17  ;;  %v900_v32 = vrot.slane %v888_v30, 4  ;;  %v846_v33 = vrot.slane %v834_v31, 2  ;;  %v2040_v30 = vmov 0.0   ;;  %v97_v31 = vld [vmem:[%s3277_s0 + $0x20] sm:$0x3f]  ;;  %vm3301_vm15 = vcmask 728064  }
  0x26   :  { %1231 = vst [vmem:[#allocation2 + $0x368] sm:$0xc0] %v2040_v30  ;;  %1230 = vst [vmem:[#allocation2 + $0x360] sm:$0xc0] %v2040_v30 }
  0x27   :  { %1232 = vst [vmem:[#allocation2 + $0x370] sm:$0xc0] %v2040_v30  ;;  %1233 = vst [vmem:[#allocation2 + $0x378] sm:$0xc0] %v2040_v30 }
  0x28   :  { %312 = vrot.lane.b32.xlu1 %v306_v36, %s2022_s17  ;;  %v956_v36 = vrot.slane %v944_v34, 6  ;;  %1234 = vst [vmem:[#allocation2 + $0x380] sm:$0xc0] %v2040_v30  ;;  %1235 = vst.msk [vmem:[#allocation2 + $0x388] sm:$0xc0] %vm84_vm7, %v2040_v30 }
  0x29   :  { %370 = vrot.lane.b32.xlu0 %v362_v37, %s2023_s25  ;;  %v955_v37 = vrot.slane %v943_v35, 6 }
  0x2c   :  { %410 = vrot.lane.b32.xlu1 %v397_v41, %s2024_s13  ;;  %v1033_v41 = vld [vmem:[%s3277_s0 + $0x8] sm:$0x3f] }
  0x2d   :  { %366 = vrot.lane.b32.xlu0 %v360_v40, %s2023_s25  ;;  %v1034_v40 = vld [vmem:[%s3277_s0 + $0x10] sm:$0x3f] }
  0x2e   :  { %v1046_v42 = vrot.slane %v1034_v40, 2 }
  0x30   :  { %458 = vrot.lane.b32.xlu1 %v451_v43, %s2025_s22  ;;  %v1045_v43 = vrot.slane %v1033_v41, 2 }
  0x31   :  { %412 = vrot.lane.b32.xlu0 %v398_v44, %s2024_s13  ;;  %v942_v44 = vld [vmem:[%s3277_s0] sm:$0x3f] }
  0x34   :  { %512 = vrot.lane.b32.xlu1 %v505_v47, %s2026_s28  ;;  %v954_v47 = vrot.slane %v942_v44, 6  ;;  %v1190_v44 = vld [vmem:[%s3277_s0 + $0x10] sm:$0x3f] }
  0x35   :  { %460 = vrot.lane.b32.xlu0 %v452_v48, %s2025_s22  ;;  %v990_v48 = vld [vmem:[%s3277_s0] sm:$0x3f] }
  0x38   :  { %408 = vrot.lane.b32.xlu1 %v396_v51, %s2024_s13 }
  0x39   :  { %514 = vrot.lane.b32.xlu0 %v506_v50, %s2026_s28  ;;  %v1032_v50 = vld [vmem:[%s3277_s0] sm:$0x3f] }
  0x3a   :  { %v1044_v56 = vrot.slane %v1032_v50, 2 }
  0x3c   :  { %510 = vrot.lane.b32.xlu1 %v504_v54, %s2026_s28 }
  0x3d   :  { %456 = vrot.lane.b32.xlu0 %v450_v55, %s2025_s22  ;;  %v1099_v55 = vrot.slane %v1087_v49, 4 }
  0x40   :  { %568 = vrot.lane.b32.xlu1 %v560_v58, %s2027_s20  ;;  %v1088_v58 = vld [vmem:[%s3277_s0 + $0x10] sm:$0x3f] }
  0x41   :  { %566 = vrot.lane.b32.xlu0 %v559_v59, %s2027_s20 }
  0x44   :  { %610 = vrot.lane.b32.xlu1 %v596_v60, %s2028_s12 }
  0x45   :  { %608 = vrot.lane.b32.xlu0 %v595_v61, %s2028_s12 }
  0x48   :  { %658 = vrot.lane.b32.xlu1 %v650_v0, %s2029_s18  ;;  %v1153_v0 = vrot.slane %v1141_v57, 6  ;;  %v29_v57 = vld [vmem:[%s3277_s0 + $0x28] sm:$0x3f] }
  0x49   :  { %656 = vrot.lane.b32.xlu0 %v649_v1, %s2029_s18  ;;  %v1100_v1 = vrot.slane %v1088_v58, 4  ;;  %36 = vst.msk [vmem:[#allocation2 + $0x28] sm:$0x3f] %vm35_vm8, %v29_v57 }
  0x4c   :  { %606 = vrot.lane.b32.xlu1 %v594_v4, %s2028_s12 }
  0x4d   :  { %564 = vrot.lane.b32.xlu0 %v558_v3, %s2027_s20  ;;  %v1142_v3 = vld [vmem:[%s3277_s0 + $0x10] sm:$0x3f] }
  0x50   :  { %710 = vrot.lane.b32.xlu1 %v703_v7, %s3286_s16 }
  0x51   :  { %654 = vrot.lane.b32.xlu0 %v648_v8, %s2029_s18 }
  0x54   :  { %764 = vrot.lane.b32.xlu1 %v757_v11, %s3284_s7  ;;  %v1154_v11 = vrot.slane %v1142_v3, 6  ;;  %v243_v3 = vld [vmem:[%s3277_s0 + $0x18] sm:$0x3f] }
  0x55   :  { %712 = vrot.lane.b32.xlu0 %v704_v12, %s3286_s16  ;;  %v27_v12 = vld [vmem:[%s3277_s0 + $0x18] sm:$0x3f] }
  0x56   :  { %33 = vst [vmem:[#allocation2 + $0x18] sm:$0x3f] %v27_v12 }
  0x58   :  { %708 = vrot.lane.b32.xlu1 %v702_v15, %s3286_s16  ;;  %s2035_s16 = smov 70  }
  0x59   :  { %766 = vrot.lane.b32.xlu0 %v758_v16, %s3284_s7 }
  0x5c   :  { %806 = vrot.lane.b32.xlu1 %v793_v19, %s2032_s21 }
  0x5d   :  { %762 = vrot.lane.b32.xlu0 %v756_v18, %s3284_s7  ;;  %s3318_s7 = smov 71  }
  0x60   :  { %854 = vrot.lane.b32.xlu1 %v847_v21, %s3290_s14  ;;  %v52_v21 = vrot.slane %v40_v13, 2 }
  0x61   :  { %808 = vrot.lane.b32.xlu0 %v794_v22, %s2032_s21  ;;  %v1152_v22 = vrot.slane %v1140_v14, 6 }
  0x64   :  { %908 = vrot.lane.b32.xlu1 %v901_v25, %s3288_s23 }
  0x65   :  { %856 = vrot.lane.b32.xlu0 %v848_v26, %s3290_s14 }
  0x68   :  { %804 = vrot.lane.b32.xlu1 %v792_v29, %s2032_s21  ;;  %v53_v29 = vrot.slane %v41_v24, 2 }
  0x69   :  { %910 = vrot.lane.b32.xlu0 %v902_v28, %s3288_s23  ;;  %v108_v28 = vrot.slane %v96_v23, 4  ;;  %v297_v23 = vld [vmem:[%s3277_s0 + $0x18] sm:$0x3f] }
  0x6c   :  { %906 = vrot.lane.b32.xlu1 %v900_v32, %s3288_s23 }
  0x6d   :  { %852 = vrot.lane.b32.xlu0 %v846_v33, %s3290_s14  ;;  %s3298_s14 = smov 56  }
  0x70   :  { %964 = vrot.lane.b32.xlu1 %v956_v36, %s2035_s16  ;;  %v109_v36 = vrot.slane %v97_v31, 4 }
  0x71   :  { %962 = vrot.lane.b32.xlu0 %v955_v37, %s2035_s16  ;;  %v1188_v37 = vld [vmem:[%s3277_s0] sm:$0x3f] }
  0x74   :  { %1006 = vrot.lane.b32.xlu1 %v992_v38, %s3298_s14 }
  0x75   :  { %1004 = vrot.lane.b32.xlu0 %v991_v39, %s3298_s14 }
  0x76   :  { %v114_v45 = vpop.permute.xlu1 %113 }
  0x77   :  { %v58_v46 = vpop.permute.xlu0 %57 }
  0x78   :  { %1054 = vrot.lane.b32.xlu1 %v1046_v42, %s3292_s11 }
  0x79   :  { %1052 = vrot.lane.b32.xlu0 %v1045_v43, %s3292_s11 }
  0x7a   :  { %v2336_v51 = vpop.permute.xlu1 %115 }
  0x7b   :  { %v2338_v52 = vpop.permute.xlu0 %59  ;;  %v125_v53 = vsel %vm123_vm0, %v114_v45, %v2336_v51 }
  0x7c   :  { %v69_v54 = vsel %vm67_vm1, %v58_v46, %v2338_v52  ;;  %136 = vst [vmem:[#allocation2 + $0x68] ss:$-44 sps:$4 sm:$0xf3] %v125_v53   ;;  %1002 = vrot.lane.b32.xlu1 %v990_v48, %s3298_s14 }
  0x7d   :  { %80 = vst [vmem:[#allocation2 + $0x38] ss:$-44 sps:$4 sm:$0xcf] %v69_v54   ;;  %960 = vrot.lane.b32.xlu0 %v954_v47, %s2035_s16  ;;  %v152_v47 = vld [vmem:[%s3277_s0 + $0x18] sm:$0x3f] }
  0x7e   :  { %v112_v59 = vpop.permute.xlu1 %111  ;;  %v164_v54 = vrot.slane %v152_v47, 6 }
  0x7f   :  { %v56_v60 = vpop.permute.xlu0 %55  ;;  %v124_v61 = vsel %vm123_vm0, %v112_v59, %v114_v45  ;;  %v1189_v45 = vld [vmem:[%s3277_s0 + $0x8] sm:$0x3f] }
  0x80   :  { %v68_v62 = vsel %vm67_vm1, %v56_v60, %v58_v46  ;;  %135 = vst [vmem:[#allocation2 + $0x60] ss:$-44 sps:$4 sm:$0xf3] %v124_v61   ;;  %1106 = vrot.lane.b32.xlu1 %v1099_v55, %s3296_s9  ;;  %v153_v46 = vld [vmem:[%s3277_s0 + $0x20] sm:$0x3f] }
  0x81   :  { %79 = vst [vmem:[#allocation2 + $0x30] ss:$-44 sps:$4 sm:$0xcf] %v68_v62   ;;  %1050 = vrot.lane.b32.xlu0 %v1044_v56, %s3292_s11  ;;  %v165_v53 = vrot.slane %v153_v46, 6  ;;  %v28_v62 = vld [vmem:[%s3277_s0 + $0x20] sm:$0x3f] }
  0x82   :  { %v2365_v4 = vpop.permute.xlu1 %171  ;;  %34 = vst [vmem:[#allocation2 + $0x20] sm:$0x3f] %v28_v62  ;;  %v441_v62 = vld [vmem:[%s3277_s0 + $0x18] sm:$0x3f] }
  0x83   :  { %v170_v5 = vpop.permute.xlu0 %169 }
  0x84   :  { %v181_v6 = vsel %vm179_vm2, %v170_v5, %v2365_v4  ;;  %v1239_v7 = vld [vmem:[#allocation2 + $0x8] sm:$0xff]  ;;  %v1245_v8 = vld [vmem:[#allocation2 + $0x38] sm:$0xff]  ;;  %1160 = vrot.lane.b32.xlu1 %v1153_v0, %s3294_s26  ;;  %v202_v0 = vld [vmem:[%s3277_s0 + $0x20] sm:$0x3f] }
  0x85   :  { %192 = vst [vmem:[#allocation2 + $0x68] sm:$0xfc] %v181_v6  ;;  %1108 = vrot.lane.b32.xlu0 %v1100_v1, %s3296_s9  ;;  %v1353_v9 = vpack.c.bf16 %v1245_v8, %v1239_v7  ;;  %v201_v1 = vld [vmem:[%s3277_s0 + $0x18] sm:$0x3f]  ;;  %v256_v8 = vrot.slane %v244_v2, 2 }
  0x86   :  { %v2380_v15 = vpop.permute.xlu1 %214 }
  0x87   :  { %v213_v16 = vpop.permute.xlu0 %212  ;;  %1456 = vmatprep.subr.bf16.mxu0 %v1353_v9  ;;  %v255_v9 = vrot.slane %v243_v3, 2 }
  0x88   :  { %v224_v17 = vsel %vm222_vm3, %v213_v16, %v2380_v15  ;;  %v1238_v18 = vld [vmem:[#allocation2] sm:$0xff]  ;;  %v1244_v19 = vld [vmem:[#allocation2 + $0x30] sm:$0xff]  ;;  %1104 = vrot.lane.b32.xlu1 %v1098_v10, %s3296_s9  ;;  %v98_v10 = vld [vmem:[%s3277_s0 + $0x28] sm:$0x3f] }
  0x89   :  { %235 = vst [vmem:[#allocation2 + $0x98] sm:$0x3f] %v224_v17  ;;  %1162 = vrot.lane.b32.xlu0 %v1154_v11, %s3294_s26  ;;  %v1352_v20 = vpack.c.bf16 %v1244_v19, %v1238_v18  ;;  %v42_v11 = vld [vmem:[%s3277_s0 + $0x28] sm:$0x3f]  ;;  %v110_v19 = vrot.slane %v98_v10, 4 }
  0x8a   :  { %v2392_v25 = vpop.permute.xlu1 %262 }
  0x8b   :  { %v261_v26 = vpop.permute.xlu0 %260  ;;  %1457 = vmatpush1.bf16.msra.mxu0 %v1352_v20  ;;  %v54_v20 = vrot.slane %v42_v11, 2 }
  0x8c   :  { %v272_v27 = vsel %vm270_vm4, %v261_v26, %v2392_v25  ;;  %61 = vrot.lane.b32.xlu1 %v52_v21, %s2018_s30  ;;  %v1251_v41 = vld [vmem:[#allocation2 + $0x68] sm:$0xff] }
  0x8d   :  { %283 = vst [vmem:[#allocation2 + $0xc8] ss:$-44 sps:$4 sm:$0xcf] %v272_v27   ;;  %1158 = vrot.lane.b32.xlu0 %v1152_v22, %s3294_s26  ;;  %v2480_v21 = vld [vmem:[%s3278_s1 + $0x4] ss:$8 sps:$4 sm:$0xff]   ;;  %s3320_s26 = smov 55  }
  0x8e   :  { %v211_v32 = vpop.permute.xlu1 %210  ;;  %v298_v22 = vld [vmem:[%s3277_s0 + $0x20] sm:$0x3f]  ;;  %1978 = vmatprep.mubr.msk.bf16.mxu0 %vm1433_vm11, %v2480_v21  ;;  %1980 = vmatprep.mubr.msk.bf16.mxu1 %vm1433_vm11, %v2480_v21 }
  0x8f   :  { %v168_v33 = vpop.permute.xlu0 %167  ;;  %v223_v34 = vsel %vm222_vm3, %v211_v32, %v213_v16  ;;  %v310_v32 = vrot.slane %v298_v22, 4 }
  0x90   :  { %v180_v35 = vsel %vm179_vm2, %v168_v33, %v170_v5  ;;  %234 = vst [vmem:[#allocation2 + $0x90] sm:$0x3f] %v223_v34  ;;  %117 = vrot.lane.b32.xlu1 %v108_v28, %s2017_s29  ;;  %v309_v33 = vrot.slane %v297_v23, 4  ;;  %v352_v34 = vld [vmem:[%s3277_s0 + $0x20] sm:$0x3f] }
  0x91   :  { %191 = vst [vmem:[#allocation2 + $0x60] sm:$0xfc] %v180_v35  ;;  %63 = vrot.lane.b32.xlu0 %v53_v29, %s2018_s30  ;;  %v351_v35 = vld [vmem:[%s3277_s0 + $0x18] sm:$0x3f] }
  0x92   :  { %v315_v38 = vpop.permute.xlu1 %314 }
  0x93   :  { %v259_v39 = vpop.permute.xlu0 %258 }
  0x94   :  { %v271_v40 = vsel %vm270_vm4, %v259_v39, %v261_v26  ;;  %v1257_v42 = vld [vmem:[#allocation2 + $0x98] sm:$0xff]  ;;  %1200 = vrot.lane.b32.xlu1 %v1188_v37, %s2041_s10 }
  0x95   :  { %282 = vst [vmem:[#allocation2 + $0xc0] ss:$-44 sps:$4 sm:$0xcf] %v271_v40   ;;  %119 = vrot.lane.b32.xlu0 %v109_v36, %s2017_s29  ;;  %v1359_v43 = vpack.c.bf16 %v1257_v42, %v1251_v41  ;;  %v364_v40 = vrot.slane %v352_v34, 6  ;;  %v363_v41 = vrot.slane %v351_v35, 6 }
  0x96   :  { %v369_v48 = vpop.permute.xlu1 %368  ;;  %v154_v42 = vld [vmem:[%s3277_s0 + $0x28] sm:$0x3f] }
  0x97   :  { %v2428_v49 = vpop.permute.xlu0 %316  ;;  %1458 = vmatprep.subr.bf16.mxu0 %v1359_v43  ;;  %v166_v47 = vrot.slane %v154_v42, 6 }
  0x98   :  { %v326_v50 = vsel %vm324_vm5, %v315_v38, %v2428_v49  ;;  %1204 = vrot.lane.b32.xlu1 %v1190_v44, %s2041_s10  ;;  %v1250_v60 = vld [vmem:[#allocation2 + $0x60] sm:$0xff] }
  0x99   :  { %337 = vst [vmem:[#allocation2 + $0xf8] ss:$-44 sps:$4 sm:$0xf3] %v326_v50   ;;  %1202 = vrot.lane.b32.xlu0 %v1189_v45, %s2041_s10  ;;  %v245_v50 = vld [vmem:[%s3277_s0 + $0x28] sm:$0x3f] }
  0x9a   :  { %v313_v55 = vpop.permute.xlu1 %312 }
  0x9b   :  { %v2434_v56 = vpop.permute.xlu0 %370  ;;  %v325_v58 = vsel %vm324_vm5, %v313_v55, %v315_v38 }
  0x9c   :  { %v380_v59 = vsel %vm378_vm6, %v369_v48, %v2434_v56  ;;  %v1256_v61 = vld [vmem:[#allocation2 + $0x90] sm:$0xff]  ;;  %336 = vst [vmem:[#allocation2 + $0xf0] ss:$-44 sps:$4 sm:$0xf3] %v325_v58   ;;  %175 = vrot.lane.b32.xlu1 %v165_v53, %s2019_s15 }
  0x9d   :  { %391 = vst [vmem:[#allocation2 + $0xf8] sm:$0xfc] %v380_v59  ;;  %173 = vrot.lane.b32.xlu0 %v164_v54, %s2019_s15  ;;  %v1358_v63 = vpack.c.bf16 %v1256_v61, %v1250_v60  ;;  %v257_v60 = vrot.slane %v245_v50, 2  ;;  %v399_v61 = vld [vmem:[%s3277_s0 + $0x18] sm:$0x3f] }
  0x9e   :  { %v411_v5 = vpop.permute.xlu1 %410 }
  0x9f   :  { %v367_v6 = vpop.permute.xlu0 %366  ;;  %1459 = vmatpush1.bf16.msra.mxu0 %v1358_v63 }
  0xa0   :  { %v379_v7 = vsel %vm378_vm6, %v367_v6, %v369_v48  ;;  %218 = vrot.lane.b32.xlu1 %v202_v0, %s2020_s24  ;;  %v1263_v16 = vld [vmem:[#allocation2 + $0xc8] sm:$0xff]  ;;  %v453_v6 = vrot.slane %v441_v62, 2 }
  0xa1   :  { %390 = vst [vmem:[#allocation2 + $0xf0] sm:$0xfc] %v379_v7  ;;  %216 = vrot.lane.b32.xlu0 %v201_v1, %s2020_s24  ;;  %v203_v48 = vld [vmem:[%s3277_s0 + $0x28] sm:$0x3f]  ;;  %v400_v7 = vld [vmem:[%s3277_s0 + $0x20] sm:$0x3f] }
  0xa2   :  { %v459_v12 = vpop.permute.xlu1 %458 }
  0xa3   :  { %v2471_v13 = vpop.permute.xlu0 %412  ;;  %v1262_v28 = vld [vmem:[#allocation2 + $0xc0] sm:$0xff] }
  0xa4   :  { %v422_v14 = vsel %vm420_vm9, %v411_v5, %v2471_v13  ;;  %v1269_v17 = vld [vmem:[#allocation2 + $0xf8] sm:$0xff]  ;;  %266 = vrot.lane.b32.xlu1 %v256_v8, %s2021_s27 }
  0xa5   :  { %433 = vst [vmem:[#allocation2 + $0x128] sm:$0x3f] %v422_v14  ;;  %264 = vrot.lane.b32.xlu0 %v255_v9, %s2021_s27  ;;  %v1365_v18 = vpack.c.bf16 %v1269_v17, %v1263_v16  ;;  %v495_v8 = vld [vmem:[%s3277_s0 + $0x18] sm:$0x3f]  ;;  %v442_v9 = vld [vmem:[%s3277_s0 + $0x20] sm:$0x3f] }
  0xa6   :  { %v513_v24 = vpop.permute.xlu1 %512  ;;  %v507_v14 = vrot.slane %v495_v8, 4  ;;  %v454_v16 = vrot.slane %v442_v9, 2  ;;  %v299_v17 = vld [vmem:[%s3277_s0 + $0x28] sm:$0x3f] }
  0xa7   :  { %v2488_v26 = vpop.permute.xlu0 %460  ;;  %1460 = vmatprep.subr.bf16.mxu0 %v1365_v18  ;;  %v496_v18 = vld [vmem:[%s3277_s0 + $0x20] sm:$0x3f] }
  0xa8   :  { %v470_v27 = vsel %vm468_vm10, %v459_v12, %v2488_v26  ;;  %v1268_v29 = vld [vmem:[#allocation2 + $0xf0] sm:$0xff]  ;;  %121 = vrot.lane.b32.xlu1 %v110_v19, %s2017_s29 }
  0xa9   :  { %481 = vst [vmem:[#allocation2 + $0x158] ss:$-44 sps:$4 sm:$0xcf] %v470_v27   ;;  %65 = vrot.lane.b32.xlu0 %v54_v20, %s2018_s30  ;;  %v1364_v31 = vpack.c.bf16 %v1268_v29, %v1262_v28  ;;  %v508_v27 = vrot.slane %v496_v18, 4  ;;  %v549_v28 = vld [vmem:[%s3277_s0 + $0x18] sm:$0x3f] }
  0xaa   :  { %v409_v36 = vpop.permute.xlu1 %408  ;;  %v353_v29 = vld [vmem:[%s3277_s0 + $0x28] sm:$0x3f]  ;;  %v694_v18 = vld [vmem:[%s3277_s0 + $0x20] sm:$0x3f] }
  0xab   :  { %v2504_v37 = vpop.permute.xlu0 %514  ;;  %1461 = vmatpush1.bf16.msra.mxu0 %v1364_v31  ;;  %v421_v38 = vsel %vm420_vm9, %v409_v36, %v411_v5 }
  0xac   :  { %v524_v39 = vsel %vm3314_vm12, %v513_v24, %v2504_v37  ;;  %432 = vst [vmem:[#allocation2 + $0x120] sm:$0x3f] %v421_v38  ;;  %320 = vrot.lane.b32.xlu1 %v310_v32, %s2022_s17  ;;  %v561_v38 = vrot.slane %v549_v28, 6 }
  0xad   :  { %535 = vst [vmem:[#allocation2 + $0x188] ss:$-44 sps:$4 sm:$0xf3] %v524_v39   ;;  %318 = vrot.lane.b32.xlu0 %v309_v33, %s2022_s17  ;;  %v365_v39 = vrot.slane %v353_v29, 6  ;;  %v706_v29 = vrot.slane %v694_v18, 4 }
  0xae   :  { %v511_v43 = vpop.permute.xlu1 %510 }
  0xaf   :  { %v457_v44 = vpop.permute.xlu0 %456  ;;  %v523_v45 = vsel %vm3314_vm12, %v511_v43, %v513_v24  ;;  %v311_v24 = vrot.slane %v299_v17, 4  ;;  %vm91_vm12 = vcmask 60416  }
  0xb0   :  { %v469_v46 = vsel %vm468_vm10, %v457_v44, %v459_v12  ;;  %534 = vst [vmem:[#allocation2 + $0x180] ss:$-44 sps:$4 sm:$0xf3] %v523_v45   ;;  %374 = vrot.lane.b32.xlu1 %v364_v40, %s2023_s25  ;;  %v1275_v57 = vld [vmem:[#allocation2 + $0x128] sm:$0xff]  ;;  %v550_v40 = vld [vmem:[%s3277_s0 + $0x20] sm:$0x3f] }
  0xb1   :  { %480 = vst [vmem:[#allocation2 + $0x150] ss:$-44 sps:$4 sm:$0xcf] %v469_v46   ;;  %372 = vrot.lane.b32.xlu0 %v363_v41, %s2023_s25  ;;  %v562_v44 = vrot.slane %v550_v40, 6  ;;  %v597_v45 = vld [vmem:[%s3277_s0 + $0x18] sm:$0x3f] }
  0xb2   :  { %v2524_v53 = vpop.permute.xlu1 %568  ;;  %v639_v46 = vld [vmem:[%s3277_s0 + $0x18] sm:$0x3f] }
  0xb3   :  { %v567_v54 = vpop.permute.xlu0 %566 }
  0xb4   :  { %v578_v55 = vsel %vm3304_vm13, %v567_v54, %v2524_v53  ;;  %v1281_v58 = vld [vmem:[#allocation2 + $0x158] sm:$0xff]  ;;  %220 = vrot.lane.b32.xlu1 %v203_v48, %s2020_s24  ;;  %s3316_s24 = smov 74  }
  0xb5   :  { %589 = vst [vmem:[#allocation2 + $0x188] sm:$0xfc] %v578_v55  ;;  %177 = vrot.lane.b32.xlu0 %v166_v47, %s2019_s15  ;;  %v1371_v59 = vpack.c.bf16 %v1281_v58, %v1275_v57  ;;  %s3322_s15 = smov 53  }
  0xb6   :  { %v2536_v63 = vpop.permute.xlu1 %610 }
  0xb7   :  { %v609_v0 = vpop.permute.xlu0 %608  ;;  %1462 = vmatprep.subr.bf16.mxu0 %v1371_v59  ;;  %v651_v59 = vrot.slane %v639_v46, 2 }
  0xb8   :  { %v620_v1 = vsel %vm3300_vm14, %v609_v0, %v2536_v63  ;;  %v1274_v2 = vld [vmem:[#allocation2 + $0x120] sm:$0xff]  ;;  %v1280_v3 = vld [vmem:[#allocation2 + $0x150] sm:$0xff]  ;;  %414 = vrot.lane.b32.xlu1 %v399_v61, %s2024_s13 }
  0xb9   :  { %631 = vst [vmem:[#allocation2 + $0x1b8] sm:$0x3f] %v620_v1  ;;  %268 = vrot.lane.b32.xlu0 %v257_v60, %s2021_s27  ;;  %v1370_v5 = vpack.c.bf16 %v1280_v3, %v1274_v2  ;;  %v598_v60 = vld [vmem:[%s3277_s0 + $0x20] sm:$0x3f]  ;;  %v401_v3 = vld [vmem:[%s3277_s0 + $0x28] sm:$0x3f] }
  0xba   :  { %v2551_v10 = vpop.permute.xlu1 %658  ;;  %v640_v61 = vld [vmem:[%s3277_s0 + $0x20] sm:$0x3f] }
  0xbb   :  { %v657_v11 = vpop.permute.xlu0 %656  ;;  %1463 = vmatpush1.bf16.msra.mxu0 %v1370_v5  ;;  %v652_v2 = vrot.slane %v640_v61, 2  ;;  %v497_v5 = vld [vmem:[%s3277_s0 + $0x28] sm:$0x3f] }
  0xbc   :  { %v668_v12 = vsel %vm3301_vm15, %v657_v11, %v2551_v10  ;;  %462 = vrot.lane.b32.xlu1 %v453_v6, %s2025_s22  ;;  %v1287_v34 = vld [vmem:[#allocation2 + $0x188] sm:$0xff] }
  0xbd   :  { %679 = vst [vmem:[#allocation2 + $0x1e8] ss:$-44 sps:$4 sm:$0xcf] %v668_v12   ;;  %416 = vrot.lane.b32.xlu0 %v400_v7, %s2024_s13  ;;  %v443_v6 = vld [vmem:[%s3277_s0 + $0x28] sm:$0x3f] }
  0xbe   :  { %v607_v19 = vpop.permute.xlu1 %606  ;;  %v455_v17 = vrot.slane %v443_v6, 2 }
  0xbf   :  { %v565_v20 = vpop.permute.xlu0 %564  ;;  %v619_v22 = vsel %vm3300_vm14, %v607_v19, %v609_v0  ;;  %vm3302_vm14 = vcmask 719872   ;;  %v693_v19 = vld [vmem:[%s3277_s0 + $0x18] sm:$0x3f] }
  0xc0   :  { %v577_v23 = vsel %vm3304_vm13, %v565_v20, %v567_v54  ;;  %630 = vst [vmem:[#allocation2 + $0x1b0] sm:$0x3f] %v619_v22  ;;  %516 = vrot.lane.b32.xlu1 %v507_v14, %s2026_s28  ;;  %vm3306_vm13 = vcmask 580608  }
  0xc1   :  { %588 = vst [vmem:[#allocation2 + $0x180] sm:$0xfc] %v577_v23  ;;  %464 = vrot.lane.b32.xlu0 %v454_v16, %s2025_s22  ;;  %v509_v16 = vrot.slane %v497_v5, 4 }
  0xc2   :  { %v711_v31 = vpop.permute.xlu1 %710 }
  0xc3   :  { %v655_v32 = vpop.permute.xlu0 %654 }
  0xc4   :  { %v667_v33 = vsel %vm3301_vm15, %v655_v32, %v657_v11  ;;  %v1293_v35 = vld [vmem:[#allocation2 + $0x1b8] sm:$0xff]  ;;  %322 = vrot.lane.b32.xlu1 %v311_v24, %s2022_s17  ;;  %vm3303_vm15 = vcmask 605184   ;;  %v748_v32 = vld [vmem:[%s3277_s0 + $0x20] sm:$0x3f] }
  0xc5   :  { %678 = vst [vmem:[#allocation2 + $0x1e0] ss:$-44 sps:$4 sm:$0xcf] %v667_v33   ;;  %518 = vrot.lane.b32.xlu0 %v508_v27, %s2026_s28  ;;  %v1377_v36 = vpack.c.bf16 %v1293_v35, %v1287_v34  ;;  %v747_v33 = vld [vmem:[%s3277_s0 + $0x18] sm:$0x3f] }
  0xc6   :  { %v765_v41 = vpop.permute.xlu1 %764  ;;  %v759_v40 = vrot.slane %v747_v33, 6 }
  0xc7   :  { %v2579_v42 = vpop.permute.xlu0 %712  ;;  %1464 = vmatprep.subr.bf16.mxu0 %v1377_v36 }
  0xc8   :  { %v722_v43 = vsel %vm3302_vm14, %v711_v31, %v2579_v42  ;;  %570 = vrot.lane.b32.xlu1 %v561_v38, %s2027_s20  ;;  %v1286_v55 = vld [vmem:[#allocation2 + $0x180] sm:$0xff] }
  0xc9   :  { %733 = vst [vmem:[#allocation2 + $0x218] ss:$-44 sps:$4 sm:$0xf3] %v722_v43   ;;  %376 = vrot.lane.b32.xlu0 %v365_v39, %s2023_s25  ;;  %v760_v39 = vrot.slane %v748_v32, 6 }
  0xca   :  { %v709_v47 = vpop.permute.xlu1 %708 }
  0xcb   :  { %v2591_v48 = vpop.permute.xlu0 %766  ;;  %v721_v50 = vsel %vm3302_vm14, %v709_v47, %v711_v31  ;;  %vm3305_vm14 = vcmask 596992   ;;  %v705_v31 = vrot.slane %v693_v19, 4 }
  0xcc   :  { %v776_v54 = vsel %vm3303_vm15, %v765_v41, %v2591_v48  ;;  %v1292_v57 = vld [vmem:[#allocation2 + $0x1b0] sm:$0xff]  ;;  %732 = vst [vmem:[#allocation2 + $0x210] ss:$-44 sps:$4 sm:$0xf3] %v721_v50   ;;  %612 = vrot.lane.b32.xlu1 %v597_v45, %s2028_s12  ;;  %v599_v50 = vld [vmem:[%s3277_s0 + $0x28] sm:$0x3f] }
  0xcd   :  { %787 = vst [vmem:[#allocation2 + $0x218] sm:$0xfc] %v776_v54  ;;  %572 = vrot.lane.b32.xlu0 %v562_v44, %s2027_s20  ;;  %v1376_v58 = vpack.c.bf16 %v1292_v57, %v1286_v55  ;;  %v641_v54 = vld [vmem:[%s3277_s0 + $0x28] sm:$0x3f] }
  0xce   :  { %v807_v62 = vpop.permute.xlu1 %806 }
  0xcf   :  { %v763_v0 = vpop.permute.xlu0 %762  ;;  %1465 = vmatpush1.bf16.msra.mxu0 %v1376_v58 }
  0xd0   :  { %v775_v1 = vsel %vm3303_vm15, %v763_v0, %v765_v41  ;;  %660 = vrot.lane.b32.xlu1 %v651_v59, %s2029_s18  ;;  %v1299_v11 = vld [vmem:[#allocation2 + $0x1e8] sm:$0xff]  ;;  %vm3307_vm15 = vcmask 588800   ;;  %v795_v0 = vld [vmem:[%s3277_s0 + $0x18] sm:$0x3f] }
  0xd1   :  { %786 = vst [vmem:[#allocation2 + $0x210] sm:$0xfc] %v775_v1  ;;  %614 = vrot.lane.b32.xlu0 %v598_v60, %s2028_s12  ;;  %v551_v41 = vld [vmem:[%s3277_s0 + $0x28] sm:$0x3f]  ;;  %v837_v1 = vld [vmem:[%s3277_s0 + $0x18] sm:$0x3f] }
  0xd2   :  { %v855_v7 = vpop.permute.xlu1 %854  ;;  %v563_v47 = vrot.slane %v551_v41, 6 }
  0xd3   :  { %v2616_v8 = vpop.permute.xlu0 %808  ;;  %v1298_v24 = vld [vmem:[#allocation2 + $0x1e0] sm:$0xff] }
  0xd4   :  { %v818_v9 = vsel %vm3305_vm14, %v807_v62, %v2616_v8  ;;  %v1305_v12 = vld [vmem:[#allocation2 + $0x218] sm:$0xff]  ;;  %418 = vrot.lane.b32.xlu1 %v401_v3, %s2024_s13 }
  0xd5   :  { %829 = vst [vmem:[#allocation2 + $0x248] sm:$0x3f] %v818_v9  ;;  %662 = vrot.lane.b32.xlu0 %v652_v2, %s2029_s18  ;;  %v1383_v14 = vpack.c.bf16 %v1305_v12, %v1299_v11  ;;  %v849_v11 = vrot.slane %v837_v1, 2  ;;  %v796_v12 = vld [vmem:[%s3277_s0 + $0x20] sm:$0x3f] }
  0xd6   :  { %v909_v20 = vpop.permute.xlu1 %908 }
  0xd7   :  { %v2628_v22 = vpop.permute.xlu0 %856  ;;  %1466 = vmatprep.subr.bf16.mxu0 %v1383_v14  ;;  %v891_v14 = vld [vmem:[%s3277_s0 + $0x18] sm:$0x3f] }
  0xd8   :  { %v866_v23 = vsel %vm3307_vm15, %v855_v7, %v2628_v22  ;;  %v1304_v27 = vld [vmem:[#allocation2 + $0x210] sm:$0xff]  ;;  %520 = vrot.lane.b32.xlu1 %v509_v16, %s2026_s28  ;;  %v838_v16 = vld [vmem:[%s3277_s0 + $0x20] sm:$0x3f] }
  0xd9   :  { %877 = vst [vmem:[#allocation2 + $0x278] ss:$-44 sps:$4 sm:$0xcf] %v866_v23   ;;  %466 = vrot.lane.b32.xlu0 %v455_v17, %s2025_s22  ;;  %v1382_v28 = vpack.c.bf16 %v1304_v27, %v1298_v24  ;;  %s3315_s22 = smov 88   ;;  %v850_v23 = vrot.slane %v838_v16, 2 }
  0xda   :  { %v805_v34 = vpop.permute.xlu1 %804  ;;  %v695_v24 = vld [vmem:[%s3277_s0 + $0x28] sm:$0x3f]  ;;  %v892_v27 = vld [vmem:[%s3277_s0 + $0x20] sm:$0x3f] }
  0xdb   :  { %v2640_v35 = vpop.permute.xlu0 %910  ;;  %1467 = vmatpush1.bf16.msra.mxu0 %v1382_v28  ;;  %v817_v36 = vsel %vm3305_vm14, %v805_v34, %v807_v62  ;;  %vm3313_vm14 = vcmask 572416   ;;  %v653_v62 = vrot.slane %v641_v54, 2  ;;  %v707_v33 = vrot.slane %v695_v24, 4  ;;  %v893_v24 = vld [vmem:[%s3277_s0 + $0x28] sm:$0x3f] }
  0xdc   :  { %v920_v38 = vsel %vm3306_vm13, %v909_v20, %v2640_v35  ;;  %828 = vst [vmem:[#allocation2 + $0x240] sm:$0x3f] %v817_v36  ;;  %716 = vrot.lane.b32.xlu1 %v706_v29, %s3315_s22  ;;  %v904_v34 = vrot.slane %v892_v27, 4  ;;  %v945_v36 = vld [vmem:[%s3277_s0 + $0x18] sm:$0x3f] }
  0xdd   :  { %931 = vst [vmem:[#allocation2 + $0x2a8] ss:$-44 sps:$4 sm:$0xf3] %v920_v38   ;;  %714 = vrot.lane.b32.xlu0 %v705_v31, %s3315_s22  ;;  %v749_v38 = vld [vmem:[%s3277_s0 + $0x28] sm:$0x3f] }
  0xde   :  { %v907_v43 = vpop.permute.xlu1 %906 }
  0xdf   :  { %v853_v44 = vpop.permute.xlu0 %852  ;;  %v919_v45 = vsel %vm3306_vm13, %v907_v43, %v909_v20  ;;  %vm3308_vm13 = vcmask 457728   ;;  %v903_v20 = vrot.slane %v891_v14, 4 }
  0xe0   :  { %v865_v46 = vsel %vm3307_vm15, %v853_v44, %v855_v7  ;;  %930 = vst [vmem:[#allocation2 + $0x2a0] ss:$-44 sps:$4 sm:$0xf3] %v919_v45   ;;  %770 = vrot.lane.b32.xlu1 %v760_v39, %s3316_s24  ;;  %v1311_v59 = vld [vmem:[#allocation2 + $0x248] sm:$0xff]  ;;  %vm3309_vm15 = vcmask 449536  }
  0xe1   :  { %876 = vst [vmem:[#allocation2 + $0x270] ss:$-44 sps:$4 sm:$0xcf] %v865_v46   ;;  %768 = vrot.lane.b32.xlu0 %v759_v40, %s3316_s24  ;;  %v957_v46 = vrot.slane %v945_v36, 6  ;;  %v905_v36 = vrot.slane %v893_v24, 4 }
  0xe2   :  { %v2660_v55 = vpop.permute.xlu1 %964  ;;  %v995_v24 = vld [vmem:[%s3277_s0 + $0x28] sm:$0x3f] }
  0xe3   :  { %v963_v57 = vpop.permute.xlu0 %962 }
  0xe4   :  { %v974_v58 = vsel %vm3313_vm14, %v963_v57, %v2660_v55  ;;  %v1317_v60 = vld [vmem:[#allocation2 + $0x278] sm:$0xff]  ;;  %616 = vrot.lane.b32.xlu1 %v599_v50, %s2028_s12  ;;  %v946_v50 = vld [vmem:[%s3277_s0 + $0x20] sm:$0x3f] }
  0xe5   :  { %985 = vst [vmem:[#allocation2 + $0x2a8] sm:$0xfc] %v974_v58  ;;  %574 = vrot.lane.b32.xlu0 %v563_v47, %s2027_s20  ;;  %v1389_v61 = vpack.c.bf16 %v1317_v60, %v1311_v59  ;;  %v761_v47 = vrot.slane %v749_v38, 6  ;;  %v958_v59 = vrot.slane %v946_v50, 6  ;;  %v993_v60 = vld [vmem:[%s3277_s0 + $0x18] sm:$0x3f] }
  0xe6   :  { %v2672_v2 = vpop.permute.xlu1 %1006 }
  0xe7   :  { %v1005_v3 = vpop.permute.xlu0 %1004  ;;  %1468 = vmatprep.subr.bf16.mxu0 %v1389_v61  ;;  %v1035_v61 = vld [vmem:[%s3277_s0 + $0x18] sm:$0x3f] }
  0xe8   :  { %v1016_v5 = vsel %vm3308_vm13, %v1005_v3, %v2672_v2  ;;  %v1310_v6 = vld [vmem:[#allocation2 + $0x240] sm:$0xff]  ;;  %v1316_v7 = vld [vmem:[#allocation2 + $0x270] sm:$0xff]  ;;  %810 = vrot.lane.b32.xlu1 %v795_v0, %s2032_s21 }
  0xe9   :  { %1027 = vst [vmem:[#allocation2 + $0x2d8] sm:$0x3f] %v1016_v5  ;;  %664 = vrot.lane.b32.xlu0 %v653_v62, %s2029_s18  ;;  %v1388_v9 = vpack.c.bf16 %v1316_v7, %v1310_v6  ;;  %s3317_s18 = smov 72  }
  0xea   :  { %v2687_v17 = vpop.permute.xlu1 %1054 }
  0xeb   :  { %v1053_v18 = vpop.permute.xlu0 %1052  ;;  %1469 = vmatpush1.bf16.msra.mxu0 %v1388_v9  ;;  %v1047_v9 = vrot.slane %v1035_v61, 2 }
  0xec   :  { %v1064_v19 = vsel %vm3309_vm15, %v1053_v18, %v2687_v17  ;;  %858 = vrot.lane.b32.xlu1 %v849_v11, %s3317_s18  ;;  %v1323_v43 = vld [vmem:[#allocation2 + $0x2a8] sm:$0xff]  ;;  %v994_v11 = vld [vmem:[%s3277_s0 + $0x20] sm:$0x3f] }
  0xed   :  { %1075 = vst [vmem:[#allocation2 + $0x308] ss:$-44 sps:$4 sm:$0xcf] %v1064_v19   ;;  %812 = vrot.lane.b32.xlu0 %v796_v12, %s2032_s21  ;;  %v1036_v12 = vld [vmem:[%s3277_s0 + $0x20] sm:$0x3f] }
  0xee   :  { %v1003_v28 = vpop.permute.xlu1 %1002 }
  0xef   :  { %v961_v29 = vpop.permute.xlu0 %960  ;;  %v1015_v31 = vsel %vm3308_vm13, %v1003_v28, %v1005_v3  ;;  %vm3312_vm13 = vcmask 441344  }
  0xf0   :  { %v973_v32 = vsel %vm3313_vm14, %v961_v29, %v963_v57  ;;  %1026 = vst [vmem:[#allocation2 + $0x2d0] sm:$0x3f] %v1015_v31  ;;  %912 = vrot.lane.b32.xlu1 %v903_v20, %s3318_s7  ;;  %v1048_v20 = vrot.slane %v1036_v12, 2  ;;  %vm147_vm14 = vcmask 58368  }
  0xf1   :  { %984 = vst [vmem:[#allocation2 + $0x2a0] sm:$0xfc] %v973_v32  ;;  %860 = vrot.lane.b32.xlu0 %v850_v23, %s3317_s18  ;;  %v797_v23 = vld [vmem:[%s3277_s0 + $0x28] sm:$0x3f] }
  0xf2   :  { %v1107_v39 = vpop.permute.xlu1 %1106 }
  0xf3   :  { %v1051_v40 = vpop.permute.xlu0 %1050 }
  0xf4   :  { %v1063_v41 = vsel %vm3309_vm15, %v1051_v40, %v1053_v18  ;;  %v1329_v44 = vld [vmem:[#allocation2 + $0x2d8] sm:$0xff]  ;;  %718 = vrot.lane.b32.xlu1 %v707_v33, %s3315_s22  ;;  %vm3310_vm15 = vcmask 433152  }
  0xf5   :  { %1074 = vst [vmem:[#allocation2 + $0x300] ss:$-44 sps:$4 sm:$0xcf] %v1063_v41   ;;  %914 = vrot.lane.b32.xlu0 %v904_v34, %s3318_s7  ;;  %v1395_v45 = vpack.c.bf16 %v1329_v44, %v1323_v43 }
  0xf6   :  { %v1161_v54 = vpop.permute.xlu1 %1160 }
  0xf7   :  { %v2715_v57 = vpop.permute.xlu0 %1108  ;;  %1470 = vmatprep.subr.bf16.mxu0 %v1395_v45 }
  0xf8   :  { %v1118_v58 = vsel %vm3312_vm13, %v1107_v39, %v2715_v57  ;;  %966 = vrot.lane.b32.xlu1 %v957_v46, %s2035_s16  ;;  %v1322_v5 = vld [vmem:[#allocation2 + $0x2a0] sm:$0xff] }
  0xf9   :  { %1129 = vst [vmem:[#allocation2 + $0x338] ss:$-44 sps:$4 sm:$0xf3] %v1118_v58   ;;  %772 = vrot.lane.b32.xlu0 %v761_v47, %s3316_s24  ;;  %s3319_s24 = smov 56   ;;  %v1143_v58 = vld [vmem:[%s3277_s0 + $0x18] sm:$0x3f] }
  0xfa   :  { %v1105_v62 = vpop.permute.xlu1 %1104 }
  0xfb   :  { %v2727_v0 = vpop.permute.xlu0 %1162  ;;  %v1117_v1 = vsel %vm3312_vm13, %v1105_v62, %v1107_v39  ;;  %v1090_v39 = vld [vmem:[%s3277_s0 + $0x20] sm:$0x3f]  ;;  %vm140_vm13 = vcmask 64516  }
  0xfc   :  { %v1172_v3 = vsel %vm3310_vm15, %v1161_v54, %v2727_v0  ;;  %v1328_v6 = vld [vmem:[#allocation2 + $0x2d0] sm:$0xff]  ;;  %1128 = vst [vmem:[#allocation2 + $0x330] ss:$-44 sps:$4 sm:$0xf3] %v1117_v1   ;;  %1008 = vrot.lane.b32.xlu1 %v993_v60, %s3319_s24  ;;  %v1102_v47 = vrot.slane %v1090_v39, 4 }
  0xfd   :  { %1183 = vst [vmem:[#allocation2 + $0x338] sm:$0xfc] %v1172_v3  ;;  %968 = vrot.lane.b32.xlu0 %v958_v59, %s2035_s16  ;;  %v1394_v7 = vpack.c.bf16 %v1328_v6, %v1322_v5  ;;  %v1155_v3 = vrot.slane %v1143_v58, 6  ;;  %v947_v5 = vld [vmem:[%s3277_s0 + $0x28] sm:$0x3f] }
  0xfe   :  { %v62_v14 = vpop.permute.xlu1 %61  ;;  %v1192_v58 = vld [vmem:[%s3277_s0 + $0x20] sm:$0x3f] }
  0xff   :  { %v1159_v16 = vpop.permute.xlu0 %1158  ;;  %1471 = vmatpush1.bf16.msra.mxu0 %v1394_v7  ;;  %v70_v18 = vsel %vm67_vm1, %v2338_v52, %v62_v14  ;;  %v839_v52 = vld [vmem:[%s3277_s0 + $0x28] sm:$0x3f] }
 0x100   :  { %v1171_v19 = vsel %vm3310_vm15, %v1159_v16, %v1161_v54  ;;  %81 = vst [vmem:[#allocation2 + $0x40] ss:$-44 sps:$4 sm:$0xcf] %v70_v18   ;;  %1056 = vrot.lane.b32.xlu1 %v1047_v9, %s3320_s26  ;;  %v1335_v32 = vld [vmem:[#allocation2 + $0x308] sm:$0xff]  ;;  %v851_v38 = vrot.slane %v839_v52, 2  ;;  %vm3311_vm15 = vcmask 424960  }
 0x101   :  { %1182 = vst [vmem:[#allocation2 + $0x330] sm:$0xfc] %v1171_v19  ;;  %1010 = vrot.lane.b32.xlu0 %v994_v11, %s3319_s24  ;;  %v1144_v54 = vld [vmem:[%s3277_s0 + $0x20] sm:$0x3f] }
 0x102   :  { %v118_v27 = vpop.permute.xlu1 %117  ;;  %v1156_v1 = vrot.slane %v1144_v54, 6 }
 0x103   :  { %v2754_v28 = vpop.permute.xlu0 %63  ;;  %v126_v29 = vsel %vm123_vm0, %v2336_v51, %v118_v27  ;;  %v1089_v51 = vld [vmem:[%s3277_s0 + $0x18] sm:$0x3f]  ;;  %v1334_v44 = vld [vmem:[#allocation2 + $0x300] sm:$0xff] }
 0x104   :  { %v71_v31 = vsel %vm67_vm1, %v62_v14, %v2754_v28  ;;  %v1341_v33 = vld [vmem:[#allocation2 + $0x338] sm:$0xff]  ;;  %137 = vst [vmem:[#allocation2 + $0x70] ss:$-44 sps:$4 sm:$0xf3] %v126_v29   ;;  %814 = vrot.lane.b32.xlu1 %v797_v23, %s2032_s21  ;;  %v1101_v50 = vrot.slane %v1089_v51, 4  ;;  %v1236_v29 = vld [vmem:[%s3278_s1] sm:$0xff] }
 0x105   :  { %82 = vst [vmem:[#allocation2 + $0x48] ss:$-44 sps:$4 sm:$0xcf] %v71_v31   ;;  %1058 = vrot.lane.b32.xlu0 %v1048_v20, %s3320_s26  ;;  %v1401_v34 = vpack.c.bf16 %v1341_v33, %v1335_v32  ;;  %v959_v20 = vrot.slane %v947_v5, 6  ;;  %v1191_v51 = vld [vmem:[%s3277_s0 + $0x18] sm:$0x3f] }
 0x106   :  { %v1201_v40 = vpop.permute.xlu1 %1200 }
 0x107   :  { %v2768_v41 = vpop.permute.xlu0 %119  ;;  %1472 = vmatprep.subr.bf16.mxu0 %v1401_v34  ;;  %v1240_v19 = vld [vmem:[#allocation2 + $0x10] sm:$0xff] }
 0x108   :  { %v127_v43 = vsel %vm123_vm0, %v118_v27, %v2768_v41  ;;  %v1340_v45 = vld [vmem:[#allocation2 + $0x330] sm:$0xff]  ;;  %916 = vrot.lane.b32.xlu1 %v905_v36, %s3318_s7  ;;  %v1237_v36 = vld [vmem:[%s3278_s1 + $0x8] sm:$0xff] }
 0x109   :  { %138 = vst [vmem:[#allocation2 + $0x78] ss:$-44 sps:$4 sm:$0xf3] %v127_v43   ;;  %862 = vrot.lane.b32.xlu0 %v851_v38, %s3317_s18  ;;  %v1400_v46 = vpack.c.bf16 %v1340_v45, %v1334_v44  ;;  %s3321_s18 = smov 54  }
 0x10a   :  { %v2780_v59 = vpop.permute.xlu1 %1204 }
 0x10b   :  { %v1203_v60 = vpop.permute.xlu0 %1202  ;;  %1473 = vmatpush1.bf16.msra.mxu0 %v1400_v46  ;;  %v1246_v9 = vld [vmem:[#allocation2 + $0x40] sm:$0xff]  ;;  %v2828_v46 = vcombine.low %v1236_v29, %v1237_v36  ;;  %v2042_v36 = vmov 0  }
 0x10c   :  { %v1213_v61 = vsel %vm3311_vm15, %v1201_v40, %v1203_v60  ;;  %v1214_v62 = vsel %vm3311_vm15, %v1203_v60, %v2780_v59  ;;  %1112 = vrot.lane.b32.xlu1 %v1102_v47, %s3321_s18  ;;  %v1241_v14 = vld [vmem:[#allocation2 + $0x18] sm:$0xff]  ;;  %v1354_v23 = vpack.c.bf16 %v1246_v9, %v1240_v19  ;;  %vm1437_vm15 = vcmask 1043456   ;;  %v1091_v40 = vld [vmem:[%s3277_s0 + $0x28] sm:$0x3f]  ;;  %2009 = vset.pattern.permute.xlu0 %v2042_v36 }
 0x10d   :  { %1224 = vst [vmem:[#allocation2 + $0x360] sm:$0x3f] %v1213_v61  ;;  %1225 = vst [vmem:[#allocation2 + $0x368] sm:$0x3f] %v1214_v62  ;;  %1110 = vrot.lane.b32.xlu0 %v1101_v50, %s3321_s18  ;;  %v1103_v54 = vrot.slane %v1091_v40, 4  ;;  %2010 = vset.pattern.permute.xlu1 %v2042_v36 }
 0x10e   :  { %v2790_v6 = vpop.permute.xlu1 %175 }
 0x10f   :  { %v174_v7 = vpop.permute.xlu0 %173 }
 0x110   :  { %v182_v11 = vsel %vm179_vm2, %v2365_v4, %v174_v7  ;;  %v183_v12 = vsel %vm179_vm2, %v174_v7, %v2790_v6  ;;  %v1247_v16 = vld [vmem:[#allocation2 + $0x48] sm:$0xff]  ;;  %1166 = vrot.lane.b32.xlu1 %v1156_v1, %s3322_s15 }
 0x111   :  { %193 = vst [vmem:[#allocation2 + $0x70] sm:$0xfc] %v182_v11  ;;  %194 = vst [vmem:[#allocation2 + $0x78] sm:$0xfc] %v183_v12  ;;  %1164 = vrot.lane.b32.xlu0 %v1155_v3, %s3322_s15  ;;  %v1355_v18 = vpack.c.bf16 %v1247_v16, %v1241_v14  ;;  %v1037_v4 = vld [vmem:[%s3277_s0 + $0x28] sm:$0x3f] }
 0x112   :  { %v2804_v52 = vpop.permute.xlu1 %218  ;;  %v1193_v3 = vld [vmem:[%s3277_s0 + $0x28] sm:$0x3f] }
 0x113   :  { %v217_v27 = vpop.permute.xlu0 %216  ;;  %1499 = vmatprep.subr.bf16.mxu1 %v1355_v18 }
 0x114   :  { %v225_v31 = vsel %vm222_vm3, %v2380_v15, %v217_v27  ;;  %v226_v32 = vsel %vm222_vm3, %v217_v27, %v2804_v52  ;;  %1500 = vmatpush1.bf16.msra.mxu1 %v1354_v23  ;;  %v1347_v33 = vld [vmem:[#allocation2 + $0x368] sm:$0xff]  ;;  %v1346_v34 = vld [vmem:[#allocation2 + $0x360] sm:$0xff]  ;;  %1012 = vrot.lane.b32.xlu1 %v995_v24, %s3319_s24  ;;  %v1049_v15 = vrot.slane %v1037_v4, 2 }
 0x115   :  { %236 = vst [vmem:[#allocation2 + $0xa0] sm:$0x3f] %v225_v31  ;;  %237 = vst [vmem:[#allocation2 + $0xa8] sm:$0x3f] %v226_v32  ;;  %970 = vrot.lane.b32.xlu0 %v959_v20, %s2035_s16  ;;  %v1407_v38 = vpack.c.bf16 %v1347_v33, %v1347_v33  ;;  %v1406_v39 = vpack.c.bf16 %v1346_v34, %v1346_v34 }
 0x116   :  { %v2824_v43 = vpop.permute.xlu1 %266 }
 0x117   :  { %v265_v44 = vpop.permute.xlu0 %264  ;;  %1977 = vmatprep.subr.msk.bf16.mxu0 %vm1437_vm15, %v1407_v38  ;;  %v1439_v45 = vsel %vm1437_vm15, %v1406_v39, 0  ;;  %v1412_v38 = vld [vmem:[%s3279_s2] sm:$0xff] }
 0x118   :  { %v273_v47 = vsel %vm270_vm4, %v2392_v25, %v265_v44  ;;  %v274_v50 = vsel %vm270_vm4, %v265_v44, %v2824_v43  ;;  %1475 = vmatpush1.bf16.msra.mxu0 %v1439_v45  ;;  %1206 = vrot.lane.b32.xlu1 %v1191_v51, %s2041_s10  ;;  %v1145_v25 = vld [vmem:[%s3277_s0 + $0x28] sm:$0x3f]  ;;  %v1253_v7 = vld [vmem:[#allocation2 + $0x78] sm:$0xff]  ;;  %v1252_v12 = vld [vmem:[#allocation2 + $0x70] sm:$0xff] }
 0x119   :  { %284 = vst [vmem:[#allocation2 + $0xd0] ss:$-44 sps:$4 sm:$0xcf] %v273_v47   ;;  %285 = vst [vmem:[#allocation2 + $0xd8] ss:$-44 sps:$4 sm:$0xcf] %v274_v50   ;;  %1060 = vrot.lane.b32.xlu0 %v1049_v15, %s3320_s26 }
 0x11a   :  { %v122_v60 = vpop.permute.xlu1 %121 }
 0x11b   :  { %v66_v61 = vpop.permute.xlu0 %65  ;;  %1489 = vmatmul.mubr.bf16.vlgmr.msra.gmra.mrb[0].mxu0 %v2828_v46  ;;  %v128_v62 = vsel %vm123_vm0, %v2768_v41, %v122_v60  ;;  %141 = vst.msk [vmem:[#allocation2 + $0x58] sm:$0xf0] %vm140_vm13, %v122_v60  ;;  %v1157_v41 = vrot.slane %v1145_v25, 6  ;;  %vm196_vm0 = vcmask 64514  }
 0x11c   :  { %148 = vst.msk [vmem:[#allocation2 + $0x88] sm:$0x3] %vm147_vm14, %v122_v60  ;;  %v72_v1 = vsel %vm67_vm1, %v2754_v28, %v66_v61  ;;  %1982 = vmatprep.mubr.msk.bf16.mxu0 %vm1433_vm11, %v2480_v21  ;;  %139 = vst [vmem:[#allocation2 + $0x80] ss:$-44 sps:$4 sm:$0xf3] %v128_v62   ;;  %1114 = vrot.lane.b32.xlu1 %v1103_v54, %s3321_s18  ;;  %vm3325_vm11 = vcmask 744448  }
 0x11d   :  { %85 = vst.msk [vmem:[#allocation2 + $0x28] sm:$0xc0] %vm84_vm7, %v66_v61  ;;  %83 = vst [vmem:[#allocation2 + $0x50] ss:$-44 sps:$4 sm:$0xcf] %v72_v1   ;;  %1208 = vrot.lane.b32.xlu0 %v1192_v58, %s2041_s10 }
 0x11e   :  { %92 = vst.msk [vmem:[#allocation2 + $0x58] sm:$0xf] %vm91_vm12, %v66_v61  ;;  %v2858_v5 = vpop.permute.xlu1 %320 }
 0x11f   :  { %v319_v28 = vpop.permute.xlu0 %318 }
 0x120   :  { %v327_v9 = vsel %vm324_vm5, %v2428_v49, %v319_v28  ;;  %v328_v21 = vsel %vm324_vm5, %v319_v28, %v2858_v5  ;;  %v1259_v11 = vld [vmem:[#allocation2 + $0xa8] sm:$0xff]  ;;  %v1258_v14 = vld [vmem:[#allocation2 + $0xa0] sm:$0xff]  ;;  %1210 = vrot.lane.b32.xlu1 %v1193_v3, %s2041_s10 }
 0x121   :  { %338 = vst [vmem:[#allocation2 + $0x100] ss:$-44 sps:$4 sm:$0xf3] %v327_v9   ;;  %339 = vst [vmem:[#allocation2 + $0x108] ss:$-44 sps:$4 sm:$0xf3] %v328_v21   ;;  %1168 = vrot.lane.b32.xlu0 %v1157_v41, %s3322_s15  ;;  %v1361_v16 = vpack.c.bf16 %v1259_v11, %v1253_v7  ;;  %v1360_v18 = vpack.c.bf16 %v1258_v14, %v1252_v12 }
 0x122   :  { %v2866_v19 = vpop.permute.xlu1 %374 }
 0x123   :  { %v373_v20 = vpop.permute.xlu0 %372  ;;  %1501 = vmatprep.subr.bf16.mxu1 %v1361_v16 }
 0x124   :  { %v1243_v23 = vld [vmem:[#allocation2 + $0x28] sm:$0xff]  ;;  %v381_v24 = vsel %vm378_vm6, %v2434_v56, %v373_v20  ;;  %v382_v4 = vsel %vm378_vm6, %v373_v20, %v2866_v19  ;;  %1502 = vmatpush1.bf16.msra.mxu1 %v1360_v18  ;;  %v1242_v29 = vld [vmem:[#allocation2 + $0x20] sm:$0xff]  ;;  %v1248_v31 = vld [vmem:[#allocation2 + $0x50] sm:$0xff] }
 0x125   :  { %v1249_v49 = vld [vmem:[#allocation2 + $0x58] sm:$0xff]  ;;  %392 = vst [vmem:[#allocation2 + $0x100] sm:$0xfc] %v381_v24  ;;  %393 = vst [vmem:[#allocation2 + $0x108] sm:$0xfc] %v382_v4  ;;  %v1356_v32 = vpack.c.bf16 %v1248_v31, %v1242_v29  ;;  %v1413_v56 = vld [vmem:[%s3279_s2 + $0x8] sm:$0xff]  ;;  %1416 = vperm.xlu0 %2009, %v1412_v38  }
 0x126   :  { %v1357_v27 = vpack.c.bf16 %v1249_v49, %v1243_v23  ;;  %v221_v33 = vpop.permute.xlu1 %220  ;;  %1421 = vperm.xlu1 %2010, %v1413_v56  }
 0x127   :  { %v178_v34 = vpop.permute.xlu0 %177  ;;  %v227_v39 = vsel %vm222_vm3, %v2804_v52, %v221_v33  ;;  %239 = vst.msk [vmem:[#allocation2 + $0xb8] sm:$0x3f] %vm35_vm8, %v221_v33 }
 0x128   :  { %1542 = vmatprep.subr.bf16.mxu0 %v1357_v27  ;;  %v184_v15 = vsel %vm179_vm2, %v2790_v6, %v178_v34  ;;  %197 = vst.msk [vmem:[#allocation2 + $0x88] sm:$0xfc] %vm196_vm0, %v178_v34  ;;  %238 = vst [vmem:[#allocation2 + $0xb0] sm:$0x3f] %v227_v39  ;;  %v1265_v44 = vld [vmem:[#allocation2 + $0xd8] sm:$0xff]  ;;  %v1264_v47 = vld [vmem:[#allocation2 + $0xd0] sm:$0xff] }
 0x129   :  { %1543 = vmatpush1.bf16.msra.mxu0 %v1356_v32  ;;  %195 = vst [vmem:[#allocation2 + $0x80] sm:$0xfc] %v184_v15  ;;  %vm3323_vm2 = vcmask 752640  }
 0x12a   :  { %v415_v51 = vpop.permute.xlu1 %414  ;;  %vm3324_vm3 = vmmov %vm3323_vm2 }
 0x12b   :  { %v269_v40 = vpop.permute.xlu0 %268  ;;  %v423_v45 = vsel %vm420_vm9, %v2471_v13, %v415_v51 }
 0x12c   :  { %v275_v52 = vsel %vm270_vm4, %v2824_v43, %v269_v40  ;;  %287 = vst.msk [vmem:[#allocation2 + $0xb8] sm:$0xc0] %vm84_vm7, %v269_v40  ;;  %v1271_v6 = vld [vmem:[#allocation2 + $0x108] sm:$0xff]  ;;  %v1270_v50 = vld [vmem:[#allocation2 + $0x100] sm:$0xff]  ;;  %434 = vst [vmem:[#allocation2 + $0x130] sm:$0x3f] %v423_v45 }
 0x12d   :  { %293 = vst.msk [vmem:[#allocation2 + $0xe8] sm:$0xf] %vm91_vm12, %v269_v40  ;;  %286 = vst [vmem:[#allocation2 + $0xe0] ss:$-44 sps:$4 sm:$0xcf] %v275_v52   ;;  %v1367_v54 = vpack.c.bf16 %v1271_v6, %v1265_v44  ;;  %v1366_v58 = vpack.c.bf16 %v1270_v50, %v1264_v47 }
 0x12e   :  { %v463_v25 = vpop.permute.xlu1 %462 }
 0x12f   :  { %v2890_v60 = vpop.permute.xlu0 %416  ;;  %1503 = vmatprep.subr.bf16.mxu1 %v1367_v54  ;;  %v471_v13 = vsel %vm468_vm10, %v2488_v26, %v463_v25  ;;  %v1255_v1 = vld [vmem:[#allocation2 + $0x88] sm:$0xff] }
 0x130   :  { %v424_v43 = vsel %vm420_vm9, %v415_v51, %v2890_v60  ;;  %1504 = vmatpush1.bf16.msra.mxu1 %v1366_v58  ;;  %482 = vst [vmem:[#allocation2 + $0x160] ss:$-44 sps:$4 sm:$0xcf] %v471_v13   ;;  %v1254_v9 = vld [vmem:[#allocation2 + $0x80] sm:$0xff] }
 0x131   :  { %435 = vst [vmem:[#allocation2 + $0x138] sm:$0x3f] %v424_v43 }
 0x132   :  { %v517_v61 = vpop.permute.xlu1 %516 }
 0x133   :  { %v2896_v62 = vpop.permute.xlu0 %464  ;;  %v1261_v41 = vld [vmem:[#allocation2 + $0xb8] sm:$0xff]  ;;  %v525_v3 = vsel %vm3323_vm2, %v2504_v37, %v517_v61  ;;  %vm3327_vm2 = vmmov %vm3325_vm11 }
 0x134   :  { %v472_v28 = vsel %vm468_vm10, %v463_v25, %v2896_v62  ;;  %v1363_v7 = vpack.c.bf16 %v1261_v41, %v1255_v1  ;;  %v1260_v26 = vld [vmem:[#allocation2 + $0xb0] sm:$0xff]  ;;  %536 = vst [vmem:[#allocation2 + $0x190] ss:$-44 sps:$4 sm:$0xf3] %v525_v3  }
 0x135   :  { %483 = vst [vmem:[#allocation2 + $0x168] ss:$-44 sps:$4 sm:$0xcf] %v472_v28   ;;  %v1362_v21 = vpack.c.bf16 %v1260_v26, %v1254_v9 }
 0x136   :  { %1544 = vmatprep.subr.bf16.mxu0 %v1363_v7  ;;  %v323_v11 = vpop.permute.xlu1 %322 }
 0x137   :  { %v519_v12 = vpop.permute.xlu0 %518  ;;  %1545 = vmatpush1.bf16.msra.mxu0 %v1362_v21  ;;  %v329_v14 = vsel %vm324_vm5, %v2858_v5, %v323_v11  ;;  %341 = vst.msk [vmem:[#allocation2 + $0xe8] sm:$0xf0] %vm140_vm13, %v323_v11  ;;  %vm3326_vm5 = vcmask 736256  }
 0x138   :  { %347 = vst.msk [vmem:[#allocation2 + $0x118] sm:$0x3] %vm147_vm14, %v323_v11  ;;  %v526_v37 = vsel %vm3324_vm3, %v517_v61, %v519_v12  ;;  %340 = vst [vmem:[#allocation2 + $0x110] ss:$-44 sps:$4 sm:$0xf3] %v329_v14  }
 0x139   :  { %537 = vst [vmem:[#allocation2 + $0x198] ss:$-44 sps:$4 sm:$0xf3] %v526_v37   ;;  %vm3329_vm3 = vmmov %vm3326_vm5 }
 0x13a   :  { %v571_v16 = vpop.permute.xlu1 %570 }
 0x13b   :  { %v377_v18 = vpop.permute.xlu0 %376  ;;  %v579_v20 = vsel %vm3325_vm11, %v2524_v53, %v571_v16  ;;  %v1282_v24 = vld [vmem:[#allocation2 + $0x160] sm:$0xff] }
 0x13c   :  { %v383_v23 = vsel %vm378_vm6, %v2866_v19, %v377_v18  ;;  %395 = vst.msk [vmem:[#allocation2 + $0x118] sm:$0xfc] %vm196_vm0, %v377_v18  ;;  %590 = vst [vmem:[#allocation2 + $0x190] sm:$0xfc] %v579_v20  ;;  %v1277_v29 = vld [vmem:[#allocation2 + $0x138] sm:$0xff]  ;;  %v1276_v19 = vld [vmem:[#allocation2 + $0x130] sm:$0xff] }
 0x13d   :  { %394 = vst [vmem:[#allocation2 + $0x110] sm:$0xfc] %v383_v23  ;;  %v1372_v32 = vpack.c.bf16 %v1282_v24, %v1276_v19  ;;  %vm3328_vm6 = vcmask 728064  }
 0x13e   :  { %v613_v5 = vpop.permute.xlu1 %612  ;;  %v1267_v36 = vld [vmem:[#allocation2 + $0xe8] sm:$0xff]  ;;  %vm3330_vm11 = vmmov %vm3328_vm6 }
 0x13f   :  { %v2912_v49 = vpop.permute.xlu0 %572  ;;  %v621_v4 = vsel %vm3326_vm5, %v2536_v63, %v613_v5  ;;  %v1266_v15 = vld [vmem:[#allocation2 + $0xe0] sm:$0xff]  ;;  %vm3331_vm5 = vcmask 752640  }
 0x140   :  { %v580_v27 = vsel %vm3327_vm2, %v571_v16, %v2912_v49  ;;  %v1283_v31 = vld [vmem:[#allocation2 + $0x168] sm:$0xff]  ;;  %632 = vst [vmem:[#allocation2 + $0x1c0] sm:$0x3f] %v621_v4 }
 0x141   :  { %591 = vst [vmem:[#allocation2 + $0x198] sm:$0xfc] %v580_v27  ;;  %v1373_v53 = vpack.c.bf16 %v1283_v31, %v1277_v29 }
 0x142   :  { %v661_v33 = vpop.permute.xlu1 %660 }
 0x143   :  { %v2918_v34 = vpop.permute.xlu0 %614  ;;  %1505 = vmatprep.subr.bf16.mxu1 %v1373_v53  ;;  %v1273_v56 = vld [vmem:[#allocation2 + $0x118] sm:$0xff]  ;;  %v669_v38 = vsel %vm3328_vm6, %v2551_v10, %v661_v33  ;;  %v1288_v41 = vld [vmem:[#allocation2 + $0x190] sm:$0xff] }
 0x144   :  { %v622_v63 = vsel %vm3329_vm3, %v613_v5, %v2918_v34  ;;  %1506 = vmatpush1.bf16.msra.mxu1 %v1372_v32  ;;  %v1369_v39 = vpack.c.bf16 %v1273_v56, %v1267_v36  ;;  %v1272_v51 = vld [vmem:[#allocation2 + $0x110] sm:$0xff]  ;;  %680 = vst [vmem:[#allocation2 + $0x1f0] ss:$-44 sps:$4 sm:$0xcf] %v669_v38  }
 0x145   :  { %633 = vst [vmem:[#allocation2 + $0x1c8] sm:$0x3f] %v622_v63  ;;  %v1368_v40 = vpack.c.bf16 %v1272_v51, %v1266_v15 }
 0x146   :  { %1546 = vmatprep.subr.bf16.mxu0 %v1369_v39  ;;  %v419_v44 = vpop.permute.xlu1 %418 }
 0x147   :  { %v663_v45 = vpop.permute.xlu0 %662  ;;  %1547 = vmatpush1.bf16.msra.mxu0 %v1368_v40  ;;  %v425_v52 = vsel %vm420_vm9, %v2890_v60, %v419_v44  ;;  %437 = vst.msk [vmem:[#allocation2 + $0x148] sm:$0x3f] %vm35_vm8, %v419_v44  ;;  %vm3332_vm9 = vcmask 719872  }
 0x148   :  { %v670_v10 = vsel %vm3330_vm11, %v661_v33, %v663_v45  ;;  %436 = vst [vmem:[#allocation2 + $0x140] sm:$0x3f] %v425_v52  ;;  %vm3333_vm2 = vmmov %vm3332_vm9  ;;  %v1289_v61 = vld [vmem:[#allocation2 + $0x198] sm:$0xff]  ;;  %vm3336_vm11 = vcmask 744448  }
 0x149   :  { %681 = vst [vmem:[#allocation2 + $0x1f8] ss:$-44 sps:$4 sm:$0xcf] %v670_v10  }
 0x14a   :  { %v521_v6 = vpop.permute.xlu1 %520 }
 0x14b   :  { %v467_v47 = vpop.permute.xlu0 %466  ;;  %v527_v50 = vsel %vm3331_vm5, %v519_v12, %v521_v6  ;;  %539 = vst.msk [vmem:[#allocation2 + $0x178] sm:$0xf0] %vm140_vm13, %v521_v6  ;;  %v1294_v60 = vld [vmem:[#allocation2 + $0x1c0] sm:$0xff]  ;;  %vm3337_vm5 = vcmask 596992  }
 0x14c   :  { %545 = vst.msk [vmem:[#allocation2 + $0x1a8] sm:$0x3] %vm147_vm14, %v521_v6  ;;  %v473_v54 = vsel %vm468_vm10, %v2896_v62, %v467_v47  ;;  %538 = vst [vmem:[#allocation2 + $0x1a0] ss:$-44 sps:$4 sm:$0xf3] %v527_v50   ;;  %v1378_v3 = vpack.c.bf16 %v1294_v60, %v1288_v41  ;;  %vm3334_vm10 = vcmask 605184  }
 0x14d   :  { %485 = vst.msk [vmem:[#allocation2 + $0x148] sm:$0xc0] %vm84_vm7, %v467_v47  ;;  %484 = vst [vmem:[#allocation2 + $0x170] ss:$-44 sps:$4 sm:$0xcf] %v473_v54  }
 0x14e   :  { %491 = vst.msk [vmem:[#allocation2 + $0x178] sm:$0xf] %vm91_vm12, %v467_v47  ;;  %v2935_v58 = vpop.permute.xlu1 %716  ;;  %vm3335_vm6 = vmmov %vm3334_vm10 }
 0x14f   :  { %v715_v25 = vpop.permute.xlu0 %714 }
 0x150   :  { %v723_v13 = vsel %vm3332_vm9, %v2579_v42, %v715_v25  ;;  %v724_v43 = vsel %vm3333_vm2, %v715_v25, %v2935_v58  ;;  %v1295_v1 = vld [vmem:[#allocation2 + $0x1c8] sm:$0xff]  ;;  %vm3338_vm9 = vcmask 728064   ;;  %vm3339_vm2 = vcmask 588800  }
 0x151   :  { %734 = vst [vmem:[#allocation2 + $0x220] ss:$-44 sps:$4 sm:$0xf3] %v723_v13   ;;  %735 = vst [vmem:[#allocation2 + $0x228] ss:$-44 sps:$4 sm:$0xf3] %v724_v43   ;;  %v1379_v62 = vpack.c.bf16 %v1295_v1, %v1289_v61 }
 0x152   :  { %v2941_v28 = vpop.permute.xlu1 %770 }
 0x153   :  { %v769_v7 = vpop.permute.xlu0 %768  ;;  %1507 = vmatprep.subr.bf16.mxu1 %v1379_v62 }
 0x154   :  { %v1279_v9 = vld [vmem:[#allocation2 + $0x148] sm:$0xff]  ;;  %v777_v21 = vsel %vm3334_vm10, %v2591_v48, %v769_v7  ;;  %v778_v42 = vsel %vm3335_vm6, %v769_v7, %v2941_v28  ;;  %1508 = vmatpush1.bf16.msra.mxu1 %v1378_v3  ;;  %v1278_v12 = vld [vmem:[#allocation2 + $0x140] sm:$0xff]  ;;  %v1284_v14 = vld [vmem:[#allocation2 + $0x170] sm:$0xff]  ;;  %vm3341_vm6 = vcmask 580608  }
 0x155   :  { %v1285_v26 = vld [vmem:[#allocation2 + $0x178] sm:$0xff]  ;;  %788 = vst [vmem:[#allocation2 + $0x220] sm:$0xfc] %v777_v21  ;;  %789 = vst [vmem:[#allocation2 + $0x228] sm:$0xfc] %v778_v42  ;;  %v1374_v37 = vpack.c.bf16 %v1284_v14, %v1278_v12 }
 0x156   :  { %v1375_v11 = vpack.c.bf16 %v1285_v26, %v1279_v9  ;;  %v617_v16 = vpop.permute.xlu1 %616  ;;  %vm3340_vm10 = vmmov %vm3337_vm5 }
 0x157   :  { %v575_v18 = vpop.permute.xlu0 %574  ;;  %v623_v20 = vsel %vm3329_vm3, %v2918_v34, %v617_v16  ;;  %635 = vst.msk [vmem:[#allocation2 + $0x1d8] sm:$0x3f] %vm35_vm8, %v617_v16  ;;  %vm3342_vm3 = vmmov %vm3339_vm2 }
 0x158   :  { %1548 = vmatprep.subr.bf16.mxu0 %v1375_v11  ;;  %v581_v48 = vsel %vm3336_vm11, %v2912_v49, %v575_v18  ;;  %593 = vst.msk [vmem:[#allocation2 + $0x1a8] sm:$0xfc] %vm196_vm0, %v575_v18  ;;  %634 = vst [vmem:[#allocation2 + $0x1d0] sm:$0x3f] %v623_v20  ;;  %v1301_v24 = vld [vmem:[#allocation2 + $0x1f8] sm:$0xff]  ;;  %v1300_v31 = vld [vmem:[#allocation2 + $0x1f0] sm:$0xff] }
 0x159   :  { %1549 = vmatpush1.bf16.msra.mxu0 %v1374_v37  ;;  %592 = vst [vmem:[#allocation2 + $0x1a0] sm:$0xfc] %v581_v48  ;;  %vm3343_vm11 = vcmask 719872  }
 0x15a   :  { %v811_v23 = vpop.permute.xlu1 %810 }
 0x15b   :  { %v665_v5 = vpop.permute.xlu0 %664  ;;  %v819_v4 = vsel %vm3337_vm5, %v2616_v8, %v811_v23  ;;  %vm3344_vm5 = vmmov %vm3341_vm6 }
 0x15c   :  { %v671_v27 = vsel %vm3338_vm9, %v663_v45, %v665_v5  ;;  %683 = vst.msk [vmem:[#allocation2 + $0x1d8] sm:$0xc0] %vm84_vm7, %v665_v5  ;;  %v1307_v29 = vld [vmem:[#allocation2 + $0x228] sm:$0xff]  ;;  %v1306_v53 = vld [vmem:[#allocation2 + $0x220] sm:$0xff]  ;;  %830 = vst [vmem:[#allocation2 + $0x250] sm:$0x3f] %v819_v4 }
 0x15d   :  { %689 = vst.msk [vmem:[#allocation2 + $0x208] sm:$0xf] %vm91_vm12, %v665_v5  ;;  %682 = vst [vmem:[#allocation2 + $0x200] ss:$-44 sps:$4 sm:$0xcf] %v671_v27   ;;  %v1385_v49 = vpack.c.bf16 %v1307_v29, %v1301_v24  ;;  %v1384_v19 = vpack.c.bf16 %v1306_v53, %v1300_v31  ;;  %vm3345_vm9 = vcmask 572416  }
 0x15e   :  { %v859_v32 = vpop.permute.xlu1 %858 }
 0x15f   :  { %v2958_v33 = vpop.permute.xlu0 %812  ;;  %1509 = vmatprep.subr.bf16.mxu1 %v1385_v49  ;;  %v867_v8 = vsel %vm3339_vm2, %v2628_v22, %v859_v32  ;;  %v1291_v38 = vld [vmem:[#allocation2 + $0x1a8] sm:$0xff]  ;;  %vm3346_vm2 = vcmask 605184  }
 0x160   :  { %v820_v34 = vsel %vm3340_vm10, %v811_v23, %v2958_v33  ;;  %1510 = vmatpush1.bf16.msra.mxu1 %v1384_v19  ;;  %878 = vst [vmem:[#allocation2 + $0x280] ss:$-44 sps:$4 sm:$0xcf] %v867_v8   ;;  %v1290_v40 = vld [vmem:[#allocation2 + $0x1a0] sm:$0xff]  ;;  %vm3347_vm10 = vcmask 457728  }
 0x161   :  { %831 = vst [vmem:[#allocation2 + $0x258] sm:$0x3f] %v820_v34 }
 0x162   :  { %v913_v36 = vpop.permute.xlu1 %912 }
 0x163   :  { %v2964_v56 = vpop.permute.xlu0 %860  ;;  %v1297_v63 = vld [vmem:[#allocation2 + $0x1d8] sm:$0xff]  ;;  %v921_v39 = vsel %vm3341_vm6, %v2640_v35, %v913_v36  ;;  %vm3348_vm6 = vmmov %vm3345_vm9 }
 0x164   :  { %v868_v15 = vsel %vm3342_vm3, %v859_v32, %v2964_v56  ;;  %v1381_v51 = vpack.c.bf16 %v1297_v63, %v1291_v38  ;;  %v1296_v22 = vld [vmem:[#allocation2 + $0x1d0] sm:$0xff]  ;;  %932 = vst [vmem:[#allocation2 + $0x2b0] ss:$-44 sps:$4 sm:$0xf3] %v921_v39   ;;  %vm3349_vm3 = vcmask 449536  }
 0x165   :  { %879 = vst [vmem:[#allocation2 + $0x288] ss:$-44 sps:$4 sm:$0xcf] %v868_v15   ;;  %v1380_v44 = vpack.c.bf16 %v1296_v22, %v1290_v40 }
 0x166   :  { %1550 = vmatprep.subr.bf16.mxu0 %v1381_v51  ;;  %v719_v45 = vpop.permute.xlu1 %718 }
 0x167   :  { %v915_v52 = vpop.permute.xlu0 %914  ;;  %1551 = vmatpush1.bf16.msra.mxu0 %v1380_v44  ;;  %v725_v10 = vsel %vm3343_vm11, %v2935_v58, %v719_v45  ;;  %737 = vst.msk [vmem:[#allocation2 + $0x208] sm:$0xf0] %vm140_vm13, %v719_v45  ;;  %v1312_v62 = vld [vmem:[#allocation2 + $0x250] sm:$0xff]  ;;  %vm3350_vm11 = vmmov %vm3347_vm10 }
 0x168   :  { %743 = vst.msk [vmem:[#allocation2 + $0x238] sm:$0x3] %vm147_vm14, %v719_v45  ;;  %v922_v35 = vsel %vm3344_vm5, %v913_v36, %v915_v52  ;;  %736 = vst [vmem:[#allocation2 + $0x230] ss:$-44 sps:$4 sm:$0xf3] %v725_v10   ;;  %vm3351_vm5 = vcmask 596992  }
 0x169   :  { %933 = vst [vmem:[#allocation2 + $0x2b8] ss:$-44 sps:$4 sm:$0xf3] %v922_v35  }
 0x16a   :  { %v967_v6 = vpop.permute.xlu1 %966 }
 0x16b   :  { %v773_v47 = vpop.permute.xlu0 %772  ;;  %v975_v50 = vsel %vm3345_vm9, %v2660_v55, %v967_v6  ;;  %v1318_v60 = vld [vmem:[#allocation2 + $0x280] sm:$0xff]  ;;  %vm3352_vm9 = vmmov %vm3349_vm3 }
 0x16c   :  { %v779_v54 = vsel %vm3346_vm2, %v2941_v28, %v773_v47  ;;  %791 = vst.msk [vmem:[#allocation2 + $0x238] sm:$0xfc] %vm196_vm0, %v773_v47  ;;  %986 = vst [vmem:[#allocation2 + $0x2b0] sm:$0xfc] %v975_v50  ;;  %v1313_v61 = vld [vmem:[#allocation2 + $0x258] sm:$0xff]  ;;  %v1390_v41 = vpack.c.bf16 %v1318_v60, %v1312_v62  ;;  %vm3353_vm2 = vcmask 580608  }
 0x16d   :  { %790 = vst [vmem:[#allocation2 + $0x230] sm:$0xfc] %v779_v54 }
 0x16e   :  { %v1009_v58 = vpop.permute.xlu1 %1008  ;;  %v1303_v7 = vld [vmem:[#allocation2 + $0x208] sm:$0xff] }
 0x16f   :  { %v2980_v25 = vpop.permute.xlu0 %968  ;;  %v1017_v13 = vsel %vm3347_vm10, %v2672_v2, %v1009_v58  ;;  %v1302_v42 = vld [vmem:[#allocation2 + $0x200] sm:$0xff]  ;;  %vm3354_vm10 = vcmask 588800  }
 0x170   :  { %v976_v43 = vsel %vm3348_vm6, %v967_v6, %v2980_v25  ;;  %v1319_v1 = vld [vmem:[#allocation2 + $0x288] sm:$0xff]  ;;  %1028 = vst [vmem:[#allocation2 + $0x2e0] sm:$0x3f] %v1017_v13  ;;  %vm3355_vm6 = vcmask 441344  }
 0x171   :  { %987 = vst [vmem:[#allocation2 + $0x2b8] sm:$0xfc] %v976_v43  ;;  %v1391_v55 = vpack.c.bf16 %v1319_v1, %v1313_v61 }
 0x172   :  { %v1057_v3 = vpop.permute.xlu1 %1056 }
 0x173   :  { %v2986_v28 = vpop.permute.xlu0 %1010  ;;  %1511 = vmatprep.subr.bf16.mxu1 %v1391_v55  ;;  %v1309_v9 = vld [vmem:[#allocation2 + $0x238] sm:$0xff]  ;;  %v1065_v26 = vsel %vm3349_vm3, %v2687_v17, %v1057_v3  ;;  %vm3356_vm3 = vmmov %vm3355_vm6  ;;  %v1324_v19 = vld [vmem:[#allocation2 + $0x2b0] sm:$0xff] }
 0x174   :  { %v1018_v2 = vsel %vm3350_vm11, %v1009_v58, %v2986_v28  ;;  %1512 = vmatpush1.bf16.msra.mxu1 %v1390_v41  ;;  %v1387_v21 = vpack.c.bf16 %v1309_v9, %v1303_v7  ;;  %v1308_v11 = vld [vmem:[#allocation2 + $0x230] sm:$0xff]  ;;  %1076 = vst [vmem:[#allocation2 + $0x310] ss:$-44 sps:$4 sm:$0xcf] %v1065_v26   ;;  %vm3357_vm11 = vcmask 433152  }
 0x175   :  { %1029 = vst [vmem:[#allocation2 + $0x2e8] sm:$0x3f] %v1018_v2  ;;  %v1386_v12 = vpack.c.bf16 %v1308_v11, %v1302_v42 }
 0x176   :  { %1552 = vmatprep.subr.bf16.mxu0 %v1387_v21  ;;  %v815_v14 = vpop.permute.xlu1 %814 }
 0x177   :  { %v1059_v37 = vpop.permute.xlu0 %1058  ;;  %1553 = vmatpush1.bf16.msra.mxu0 %v1386_v12  ;;  %v821_v16 = vsel %vm3351_vm5, %v2958_v33, %v815_v14  ;;  %833 = vst.msk [vmem:[#allocation2 + $0x268] sm:$0x3f] %vm35_vm8, %v815_v14  ;;  %vm3358_vm5 = vmmov %vm3357_vm11 }
 0x178   :  { %v1066_v17 = vsel %vm3352_vm9, %v1057_v3, %v1059_v37  ;;  %832 = vst [vmem:[#allocation2 + $0x260] sm:$0x3f] %v821_v16  ;;  %v1325_v31 = vld [vmem:[#allocation2 + $0x2b8] sm:$0xff]  ;;  %vm3359_vm9 = vcmask 457728  }
 0x179   :  { %1077 = vst [vmem:[#allocation2 + $0x318] ss:$-44 sps:$4 sm:$0xcf] %v1066_v17  }
 0x17a   :  { %v917_v18 = vpop.permute.xlu1 %916 }
 0x17b   :  { %v863_v20 = vpop.permute.xlu0 %862  ;;  %v923_v48 = vsel %vm3353_vm2, %v915_v52, %v917_v18  ;;  %935 = vst.msk [vmem:[#allocation2 + $0x298] sm:$0xf0] %vm140_vm13, %v917_v18  ;;  %v1330_v4 = vld [vmem:[#allocation2 + $0x2e0] sm:$0xff]  ;;  %vm3360_vm2 = vcmask 572416  }
 0x17c   :  { %941 = vst.msk [vmem:[#allocation2 + $0x2c8] sm:$0x3] %vm147_vm14, %v917_v18  ;;  %v869_v23 = vsel %vm3354_vm10, %v2964_v56, %v863_v20  ;;  %934 = vst [vmem:[#allocation2 + $0x2c0] ss:$-44 sps:$4 sm:$0xf3] %v923_v48   ;;  %v1396_v32 = vpack.c.bf16 %v1330_v4, %v1324_v19  ;;  %vm3361_vm10 = vcmask 424960  }
 0x17d   :  { %881 = vst.msk [vmem:[#allocation2 + $0x268] sm:$0xc0] %vm84_vm7, %v863_v20  ;;  %880 = vst [vmem:[#allocation2 + $0x290] ss:$-44 sps:$4 sm:$0xcf] %v869_v23  }
 0x17e   :  { %887 = vst.msk [vmem:[#allocation2 + $0x298] sm:$0xf] %vm91_vm12, %v863_v20  ;;  %v1113_v5 = vpop.permute.xlu1 %1112 }
 0x17f   :  { %v1111_v24 = vpop.permute.xlu0 %1110 }
 0x180   :  { %v1119_v27 = vsel %vm3355_vm6, %v2715_v57, %v1111_v24  ;;  %v1120_v29 = vsel %vm3356_vm3, %v1111_v24, %v1113_v5  ;;  %v1331_v53 = vld [vmem:[#allocation2 + $0x2e8] sm:$0xff]  ;;  %vm3362_vm6 = vcmask 449536  }
 0x181   :  { %1130 = vst [vmem:[#allocation2 + $0x340] ss:$-44 sps:$4 sm:$0xf3] %v1119_v27   ;;  %1131 = vst [vmem:[#allocation2 + $0x348] ss:$-44 sps:$4 sm:$0xf3] %v1120_v29   ;;  %v1397_v49 = vpack.c.bf16 %v1331_v53, %v1325_v31  ;;  %v1587_v53 = vlaneseq }
 0x182   :  { %v1167_v33 = vpop.permute.xlu1 %1166 }
 0x183   :  { %v1165_v8 = vpop.permute.xlu0 %1164  ;;  %1513 = vmatprep.subr.bf16.mxu1 %v1397_v49  ;;  %v1588_v49 = vshrl.u32 %v1587_v53, 7 }
 0x184   :  { %v1315_v34 = vld [vmem:[#allocation2 + $0x268] sm:$0xff]  ;;  %v1173_v56 = vsel %vm3357_vm11, %v2727_v0, %v1165_v8  ;;  %v1174_v38 = vsel %vm3358_vm5, %v1165_v8, %v1167_v33  ;;  %1514 = vmatpush1.bf16.msra.mxu1 %v1396_v32  ;;  %v1314_v63 = vld [vmem:[#allocation2 + $0x260] sm:$0xff]  ;;  %v1320_v39 = vld [vmem:[#allocation2 + $0x290] sm:$0xff] }
 0x185   :  { %v1321_v36 = vld [vmem:[#allocation2 + $0x298] sm:$0xff]  ;;  %1184 = vst [vmem:[#allocation2 + $0x340] sm:$0xfc] %v1173_v56  ;;  %1185 = vst [vmem:[#allocation2 + $0x348] sm:$0xfc] %v1174_v38  ;;  %v1392_v15 = vpack.c.bf16 %v1320_v39, %v1314_v63  ;;  %v1589_v19 = vsub.s32 0, %v1588_v49 }
 0x186   :  { %v1393_v57 = vpack.c.bf16 %v1321_v36, %v1315_v34  ;;  %v1013_v51 = vpop.permute.xlu1 %1012  ;;  %vm3363_vm11 = vmmov %vm3361_vm10  ;;  %v1593_v32 = vsub.s32 1, %v1588_v49  ;;  %v1585_v8 = vld [vmem:[%s3280_s5] sm:$0x3f]  ;;  %v1597_v36 = vsub.s32 2, %v1588_v49 }
 0x187   :  { %v971_v40 = vpop.permute.xlu0 %970  ;;  %v1019_v22 = vsel %vm3359_vm9, %v2986_v28, %v1013_v51  ;;  %1031 = vst.msk [vmem:[#allocation2 + $0x2f8] sm:$0x3f] %vm35_vm8, %v1013_v51  ;;  %v3037_v56 = vrot.slane %v1585_v8, %v1589_v19 }
 0x188   :  { %1554 = vmatprep.subr.bf16.mxu0 %v1393_v57  ;;  %v977_v0 = vsel %vm3360_vm2, %v2980_v25, %v971_v40  ;;  %989 = vst.msk [vmem:[#allocation2 + $0x2c8] sm:$0xfc] %vm196_vm0, %v971_v40  ;;  %1030 = vst [vmem:[#allocation2 + $0x2f0] sm:$0x3f] %v1019_v22  ;;  %v1337_v52 = vld [vmem:[#allocation2 + $0x318] sm:$0xff]  ;;  %v1336_v47 = vld [vmem:[#allocation2 + $0x310] sm:$0xff]  ;;  %v3039_v38 = vrot.slane %v1585_v8, %v1593_v32  ;;  %v3045_v51 = vrot.slane %v1585_v8, %v1597_v36 }
 0x189   :  { %1555 = vmatpush1.bf16.msra.mxu0 %v1392_v15  ;;  %988 = vst [vmem:[#allocation2 + $0x2c0] sm:$0xfc] %v977_v0  ;;  %v1601_v15 = vsub.s32 3, %v1588_v49 }
 0x18a   :  { %v1207_v44 = vpop.permute.xlu1 %1206 }
 0x18b   :  { %v1061_v45 = vpop.permute.xlu0 %1060  ;;  %v1215_v10 = vsel %vm3361_vm10, %v2780_v59, %v1207_v44 }
 0x18c   :  { %v1067_v35 = vsel %vm3362_vm6, %v1059_v37, %v1061_v45  ;;  %1079 = vst.msk [vmem:[#allocation2 + $0x2f8] sm:$0xc0] %vm84_vm7, %v1061_v45  ;;  %v1343_v6 = vld [vmem:[#allocation2 + $0x348] sm:$0xff]  ;;  %v1342_v50 = vld [vmem:[#allocation2 + $0x340] sm:$0xff]  ;;  %1226 = vst [vmem:[#allocation2 + $0x370] sm:$0x3f] %v1215_v10 }
 0x18d   :  { %1085 = vst.msk [vmem:[#allocation2 + $0x328] sm:$0xf] %vm91_vm12, %v1061_v45  ;;  %1078 = vst [vmem:[#allocation2 + $0x320] ss:$-44 sps:$4 sm:$0xcf] %v1067_v35   ;;  %v1403_v54 = vpack.c.bf16 %v1343_v6, %v1337_v52  ;;  %v1402_v58 = vpack.c.bf16 %v1342_v50, %v1336_v47  ;;  %v3053_v6 = vrot.slane %v1585_v8, %v1601_v15  ;;  %v1605_v50 = vsub.s32 4, %v1588_v49 }
 0x18e   :  { %v1115_v25 = vpop.permute.xlu1 %1114  ;;  %vm3364_vm7 = vmmov %vm3361_vm10 }
 0x18f   :  { %v1209_v60 = vpop.permute.xlu0 %1208  ;;  %1515 = vmatprep.subr.bf16.mxu1 %v1403_v54  ;;  %v1121_v13 = vsel %vm3356_vm3, %v1113_v5, %v1115_v25  ;;  %1133 = vst.msk [vmem:[#allocation2 + $0x328] sm:$0xf0] %vm140_vm13, %v1115_v25  ;;  %v1327_v1 = vld [vmem:[#allocation2 + $0x2c8] sm:$0xff]  ;;  %vm3365_vm12 = vmmov %vm3358_vm5  ;;  %vm1790_vm13 = vcmask 1047616  }
 0x190   :  { %1139 = vst.msk [vmem:[#allocation2 + $0x358] sm:$0x3] %vm147_vm14, %v1115_v25  ;;  %v1216_v59 = vsel %vm3363_vm11, %v1207_v44, %v1209_v60  ;;  %1516 = vmatpush1.bf16.msra.mxu1 %v1402_v58  ;;  %1132 = vst [vmem:[#allocation2 + $0x350] ss:$-44 sps:$4 sm:$0xf3] %v1121_v13   ;;  %v1326_v28 = vld [vmem:[#allocation2 + $0x2c0] sm:$0xff] }
 0x191   :  { %1227 = vst [vmem:[#allocation2 + $0x378] sm:$0x3f] %v1216_v59 }
 0x192   :  { %v1211_v43 = vpop.permute.xlu1 %1210 }
 0x193   :  { %v1169_v61 = vpop.permute.xlu0 %1168  ;;  %v1333_v55 = vld [vmem:[#allocation2 + $0x2f8] sm:$0xff]  ;;  %v1217_v62 = vsel %vm3364_vm7, %v1209_v60, %v1211_v43  ;;  %1229 = vst.msk [vmem:[#allocation2 + $0x388] sm:$0x3f] %vm35_vm8, %v1211_v43  ;;  %v1348_v9 = vld [vmem:[#allocation2 + $0x370] sm:$0xff]  ;;  %vm1633_vm8 = vcmask 64512   ;;  %v1609_v60 = vsub.s32 5, %v1588_v49 }
 0x194   :  { %v1175_v41 = vsel %vm3365_vm12, %v1167_v33, %v1169_v61  ;;  %1187 = vst.msk [vmem:[#allocation2 + $0x358] sm:$0xfc] %vm196_vm0, %v1169_v61  ;;  %v1399_v3 = vpack.c.bf16 %v1333_v55, %v1327_v1  ;;  %v1332_v7 = vld [vmem:[#allocation2 + $0x2f0] sm:$0xff]  ;;  %1228 = vst [vmem:[#allocation2 + $0x380] sm:$0x3f] %v1217_v62  ;;  %v1408_v2 = vpack.c.bf16 %v1348_v9, %v1348_v9 }
 0x195   :  { %1186 = vst [vmem:[#allocation2 + $0x350] sm:$0xfc] %v1175_v41  ;;  %v1398_v26 = vpack.c.bf16 %v1332_v7, %v1326_v28  ;;  %v3058_v62 = vrot.slane %v1585_v8, %v1605_v50 }
 0x196   :  { %1556 = vmatprep.subr.bf16.mxu0 %v1399_v3  ;;  %v1445_v11 = vsel %vm1437_vm15, %v1408_v2, 0  ;;  %v1339_v12 = vld [vmem:[#allocation2 + $0x328] sm:$0xff]  ;;  %v3060_v3 = vrot.slane %v1585_v8, %v1609_v60 }
 0x197   :  { %1557 = vmatpush1.bf16.msra.mxu0 %v1398_v26  ;;  %v1338_v17 = vld [vmem:[#allocation2 + $0x320] sm:$0xff] }
 0x198   :  { %v1349_v21 = vld [vmem:[#allocation2 + $0x378] sm:$0xff] }
 0x199   :  { %v1409_v42 = vpack.c.bf16 %v1349_v21, %v1349_v21 }
 0x19a   :  { %v1351_v37 = vld [vmem:[#allocation2 + $0x388] sm:$0xff] }
 0x19b   :  { %1979 = vmatprep.subr.msk.bf16.mxu1 %vm1437_vm15, %v1409_v42  ;;  %v1345_v14 = vld [vmem:[#allocation2 + $0x358] sm:$0xff]  ;;  %v1411_v20 = vpack.c.bf16 %v1351_v37, %v1351_v37  ;;  %v1350_v48 = vld [vmem:[#allocation2 + $0x380] sm:$0xff] }
 0x19c   :  { %1518 = vmatpush1.bf16.msra.mxu1 %v1445_v11  ;;  %v1405_v16 = vpack.c.bf16 %v1345_v14, %v1339_v12  ;;  %v1344_v18 = vld [vmem:[#allocation2 + $0x350] sm:$0xff]  ;;  %v1410_v5 = vpack.c.bf16 %v1350_v48, %v1350_v48 }
 0x19d   :  { %v1404_v23 = vpack.c.bf16 %v1344_v18, %v1338_v17 }
 0x19e   :  { %1558 = vmatprep.subr.bf16.mxu0 %v1405_v16  ;;  %v1451_v24 = vsel %vm1437_vm15, %v1410_v5, 0 }
 0x19f   :  { %1532 = vmatmul.mubr.bf16.vlgmr.msra.gmra.mrb[0].mxu1 %v2828_v46  ;;  %1559 = vmatpush1.bf16.msra.mxu0 %v1404_v23 }
 0x1a0   :  { %1981 = vmatprep.subr.msk.bf16.mxu0 %vm1437_vm15, %v1411_v20 }
 0x1a3   :  { %1561 = vmatpush1.bf16.msra.mxu0 %v1451_v24 }
 0x1a4   :  { %v1417_v33 = vpop.permute.xlu0 %1416 }
 0x1a5   :  { %v1422_v34 = vpop.permute.xlu1 %1421 }
 0x1a6   :  { %1575 = vmatmul.mubr.bf16.vlgmr.msra.gmra.mrb[4].mxu0 %v2828_v46 }
 0x1ee   :  { %v1490_v4 = vpop.f32.mrb[0].mxu0 }
 0x1ef   :  { %v1492_v27 = vpop.f32.mrb[1].mxu0  ;;  %v1491_v46 = vadd.f32 %v1490_v4, %v1417_v33 }
 0x1f0   :  { %v1494_v29 = vpop.f32.mrb[2].mxu0  ;;  %v1493_v57 = vadd.f32 %v1492_v27, %v1417_v33 }
 0x1f1   :  { %v1496_v31 = vpop.f32.mrb[3].mxu0  ;;  %v3041_v63 = vadd.f32 %v1494_v29, %v1422_v34  ;;  %v1617_v22 = vmul.f32 %v3037_v56, %v1491_v46  ;;  %v1719_v29 = vld [vmem:[%s3281_s3 + $0x8] sm:$0xff] }
 0x1f2   :  { %v3043_v39 = vadd.f32 %v1496_v31, %v1422_v34  ;;  %v1618_v0 = vmul.f32 %v3039_v38, %v1493_v57  ;;  %v1718_v31 = vld [vmem:[%s3281_s3] sm:$0xff] }
 0x1f3   :  { %v1623_v44 = vmul.f32 %v3037_v56, %v3041_v63 }
 0x1f4   :  { %v1624_v10 = vmul.f32 %v3039_v38, %v3043_v39  ;;  %v1629_v13 = vadd.f32 %v1618_v0, %v1617_v22 }
 0x1f6   :  { %v1638_v61 = vadd.f32 %v1624_v10, %v1623_v44 }
 0x272   :  { %v1533_v40 = vpop.f32.mrb[0].mxu1 }
 0x273   :  { %v1534_v45 = vadd.f32 %v1533_v40, %v1417_v33  ;;  %v1535_v52 = vpop.f32.mrb[1].mxu1 }
 0x274   :  { %v1536_v35 = vadd.f32 %v1535_v52, %v1417_v33  ;;  %v1537_v47 = vpop.f32.mrb[2].mxu1 }
 0x275   :  { %v1619_v54 = vmul.f32 %v3045_v51, %v1534_v45  ;;  %v1538_v58 = vadd.f32 %v1537_v47, %v1422_v34  ;;  %v1539_v25 = vpop.f32.mrb[3].mxu1 }
 0x276   :  { %v1540_v59 = vadd.f32 %v1539_v25, %v1422_v34  ;;  %v1620_v55 = vmul.f32 %v3053_v6, %v1536_v35 }
 0x277   :  { %v1625_v43 = vmul.f32 %v3045_v51, %v1538_v58  ;;  %v1630_v1 = vadd.f32 %v1629_v13, %v1619_v54 }
 0x278   :  { %v1626_v7 = vmul.f32 %v3053_v6, %v1540_v59 }
 0x279   :  { %v1576_v41 = vpop.f32.mrb[4].mxu0  ;;  %v1639_v28 = vadd.f32 %v1638_v61, %v1625_v43  ;;  %v1631_v42 = vadd.f32 %v1630_v1, %v1620_v55 }
 0x27a   :  { %v1577_v9 = vadd.f32 %v1576_v41, %v1417_v33  ;;  %v1578_v26 = vpop.f32.mrb[5].mxu0 }
 0x27b   :  { %v1579_v2 = vadd.f32 %v1578_v26, %v1417_v33  ;;  %v1580_v21 = vpop.f32.mrb[6].mxu0  ;;  %v1640_v17 = vadd.f32 %v1639_v28, %v1626_v7 }
 0x27c   :  { %v1621_v11 = vmul.f32 %v3058_v62, %v1577_v9  ;;  %v1581_v12 = vadd.f32 %v1580_v21, %v1422_v34  ;;  %v1582_v14 = vpop.f32.mrb[7].mxu0 }
 0x27d   :  { %v1622_v37 = vmul.f32 %v3060_v3, %v1579_v2  ;;  %v1583_v16 = vadd.f32 %v1582_v14, %v1422_v34 }
 0x27e   :  { %v1632_v18 = vadd.f32 %v1631_v42, %v1621_v11  ;;  %v1627_v20 = vmul.f32 %v3058_v62, %v1581_v12 }
 0x27f   :  { %v1634_v48 = vsel %vm1633_vm8, %v1622_v37, 0.0  ;;  %v1628_v23 = vmul.f32 %v3060_v3, %v1583_v16 }
 0x280   :  { %v1641_v5 = vadd.f32 %v1640_v17, %v1627_v20  ;;  %v1635_v24 = vadd.f32 %v1634_v48, %v1632_v18 }
 0x281   :  { %v1642_v4 = vsel %vm1633_vm8, %v1628_v23, 0.0 }
 0x282   :  { %1636 = vadd.xlane.f32.xlu1 %v1635_v24  ;;  %v1643_v27 = vadd.f32 %v1642_v4, %v1641_v5 }
 0x284   :  { %1644 = vadd.xlane.f32.xlu0 %v1643_v27 }
 0x293   :  { %1727 = vperm.xlu1 %2010, %v1719_v29  }
 0x29a   :  { %1722 = vperm.xlu0 %2009, %v1718_v31  }
 0x30f   :  { %v1637_v53 = vpop.xlane.xlu1 %1636 }
 0x310   :  { %v1646_v49 = vmul.f32 0.0025510204, %v1637_v53 }
 0x311   :  { %v1645_v19 = vpop.xlane.xlu0 %1644 }
 0x312   :  { %v1647_v32 = vmul.f32 0.0025510204, %v1645_v19  ;;  %v3075_v33 = vsub.f32 %v1491_v46, %v1646_v49  ;;  %v3077_v8 = vsub.f32 %v1493_v57, %v1646_v49  ;;  %v3079_v34 = vsub.f32 %v1534_v45, %v1646_v49 }
 0x313   :  { %v3081_v36 = vsub.f32 %v1536_v35, %v1646_v49  ;;  %v3083_v15 = vsub.f32 %v1577_v9, %v1646_v49  ;;  %v3085_v40 = vsub.f32 %v1579_v2, %v1646_v49 }
 0x314   :  { %v1660_v22 = vmul.f32 %v3075_v33, %v3075_v33  ;;  %v1661_v0 = vmul.f32 %v3077_v8, %v3077_v8  ;;  %v1662_v46 = vmul.f32 %v3079_v34, %v3079_v34  ;;  %v3094_v57 = vsub.f32 %v3041_v63, %v1647_v32 }
 0x315   :  { %v3097_v44 = vsub.f32 %v3043_v39, %v1647_v32  ;;  %v1663_v45 = vmul.f32 %v3081_v36, %v3081_v36  ;;  %v3103_v35 = vsub.f32 %v1538_v58, %v1647_v32  ;;  %v1664_v47 = vmul.f32 %v3083_v15, %v3083_v15 }
 0x316   :  { %v1672_v52 = vmul.f32 %v1660_v22, %v3037_v56  ;;  %v1673_v10 = vmul.f32 %v1661_v0, %v3039_v38  ;;  %v1665_v50 = vmul.f32 %v3085_v40, %v3085_v40  ;;  %v3109_v63 = vsub.f32 %v1540_v59, %v1647_v32 }
 0x317   :  { %v1674_v39 = vmul.f32 %v1662_v46, %v3045_v51  ;;  %v3112_v25 = vsub.f32 %v1583_v16, %v1647_v32  ;;  %v1666_v60 = vmul.f32 %v3094_v57, %v3094_v57  ;;  %v3116_v13 = vsub.f32 %v1581_v12, %v1647_v32 }
 0x318   :  { %v1684_v54 = vadd.f32 %v1673_v10, %v1672_v52  ;;  %v1667_v58 = vmul.f32 %v3097_v44, %v3097_v44  ;;  %v1668_v43 = vmul.f32 %v3103_v35, %v3103_v35  ;;  %v1675_v61 = vmul.f32 %v1663_v45, %v3053_v6 }
 0x319   :  { %v1678_v1 = vmul.f32 %v1666_v60, %v3037_v56  ;;  %v1677_v55 = vmul.f32 %v1665_v50, %v3060_v3  ;;  %v1669_v41 = vmul.f32 %v3109_v63, %v3109_v63  ;;  %v1676_v7 = vmul.f32 %v1664_v47, %v3058_v62 }
 0x31a   :  { %v1685_v59 = vadd.f32 %v1684_v54, %v1674_v39  ;;  %v1679_v28 = vmul.f32 %v1667_v58, %v3039_v38  ;;  %v1671_v26 = vmul.f32 %v3112_v25, %v3112_v25  ;;  %v1670_v2 = vmul.f32 %v3116_v13, %v3116_v13 }
 0x31b   :  { %v1680_v21 = vmul.f32 %v1668_v43, %v3045_v51  ;;  %v1688_v11 = vsel %vm1633_vm8, %v1677_v55, 0.0  ;;  %v1681_v12 = vmul.f32 %v1669_v41, %v3053_v6  ;;  %v1742_v51 = vld [vmem:[%s3282_s4] sm:$0xff]  ;;  %v1743_v6 = vld [vmem:[%s3282_s4 + $0x8] sm:$0xff] }
 0x31c   :  { %v1686_v9 = vadd.f32 %v1685_v59, %v1675_v61  ;;  %v1692_v42 = vadd.f32 %v1679_v28, %v1678_v1  ;;  %v1683_v38 = vmul.f32 %v1671_v26, %v3060_v3  ;;  %v1682_v16 = vmul.f32 %v1670_v2, %v3058_v62  ;;  %v1723_v3 = vpop.permute.xlu0 %1722  ;;  %v1728_v62 = vpop.permute.xlu1 %1727 }
 0x31e   :  { %v1687_v56 = vadd.f32 %v1686_v9, %v1676_v7  ;;  %v1693_v14 = vadd.f32 %v1692_v42, %v1680_v21  ;;  %v1696_v20 = vsel %vm1633_vm8, %v1683_v38, 0.0 }
 0x320   :  { %v1689_v37 = vadd.f32 %v1688_v11, %v1687_v56  ;;  %v1694_v17 = vadd.f32 %v1693_v14, %v1681_v12 }
 0x322   :  { %1690 = vadd.xlane.f32.xlu0 %v1689_v37  ;;  %v1695_v18 = vadd.f32 %v1694_v17, %v1682_v16 }
 0x324   :  { %v1697_v48 = vadd.f32 %v1696_v20, %v1695_v18 }
 0x326   :  { %1698 = vadd.xlane.f32.xlu1 %v1697_v48 }
 0x337   :  { %1746 = vperm.xlu1 %2010, %v1742_v51  }
 0x338   :  { %1751 = vperm.xlu0 %2009, %v1743_v6  }
 0x3af   :  { %v1691_v23 = vpop.xlane.xlu0 %1690 }
 0x3b0   :  { %v1700_v5 = vmul.f32 0.0025510204, %v1691_v23 }
 0x3b2   :  { %v1702_v24 = vadd.f32 1e-05, %v1700_v5 }
 0x3b3   :  { %v1699_v4 = vpop.xlane.xlu1 %1698 }
 0x3b4   :  { %2013 = vrsqrt.f32 %v1702_v24  ;;  %v1701_v27 = vmul.f32 0.0025510204, %v1699_v4 }
 0x3b6   :  { %v1703_v29 = vadd.f32 1e-05, %v1701_v27 }
 0x3b7   :  { %v1747_v39 = vpop.permute.xlu1 %1746  ;;  %v1752_v2 = vpop.permute.xlu0 %1751 }
 0x3b8   :  { %2015 = vrsqrt.f32 %v1703_v29 }
 0x3be   :  { %v2014_v31 = vpop.eup %2013 }
 0x3bf   :  { %v1706_v53 = vmul.f32 %v2014_v31, %v3075_v33  ;;  %v1707_v49 = vmul.f32 %v2014_v31, %v3077_v8  ;;  %v1708_v19 = vmul.f32 %v2014_v31, %v3079_v34  ;;  %v1709_v32 = vmul.f32 %v2014_v31, %v3081_v36 }
 0x3c0   :  { %v1710_v22 = vmul.f32 %v2014_v31, %v3083_v15  ;;  %v1711_v0 = vmul.f32 %v2014_v31, %v3085_v40 }
 0x3c1   :  { %v1730_v46 = vmul.f32 %v1723_v3, %v1706_v53  ;;  %v1731_v45 = vmul.f32 %v1723_v3, %v1707_v49  ;;  %v1732_v52 = vmul.f32 %v1723_v3, %v1708_v19  ;;  %v1733_v10 = vmul.f32 %v1723_v3, %v1709_v32 }
 0x3c2   :  { %v1734_v47 = vmul.f32 %v1723_v3, %v1710_v22  ;;  %v1735_v50 = vmul.f32 %v1723_v3, %v1711_v0  ;;  %v2016_v54 = vpop.eup %2015 }
 0x3c3   :  { %v1754_v33 = vadd.f32 %v1747_v39, %v1730_v46  ;;  %v3151_v60 = vadd.f32 %v1747_v39, %v1731_v45  ;;  %v3153_v8 = vadd.f32 %v1747_v39, %v1732_v52  ;;  %v3155_v34 = vadd.f32 %v1747_v39, %v1733_v10 }
 0x3c4   :  { %v3157_v36 = vadd.f32 %v1747_v39, %v1734_v47  ;;  %v3159_v15 = vadd.f32 %v1747_v39, %v1735_v50  ;;  %v1712_v40 = vmul.f32 %v2016_v54, %v3094_v57  ;;  %v1713_v58 = vmul.f32 %v2016_v54, %v3097_v44 }
 0x3c5   :  { %v1766_v43 = vmax.f32 %v1754_v33, 0.0  ;;  %v1767_v61 = vmax.f32 %v3151_v60, 0.0  ;;  %v1768_v59 = vmax.f32 %v3153_v8, 0.0  ;;  %v1769_v1 = vmax.f32 %v3155_v34, 0.0 }
 0x3c6   :  { %v1770_v55 = vmax.f32 %v3157_v36, 0.0  ;;  %v1771_v41 = vmax.f32 %v3159_v15, 0.0  ;;  %v1714_v28 = vmul.f32 %v2016_v54, %v3103_v35  ;;  %v1715_v7 = vmul.f32 %v2016_v54, %v3109_v63 }
 0x3c7   :  { %v1716_v9 = vmul.f32 %v2016_v54, %v3116_v13  ;;  %v1717_v57 = vmul.f32 %v2016_v54, %v3112_v25  ;;  %v1736_v44 = vmul.f32 %v1728_v62, %v1712_v40  ;;  %v1737_v26 = vmul.f32 %v1728_v62, %v1713_v58  ;;  %1821 = vrot.lane.b32.xlu0 %v1767_v61, %s2018_s30 }
 0x3c8   :  { %1783 = vst.msk [vmem:[#allocation3 + $0x28] sm:$0xff] %vm1633_vm8, %v1771_v41  ;;  %v1738_v21 = vmul.f32 %v1728_v62, %v1714_v28  ;;  %v1739_v42 = vmul.f32 %v1728_v62, %v1715_v7  ;;  %1819 = vrot.lane.b32.xlu1 %v1766_v43, %s2018_s30 }
 0x3c9   :  { %1791 = vst.msk [vmem:[#allocation3 + $0x28] sm:$0xff] %vm1790_vm13, %v2040_v30  ;;  %v1740_v35 = vmul.f32 %v1728_v62, %v1716_v9  ;;  %v1741_v63 = vmul.f32 %v1728_v62, %v1717_v57  ;;  %v1760_v13 = vadd.f32 %v1752_v2, %v1736_v44  ;;  %v1761_v25 = vadd.f32 %v1752_v2, %v1737_v26 }
 0x3ca   :  { %v1762_v56 = vadd.f32 %v1752_v2, %v1738_v21  ;;  %v3179_v11 = vadd.f32 %v1752_v2, %v1739_v42 }
 0x3cb   :  { %v3181_v12 = vadd.f32 %v1752_v2, %v1740_v35  ;;  %v3183_v14 = vadd.f32 %v1752_v2, %v1741_v63  ;;  %v1772_v37 = vmax.f32 %v1760_v13, 0.0  ;;  %v1773_v38 = vmax.f32 %v1761_v25, 0.0  ;;  %1825 = vrot.lane.b32.xlu0 %v1769_v1, %s2018_s30 }
 0x3cc   :  { %v1774_v16 = vmax.f32 %v1762_v56, 0.0  ;;  %v1775_v17 = vmax.f32 %v3179_v11, 0.0  ;;  %1823 = vrot.lane.b32.xlu1 %v1768_v59, %s2018_s30 }
 0x3cd   :  { %v1776_v18 = vmax.f32 %v3181_v12, 0.0  ;;  %v1777_v20 = vmax.f32 %v3183_v14, 0.0 }
 0x3cf   :  { %1789 = vst.msk [vmem:[#allocation3 + $0x60] sm:$0xff] %vm1633_vm8, %v1777_v20 }
 0x3d0   :  { %1793 = vst.msk [vmem:[#allocation3 + $0x60] sm:$0xff] %vm1790_vm13, %v2040_v30  ;;  %v1800_v48 = vld [vmem:[#allocation3 + $0x28] sm:$0xff]  ;;  %1827 = vrot.lane.b32.xlu1 %v1770_v55, %s2018_s30 }
 0x3d1   :  { %1829 = vrot.lane.b32.xlu0 %v1800_v48, %s2018_s30 }
 0x3d4   :  { %1831 = vrot.lane.b32.xlu1 %v1772_v37, %s2018_s30 }
 0x3d5   :  { %1833 = vrot.lane.b32.xlu0 %v1773_v38, %s2018_s30 }
 0x3d7   :  { %v1806_v51 = vld [vmem:[#allocation3 + $0x60] sm:$0xff] }
 0x3d8   :  { %1835 = vrot.lane.b32.xlu1 %v1774_v16, %s2018_s30 }
 0x3d9   :  { %1837 = vrot.lane.b32.xlu0 %v1775_v17, %s2018_s30 }
 0x3dc   :  { %1839 = vrot.lane.b32.xlu1 %v1776_v18, %s2018_s30 }
 0x3dd   :  { %1841 = vrot.lane.b32.xlu0 %v1806_v51, %s2018_s30 }
 0x439   :  { %v1822_v6 = vpop.permute.xlu0 %1821 }
 0x43a   :  { %v1820_v30 = vpop.permute.xlu1 %1819 }
 0x43b   :  { %v1843_v3 = vsel %vm67_vm1, %v1820_v30, %v1822_v6 }
 0x43c   :  { %v1865_v23 = vmax.f32 %v1766_v43, %v1843_v3 }
 0x43d   :  { %v1826_v62 = vpop.permute.xlu0 %1825 }
 0x43e   :  { %1901 = vrot.lane.b32.xlu1 %v1865_v23, %s2021_s27  ;;  %v1824_v5 = vpop.permute.xlu1 %1823 }
 0x43f   :  { %v1844_v24 = vsel %vm67_vm1, %v1822_v6, %v1824_v5  ;;  %v1845_v4 = vsel %vm67_vm1, %v1824_v5, %v1826_v62 }
 0x440   :  { %v1866_v27 = vmax.f32 %v1767_v61, %v1844_v24  ;;  %v1867_v29 = vmax.f32 %v1768_v59, %v1845_v4 }
 0x442   :  { %1905 = vrot.lane.b32.xlu1 %v1867_v29, %s2021_s27  ;;  %1903 = vrot.lane.b32.xlu0 %v1866_v27, %s2021_s27  ;;  %v1828_v31 = vpop.permute.xlu1 %1827 }
 0x443   :  { %v1830_v53 = vpop.permute.xlu0 %1829  ;;  %v1846_v49 = vsel %vm67_vm1, %v1826_v62, %v1828_v31 }
 0x444   :  { %v1847_v19 = vsel %vm67_vm1, %v1828_v31, %v1830_v53  ;;  %v1868_v32 = vmax.f32 %v1769_v1, %v1846_v49  ;;  %v1882_v0 = vmax.f32 %v1800_v48, %v1830_v53  ;;  %v1870_v35 = vmax.f32 %v1771_v41, %v1830_v53 }
 0x445   :  { %v1869_v22 = vmax.f32 %v1770_v55, %v1847_v19 }
 0x446   :  { %1907 = vrot.lane.b32.xlu0 %v1868_v32, %s2021_s27  ;;  %v1832_v46 = vpop.permute.xlu1 %1831 }
 0x447   :  { %v1834_v45 = vpop.permute.xlu0 %1833  ;;  %1909 = vrot.lane.b32.xlu1 %v1869_v22, %s2021_s27 }
 0x448   :  { %v1848_v52 = vsel %vm67_vm1, %v1832_v46, %v1834_v45 }
 0x449   :  { %v1871_v10 = vmax.f32 %v1772_v37, %v1848_v52 }
 0x44a   :  { %1911 = vrot.lane.b32.xlu0 %v1882_v0, %s2021_s27  ;;  %v1836_v47 = vpop.permute.xlu1 %1835 }
 0x44b   :  { %v1838_v50 = vpop.permute.xlu0 %1837  ;;  %1913 = vrot.lane.b32.xlu1 %v1871_v10, %s2021_s27  ;;  %v1849_v39 = vsel %vm67_vm1, %v1834_v45, %v1836_v47 }
 0x44c   :  { %v1850_v54 = vsel %vm67_vm1, %v1836_v47, %v1838_v50  ;;  %v1872_v33 = vmax.f32 %v1773_v38, %v1849_v39 }
 0x44d   :  { %v1873_v60 = vmax.f32 %v1774_v16, %v1850_v54 }
 0x44e   :  { %1915 = vrot.lane.b32.xlu0 %v1872_v33, %s2021_s27  ;;  %v1840_v8 = vpop.permute.xlu1 %1839 }
 0x44f   :  { %v1842_v34 = vpop.permute.xlu0 %1841  ;;  %1917 = vrot.lane.b32.xlu1 %v1873_v60, %s2021_s27  ;;  %v1851_v36 = vsel %vm67_vm1, %v1838_v50, %v1840_v8 }
 0x450   :  { %v1852_v40 = vsel %vm67_vm1, %v1840_v8, %v1842_v34  ;;  %v1874_v58 = vmax.f32 %v1775_v17, %v1851_v36  ;;  %v1888_v61 = vmax.f32 %v1806_v51, %v1842_v34 }
 0x451   :  { %v1875_v43 = vmax.f32 %v1776_v18, %v1852_v40 }
 0x452   :  { %1919 = vrot.lane.b32.xlu0 %v1874_v58, %s2021_s27 }
 0x453   :  { %1921 = vrot.lane.b32.xlu1 %v1875_v43, %s2021_s27 }
 0x456   :  { %1923 = vrot.lane.b32.xlu0 %v1888_v61, %s2021_s27 }
 0x4b0   :  { %v1902_v59 = vpop.permute.xlu1 %1901 }
 0x4b4   :  { %v1904_v1 = vpop.permute.xlu0 %1903  ;;  %v1906_v55 = vpop.permute.xlu1 %1905 }
 0x4b5   :  { %v1925_v28 = vsel %vm270_vm4, %v1902_v59, %v1904_v1  ;;  %v1926_v7 = vsel %vm270_vm4, %v1904_v1, %v1906_v55 }
 0x4b6   :  { %v1947_v9 = vmax.f32 %v1865_v23, %v1925_v28  ;;  %v1948_v57 = vmax.f32 %v1866_v27, %v1926_v7  ;;  %v1876_v23 = vmax.f32 %v1777_v20, %v1842_v34 }
 0x4b8   :  { %1959 = vst [vmem:[%s3283_s6] sm:$0xff] %v1947_v9  ;;  %1960 = vst [vmem:[%s3283_s6 + $0x8] sm:$0xff] %v1948_v57  ;;  %v1908_v44 = vpop.permute.xlu0 %1907 }
 0x4b9   :  { %v1927_v26 = vsel %vm270_vm4, %v1906_v55, %v1908_v44  ;;  %v1910_v2 = vpop.permute.xlu1 %1909 }
 0x4ba   :  { %v1949_v21 = vmax.f32 %v1867_v29, %v1927_v26  ;;  %v1928_v42 = vsel %vm270_vm4, %v1908_v44, %v1910_v2 }
 0x4bb   :  { %v1950_v63 = vmax.f32 %v1868_v32, %v1928_v42 }
 0x4bc   :  { %1961 = vst [vmem:[%s3283_s6 + $0x10] sm:$0xff] %v1949_v21  ;;  %v1912_v13 = vpop.permute.xlu0 %1911 }
 0x4bd   :  { %1962 = vst [vmem:[%s3283_s6 + $0x18] sm:$0xff] %v1950_v63  ;;  %v1929_v25 = vsel %vm270_vm4, %v1910_v2, %v1912_v13  ;;  %v1952_v56 = vmax.f32 %v1870_v35, %v1912_v13  ;;  %v1914_v11 = vpop.permute.xlu1 %1913 }
 0x4be   :  { %v1951_v12 = vmax.f32 %v1869_v22, %v1929_v25 }
 0x4bf   :  { %1964 = vst.msk [vmem:[%s3283_s6 + $0x28] sm:$0xff] %vm1633_vm8, %v1952_v56 }
 0x4c0   :  { %1963 = vst [vmem:[%s3283_s6 + $0x20] sm:$0xff] %v1951_v12  ;;  %v1916_v15 = vpop.permute.xlu0 %1915 }
 0x4c1   :  { %v1930_v41 = vsel %vm270_vm4, %v1914_v11, %v1916_v15  ;;  %v1918_v37 = vpop.permute.xlu1 %1917 }
 0x4c2   :  { %v1953_v38 = vmax.f32 %v1871_v10, %v1930_v41  ;;  %v1931_v16 = vsel %vm270_vm4, %v1916_v15, %v1918_v37 }
 0x4c3   :  { %v1954_v17 = vmax.f32 %v1872_v33, %v1931_v16 }
 0x4c4   :  { %1965 = vst [vmem:[%s3283_s6 + $0x30] sm:$0xff] %v1953_v38  ;;  %v1920_v18 = vpop.permute.xlu0 %1919 }
 0x4c5   :  { %1966 = vst [vmem:[%s3283_s6 + $0x38] sm:$0xff] %v1954_v17  ;;  %v1932_v48 = vsel %vm270_vm4, %v1918_v37, %v1920_v18  ;;  %v1922_v51 = vpop.permute.xlu1 %1921 }
 0x4c6   :  { %v1955_v6 = vmax.f32 %v1873_v60, %v1932_v48  ;;  %v1933_v30 = vsel %vm270_vm4, %v1920_v18, %v1922_v51 }
 0x4c7   :  { %v1956_v3 = vmax.f32 %v1874_v58, %v1933_v30 }
 0x4c8   :  { %1967 = vst [vmem:[%s3283_s6 + $0x40] sm:$0xff] %v1955_v6  ;;  %v1924_v62 = vpop.permute.xlu0 %1923 }
 0x4c9   :  { %1968 = vst [vmem:[%s3283_s6 + $0x48] sm:$0xff] %v1956_v3  ;;  %v1934_v5 = vsel %vm270_vm4, %v1922_v51, %v1924_v62  ;;  %v1958_v24 = vmax.f32 %v1876_v23, %v1924_v62 }
 0x4ca   :  { %v1957_v4 = vmax.f32 %v1875_v43, %v1934_v5 }
 0x4cb   :  { %1970 = vst.msk [vmem:[%s3283_s6 + $0x58] sm:$0xff] %vm1633_vm8, %v1958_v24 }
 0x4cc   :  { %1969 = vst [vmem:[%s3283_s6 + $0x50] sm:$0xff] %v1957_v4 }

</bundles_post_ra>
